<compile_context>
chip_gen: v6e
topology: v6e:2x2x1
jax: 0.10.0
libtpu: 0.0.40
codegen_flags: <defaults>
</compile_context>

<pallas_src>
import functools

import jax
import jax.numpy as jnp
from jax.experimental import pallas as pl
from jax.experimental.pallas import tpu as pltpu

SELU_ALPHA = 1.6732632423543772848170429916717
SELU_SCALE = 1.0507009873554804934193349852946


def _vmem():
    return pl.BlockSpec(memory_space=pltpu.MemorySpace.VMEM)


def _smem():
    return pl.BlockSpec(memory_space=pltpu.MemorySpace.SMEM)


# ---------------------------------------------------------------------------
# Fused forward kernel.
#
# Row layout of stacked 2-D tensors: row = p*Bp + s*Bpad + b with
#   p = patch index, s = stream (0: proj*(1-mask), 1: proj*mask), b = batch
#   (batch padded to Bpad so Bp = 2*Bpad is a full sublane tile).
#
# Per-layer GRU refs (4 each):
#   wih_comb  (Din, 6H)  cols [r_f|z_f|n_f|r_b|z_b|n_b]
#   bias_comb (1, 6H)    = b_ih + b_hh for r,z gates folded in (n gets b_ih only)
#   whh_block (2H, 6H)   block-diagonal, cols [r_f|r_b|z_f|z_b|n_f|n_b]
#   bhh_n     (1, 2H)    = [b_hn_f | b_hn_b]
# ---------------------------------------------------------------------------
def _fused_kernel(num_layers, P, Bpad, H, ps, guide, *refs):
    f32 = jnp.float32
    Bp = 2 * Bpad
    H2, H3, H4, H5, H6 = 2 * H, 3 * H, 4 * H, 5 * H, 6 * H
    nG = 4 * num_layers

    (x_ref, mult2_ref, mult3_ref, bval_ref, raw_ref,
     wproj_ref, bproj_ref) = refs[:7]
    gru_refs = refs[7:7 + nG]
    whead_ref = refs[7 + nG]
    bhead_ref = refs[8 + nG]
    recons_ref = refs[9 + nG]
    sse_ref = refs[10 + nG]
    sse_raw_ref = refs[11 + nG]
    outf_scr = refs[12 + nG]     # (P, Bp, H) forward hidden outputs
    outb_scr = refs[13 + nG]     # (P, Bp, H) backward hidden outputs

    # --- patch projection + SELU + complementary masking (streams stacked) ---
    mult2 = mult2_ref[...]                               # (P*Bp, 1)
    h = jnp.dot(x_ref[...], wproj_ref[...],
                preferred_element_type=f32) + bproj_ref[...]
    h = SELU_SCALE * jnp.where(
        h > 0.0, h, SELU_ALPHA * (jnp.exp(jnp.minimum(h, 0.0)) - 1.0))
    cur = h * mult2                                      # (P*Bp, H)

    # --- bidirectional multi-layer GRU (PyTorch gate order r, z, n) ----------
    for l in range(num_layers):
        wih_ref, bias_ref, whh_ref, bhhn_ref = gru_refs[4 * l:4 * l + 4]

        # Hoisted input projection: ONE matmul per layer for both directions;
        # b_ih (all gates) and b_hh (r,z gates) are pre-folded into bias_ref.
        gi = jnp.dot(cur, wih_ref[...], preferred_element_type=f32) + bias_ref[...]
        gi3 = gi.reshape(P, Bp, H6)                      # (P, Bp, 6H)

        Whh = whh_ref[...]                               # (2H, 6H) block-diagonal
        bhh_n = bhhn_ref[...]                            # (1, 2H)

        hcat = jnp.zeros((Bp, H2), f32)                  # [h_fwd | h_bwd]
        # Fully unrolled static time loop: the only loop-carried dependency is
        # hcat; gi slab assembly below depends on t only and overlaps with the
        # previous step's MXU/EUP latency.
        for t in range(P):
            tb = P - 1 - t
            gf = gi3[t]                                  # fwd gates at time t
            gb = gi3[tb]                                 # bwd gates at time P-1-t
            # time-aligned, gate-interleaved input slabs (off the h chain)
            gi_rz = jnp.concatenate(
                [gf[:, 0:H], gb[:, H3:H4], gf[:, H:H2], gb[:, H4:H5]], axis=-1)
            gi_n = jnp.concatenate([gf[:, H2:H3], gb[:, H5:H6]], axis=-1)

            # ONE fused recurrent matmul for both directions and all 3 gates.
            ghh = jnp.dot(hcat, Whh, preferred_element_type=f32)   # (Bp, 6H)
            # ONE sigmoid over [r_f|r_b|z_f|z_b] (128 lanes), ONE tanh (64 lanes).
            rz = jax.nn.sigmoid(gi_rz + ghh[:, 0:H4])
            n = jnp.tanh(gi_n + rz[:, 0:H2] * (ghh[:, H4:H6] + bhh_n))
            z = rz[:, H2:H4]
            hcat = (1.0 - z) * n + z * hcat

            outf_scr[t] = hcat[:, 0:H]                   # fwd output at seq pos t
            outb_scr[tb] = hcat[:, H:H2]                 # bwd output at seq pos tb
        cur = jnp.concatenate([outf_scr[...], outb_scr[...]],
                              axis=-1).reshape(P * Bp, H2)
        # TODO(synk): GRU inter-layer dropout(p=0.1) omitted (eval semantics).

    # --- head + masked recombination + lane-dense output + MSE sums ----------
    R = jnp.dot(cur, whead_ref[...], preferred_element_type=f32) + bhead_ref[...]
    R3 = R.reshape(P, Bp, ps)
    mult3 = mult3_ref[...]                               # (P, Bp, 1)
    raw3 = raw_ref[...]                                  # (P, Bpad, ps)
    bv = bval_ref[...]                                   # (Bpad, ps) valid-batch mask

    # recons = R0*mask + R1*(1-mask) == sum over streams of R*(1-mult)
    Rrec = R3 * (1.0 - mult3)
    recons3 = Rrec[:, 0:Bpad, :] + Rrec[:, Bpad:Bp, :]   # (P, Bpad, ps)

    # lane-dense (Bpad, P*ps) output; patch->sequence assembly in-kernel.
    for p in range(P):
        recons_ref[:, p * ps:(p + 1) * ps] = recons3[p]

    sse_ref[0, 0] = jnp.sum(jnp.square(recons3 - raw3) * bv[None])
    if guide:
        # recon_raw = R0*(1-mask) + R1*mask == sum over streams of R*mult
        Rraw = R3 * mult3
        recon_raw3 = Rraw[:, 0:Bpad, :] + Rraw[:, Bpad:Bp, :]
        sse_raw_ref[0, 0] = jnp.sum(jnp.square(recon_raw3 - raw3) * bv[None])
    else:
        sse_raw_ref[0, 0] = jnp.float32(0.0)


def _build_fused_call(num_layers, P, Bpad, H, ps, guide):
    Bp = 2 * Bpad
    kernel = functools.partial(_fused_kernel, num_layers, P, Bpad, H, ps, guide)
    n_inputs = 9 + num_layers * 4
    return pl.pallas_call(
        kernel,
        out_shape=(jax.ShapeDtypeStruct((Bpad, P * ps), jnp.float32),
                   jax.ShapeDtypeStruct((1, 1), jnp.float32),
                   jax.ShapeDtypeStruct((1, 1), jnp.float32)),
        in_specs=[_vmem()] * n_inputs,
        out_specs=(_vmem(), _smem(), _smem()),
        scratch_shapes=[pltpu.VMEM((P, Bp, H), jnp.float32),
                        pltpu.VMEM((P, Bp, H), jnp.float32)],
    )


# ---------------------------------------------------------------------------
# Parameter init (deterministic; mirrors the shapes in __init__).
# ---------------------------------------------------------------------------
def xavier_uniform(key, shape, fan_in, fan_out):
    bound = (6.0 / (fan_in + fan_out)) ** 0.5
    return jax.random.uniform(key, shape, jnp.float32, -bound, bound)


def init_params(key, patch_size, expansion_ratio, num_layers):
    H = expansion_ratio * patch_size
    keys = jax.random.split(key, 2 + num_layers * 2 * 4)
    w_proj = xavier_uniform(keys[0], (patch_size, H), patch_size, H)
    b_proj = jnp.zeros((1, H), jnp.float32)
    w_head = xavier_uniform(keys[1], (2 * H, patch_size), 2 * H, patch_size)
    b_head = jnp.zeros((1, patch_size), jnp.float32)

    gru = []
    k = 2
    bound = 1.0 / (H ** 0.5)       # PyTorch nn.GRU default init
    for layer_idx in range(num_layers):
        din = H if layer_idx == 0 else 2 * H
        layer = {}
        for d in ('fwd', 'bwd'):
            wih = jax.random.uniform(keys[k], (din, 3 * H), jnp.float32, -bound, bound); k += 1
            whh = jax.random.uniform(keys[k], (H, 3 * H), jnp.float32, -bound, bound); k += 1
            bih = jax.random.uniform(keys[k], (1, 3 * H), jnp.float32, -bound, bound); k += 1
            bhh = jax.random.uniform(keys[k], (1, 3 * H), jnp.float32, -bound, bound); k += 1
            layer[d] = (wih, whh, bih, bhh)
        gru.append(layer)

    return dict(patch_size=patch_size, hidden=H, w_proj=w_proj, b_proj=b_proj,
                w_head=w_head, b_head=b_head, gru=gru)


def _pack_gru_layer(layer, H):
    """Pack one bidirectional layer into the 4-ref fused-kernel layout."""
    wih_f, whh_f, bih_f, bhh_f = layer['fwd']
    wih_b, whh_b, bih_b, bhh_b = layer['bwd']
    zH = jnp.zeros((1, H), jnp.float32)
    zHH = jnp.zeros((H, H), jnp.float32)

    # hoisted input weight, cols [r_f|z_f|n_f|r_b|z_b|n_b]
    wih_comb = jnp.concatenate([wih_f, wih_b], axis=1)
    # b_ih (all gates) + b_hh (r,z gates only) folded into one bias
    bias_comb = jnp.concatenate(
        [bih_f + jnp.concatenate([bhh_f[:, 0:2 * H], zH], axis=1),
         bih_b + jnp.concatenate([bhh_b[:, 0:2 * H], zH], axis=1)], axis=1)
    # block-diagonal recurrent weight, cols [r_f|r_b|z_f|z_b|n_f|n_b]
    top = jnp.concatenate([whh_f[:, 0:H], zHH, whh_f[:, H:2 * H], zHH,
                           whh_f[:, 2 * H:3 * H], zHH], axis=1)
    bot = jnp.concatenate([zHH, whh_b[:, 0:H], zHH, whh_b[:, H:2 * H],
                           zHH, whh_b[:, 2 * H:3 * H]], axis=1)
    whh_block = jnp.concatenate([top, bot], axis=0)
    bhh_n = jnp.concatenate([bhh_f[:, 2 * H:3 * H], bhh_b[:, 2 * H:3 * H]], axis=1)
    return [wih_comb, bias_comb, whh_block, bhh_n]


# ---------------------------------------------------------------------------
# Forward pass (training path, patch_num=None i.e. GRU encoder).
# ---------------------------------------------------------------------------
def hard_reconstruction_forward(params, x, raw_x, noise_key, mode=None):
    ps = params['patch_size']
    H = params['hidden']
    B, L = x.shape
    P = L // ps
    Bpad = ((B + 3) // 4) * 4          # so Bp = 2*Bpad fills the 8-sublane tile
    Bp = 2 * Bpad
    pad = Bpad - B

    # x.unfold(-1, ps, ps) with step == size is a reshape; sequence-major.
    x_t = jnp.transpose(x.reshape(B, P, ps).astype(jnp.float32), (1, 0, 2))  # (P,B,ps)

    # Random 50% patch masking (permutation logic stays in JAX glue).
    noise = jax.random.normal(noise_key, (B, P))
    len_keep = int(P * 0.5)
    mask_base = jnp.concatenate(
        [jnp.zeros((B, len_keep), jnp.float32),
         jnp.ones((B, P - len_keep), jnp.float32)], axis=1)
    ids_shuffle = jnp.argsort(noise, axis=-1)
    ids_restore = jnp.argsort(ids_shuffle, axis=-1)
    mask = jnp.take_along_axis(mask_base, ids_restore, axis=-1)   # (B, P) in {0,1}
    mask_t = jnp.transpose(mask, (1, 0))[:, :, None]              # (P, B, 1)

    raw = jnp.squeeze(raw_x, axis=-1).astype(jnp.float32)
    raw_t = jnp.transpose(raw.reshape(B, P, ps), (1, 0, 2))       # (P, B, ps)

    # Batch pad to Bpad; padded rows are excluded from the loss via bvalid and
    # sliced off the output.
    if pad:
        x_t = jnp.pad(x_t, ((0, 0), (0, pad), (0, 0)))
        raw_t = jnp.pad(raw_t, ((0, 0), (0, pad), (0, 0)))
        mask_t = jnp.pad(mask_t, ((0, 0), (0, pad), (0, 0)), constant_values=1.0)

    # Stream-stacked layout (row = p*Bp + s*Bpad + b).
    x_stack = jnp.concatenate([x_t, x_t], axis=1).reshape(P * Bp, ps)
    mult3 = jnp.concatenate([1.0 - mask_t, mask_t], axis=1)       # (P, Bp, 1)
    mult2 = mult3.reshape(P * Bp, 1)
    bvalid = jnp.broadcast_to(
        (jnp.arange(Bpad) < B).astype(jnp.float32)[:, None], (Bpad, ps))

    guide = (mode == 'guide')
    num_layers = len(params['gru'])
    gru_flat = []
    for layer in params['gru']:
        gru_flat.extend(_pack_gru_layer(layer, H))

    fused = _build_fused_call(num_layers, P, Bpad, H, ps, guide)
    recons_pad, sse, sse_raw = fused(
        x_stack, mult2, mult3, bvalid, raw_t,
        params['w_proj'], params['b_proj'],
        *gru_flat, params['w_head'], params['b_head'])

    n_elem = float(B * P * ps)
    loss = sse[0, 0] / n_elem
    if guide:
        loss = 0.5 * loss + 0.5 * (sse_raw[0, 0] / n_elem)

    recons = recons_pad[:B]                                        # (B, L), lane-dense
    return recons, loss


if __name__ == "__main__":
    patch_size = 16
    expansion_ratio = 2       # hidden_size = 32
    num_layers = 2
    batch = 2
    num_patches = 8
    seq_len = num_patches * patch_size  # 128

    root = jax.random.PRNGKey(0)
    k_param, k_x, k_raw, k_noise = jax.random.split(root, 4)

    params = init_params(k_param, patch_size, expansion_ratio, num_layers)
    x = jax.random.normal(k_x, (batch, seq_len), jnp.float32)
    raw_x = jax.random.normal(k_raw, (batch, seq_len, 1), jnp.float32)

    recons, loss = hard_reconstruction_forward(params, x, raw_x, k_noise, mode=None)
    recons = jax.block_until_ready(recons)
    loss = jax.block_until_ready(loss)
    assert recons.shape == (batch, seq_len)
    assert bool(jnp.isfinite(loss))
    assert bool(jnp.all(jnp.isfinite(recons)))

    # Also exercise the compile-time-gated 'guide' branch.
    _, loss_g = hard_reconstruction_forward(params, x, raw_x, k_noise, mode='guide')
    loss_g = jax.block_until_ready(loss_g)
    assert bool(jnp.isfinite(loss_g))

    print("KERNEL_OK")
</pallas_src>

<mosaic_0001>
module attributes {stable_mosaic.version = 11 : i64} {
  func.func @_fused_kernel(%arg0: memref<64x16xf32, #tpu.memory_space<vmem>>, %arg1: memref<64x1xf32, #tpu.memory_space<vmem>>, %arg2: memref<8x8x1xf32, #tpu.memory_space<vmem>>, %arg3: memref<4x16xf32, #tpu.memory_space<vmem>>, %arg4: memref<8x4x16xf32, #tpu.memory_space<vmem>>, %arg5: memref<16x32xf32, #tpu.memory_space<vmem>>, %arg6: memref<1x32xf32, #tpu.memory_space<vmem>>, %arg7: memref<32x192xf32, #tpu.memory_space<vmem>>, %arg8: memref<1x192xf32, #tpu.memory_space<vmem>>, %arg9: memref<64x192xf32, #tpu.memory_space<vmem>>, %arg10: memref<1x64xf32, #tpu.memory_space<vmem>>, %arg11: memref<64x192xf32, #tpu.memory_space<vmem>>, %arg12: memref<1x192xf32, #tpu.memory_space<vmem>>, %arg13: memref<64x192xf32, #tpu.memory_space<vmem>>, %arg14: memref<1x64xf32, #tpu.memory_space<vmem>>, %arg15: memref<64x16xf32, #tpu.memory_space<vmem>>, %arg16: memref<1x16xf32, #tpu.memory_space<vmem>>, %arg17: memref<4x128xf32, #tpu.memory_space<vmem>>, %arg18: memref<1x1xf32, #tpu.memory_space<smem>>, %arg19: memref<1x1xf32, #tpu.memory_space<smem>>, %arg20: memref<8x8x32xf32, #tpu.memory_space<vmem>>, %arg21: memref<8x8x32xf32, #tpu.memory_space<vmem>>) attributes {dimension_semantics = [], scalar_prefetch = 0 : i64, scratch_operands = 2 : i64, tpu.core_type = #tpu.core_type<tc>} {
    %c0 = arith.constant 0 : index
    %c0_0 = arith.constant 0 : index
    %0 = vector.load %arg1[%c0, %c0_0] : memref<64x1xf32, #tpu.memory_space<vmem>>, vector<64x1xf32>
    %c0_1 = arith.constant 0 : index
    %c0_2 = arith.constant 0 : index
    %1 = vector.load %arg0[%c0_1, %c0_2] : memref<64x16xf32, #tpu.memory_space<vmem>>, vector<64x16xf32>
    %c0_3 = arith.constant 0 : index
    %c0_4 = arith.constant 0 : index
    %2 = vector.load %arg5[%c0_3, %c0_4] : memref<16x32xf32, #tpu.memory_space<vmem>>, vector<16x32xf32>
    %cst = arith.constant dense<0.000000e+00> : vector<64x32xf32>
    %3 = tpu.matmul %1, %2, %cst {dimension_numbers = #tpu.dot_dimension_numbers<[1], [0], [0], [1], [0, 0, 1, 1], [], []>} : vector<64x16xf32>, vector<16x32xf32>, vector<64x32xf32> -> vector<64x32xf32>
    %c0_5 = arith.constant 0 : index
    %c0_6 = arith.constant 0 : index
    %4 = vector.load %arg6[%c0_5, %c0_6] : memref<1x32xf32, #tpu.memory_space<vmem>>, vector<1x32xf32>
    %5 = vector.broadcast %4 : vector<1x32xf32> to vector<64x32xf32>
    %6 = arith.addf %3, %5 : vector<64x32xf32>
    %cst_7 = arith.constant 0.000000e+00 : f32
    %7 = vector.broadcast %cst_7 : f32 to vector<64x32xf32>
    %8 = arith.cmpf ogt, %6, %7 : vector<64x32xf32>
    %cst_8 = arith.constant 0.000000e+00 : f32
    %9 = vector.broadcast %cst_8 : f32 to vector<64x32xf32>
    %10 = arith.minimumf %6, %9 : vector<64x32xf32>
    %11 = math.exp %10 : vector<64x32xf32>
    %cst_9 = arith.constant 1.000000e+00 : f32
    %12 = vector.broadcast %cst_9 : f32 to vector<64x32xf32>
    %13 = arith.subf %11, %12 : vector<64x32xf32>
    %cst_10 = arith.constant 1.67326319 : f32
    %14 = vector.broadcast %cst_10 : f32 to vector<64x32xf32>
    %15 = arith.mulf %14, %13 : vector<64x32xf32>
    %16 = arith.select %8, %6, %15 : vector<64x32xi1>, vector<64x32xf32>
    %cst_11 = arith.constant 1.05070102 : f32
    %17 = vector.broadcast %cst_11 : f32 to vector<64x32xf32>
    %18 = arith.mulf %17, %16 : vector<64x32xf32>
    %19 = vector.broadcast %0 : vector<64x1xf32> to vector<64x32xf32>
    %20 = arith.mulf %18, %19 : vector<64x32xf32>
    %c0_12 = arith.constant 0 : index
    %c0_13 = arith.constant 0 : index
    %21 = vector.load %arg7[%c0_12, %c0_13] : memref<32x192xf32, #tpu.memory_space<vmem>>, vector<32x192xf32>
    %cst_14 = arith.constant dense<0.000000e+00> : vector<64x192xf32>
    %22 = tpu.matmul %20, %21, %cst_14 {dimension_numbers = #tpu.dot_dimension_numbers<[1], [0], [0], [1], [0, 0, 1, 1], [], []>} : vector<64x32xf32>, vector<32x192xf32>, vector<64x192xf32> -> vector<64x192xf32>
    %c0_15 = arith.constant 0 : index
    %c0_16 = arith.constant 0 : index
    %23 = vector.load %arg8[%c0_15, %c0_16] : memref<1x192xf32, #tpu.memory_space<vmem>>, vector<1x192xf32>
    %24 = vector.broadcast %23 : vector<1x192xf32> to vector<64x192xf32>
    %25 = arith.addf %22, %24 : vector<64x192xf32>
    %26 = vector.shape_cast %25 : vector<64x192xf32> to vector<8x8x192xf32>
    %c0_17 = arith.constant 0 : index
    %c0_18 = arith.constant 0 : index
    %27 = vector.load %arg9[%c0_17, %c0_18] : memref<64x192xf32, #tpu.memory_space<vmem>>, vector<64x192xf32>
    %c0_19 = arith.constant 0 : index
    %c0_20 = arith.constant 0 : index
    %28 = vector.load %arg10[%c0_19, %c0_20] : memref<1x64xf32, #tpu.memory_space<vmem>>, vector<1x64xf32>
    %cst_21 = arith.constant 0.000000e+00 : f32
    %29 = vector.broadcast %cst_21 : f32 to vector<8x64xf32>
    %30 = vector.extract_strided_slice %26 {offsets = [0, 0, 0], sizes = [1, 8, 192], strides = [1, 1, 1]} : vector<8x8x192xf32> to vector<1x8x192xf32>
    %31 = vector.shape_cast %30 : vector<1x8x192xf32> to vector<8x192xf32>
    %32 = vector.extract_strided_slice %26 {offsets = [7, 0, 0], sizes = [1, 8, 192], strides = [1, 1, 1]} : vector<8x8x192xf32> to vector<1x8x192xf32>
    %33 = vector.shape_cast %32 : vector<1x8x192xf32> to vector<8x192xf32>
    %34 = vector.extract_strided_slice %31 {offsets = [0, 0], sizes = [8, 32], strides = [1, 1]} : vector<8x192xf32> to vector<8x32xf32>
    %35 = vector.extract_strided_slice %33 {offsets = [0, 96], sizes = [8, 32], strides = [1, 1]} : vector<8x192xf32> to vector<8x32xf32>
    %36 = vector.extract_strided_slice %31 {offsets = [0, 32], sizes = [8, 32], strides = [1, 1]} : vector<8x192xf32> to vector<8x32xf32>
    %37 = vector.extract_strided_slice %33 {offsets = [0, 128], sizes = [8, 32], strides = [1, 1]} : vector<8x192xf32> to vector<8x32xf32>
    %38 = tpu.concatenate %34, %35, %36, %37 in 1 : vector<8x32xf32>, vector<8x32xf32>, vector<8x32xf32>, vector<8x32xf32> -> vector<8x128xf32>
    %39 = vector.extract_strided_slice %31 {offsets = [0, 64], sizes = [8, 32], strides = [1, 1]} : vector<8x192xf32> to vector<8x32xf32>
    %40 = vector.extract_strided_slice %33 {offsets = [0, 160], sizes = [8, 32], strides = [1, 1]} : vector<8x192xf32> to vector<8x32xf32>
    %41 = tpu.concatenate %39, %40 in 1 : vector<8x32xf32>, vector<8x32xf32> -> vector<8x64xf32>
    %cst_22 = arith.constant dense<0.000000e+00> : vector<8x192xf32>
    %42 = tpu.matmul %29, %27, %cst_22 {dimension_numbers = #tpu.dot_dimension_numbers<[1], [0], [0], [1], [0, 0, 1, 1], [], []>} : vector<8x64xf32>, vector<64x192xf32>, vector<8x192xf32> -> vector<8x192xf32>
    %43 = vector.extract_strided_slice %42 {offsets = [0, 0], sizes = [8, 128], strides = [1, 1]} : vector<8x192xf32> to vector<8x128xf32>
    %44 = arith.addf %38, %43 : vector<8x128xf32>
    %45 = arith.negf %44 : vector<8x128xf32>
    %46 = math.exp %45 : vector<8x128xf32>
    %cst_23 = arith.constant 1.000000e+00 : f32
    %47 = vector.broadcast %cst_23 : f32 to vector<8x128xf32>
    %48 = arith.addf %47, %46 : vector<8x128xf32>
    %49 = arith.divf %47, %48 : vector<8x128xf32>
    %50 = vector.extract_strided_slice %49 {offsets = [0, 0], sizes = [8, 64], strides = [1, 1]} : vector<8x128xf32> to vector<8x64xf32>
    %51 = vector.extract_strided_slice %42 {offsets = [0, 128], sizes = [8, 64], strides = [1, 1]} : vector<8x192xf32> to vector<8x64xf32>
    %52 = vector.broadcast %28 : vector<1x64xf32> to vector<8x64xf32>
    %53 = arith.addf %51, %52 : vector<8x64xf32>
    %54 = arith.mulf %50, %53 : vector<8x64xf32>
    %55 = arith.addf %41, %54 : vector<8x64xf32>
    %56 = math.tanh %55 : vector<8x64xf32>
    %57 = vector.extract_strided_slice %49 {offsets = [0, 64], sizes = [8, 64], strides = [1, 1]} : vector<8x128xf32> to vector<8x64xf32>
    %cst_24 = arith.constant 1.000000e+00 : f32
    %58 = vector.broadcast %cst_24 : f32 to vector<8x64xf32>
    %59 = arith.subf %58, %57 : vector<8x64xf32>
    %60 = arith.mulf %59, %56 : vector<8x64xf32>
    %61 = arith.mulf %57, %29 : vector<8x64xf32>
    %62 = arith.addf %60, %61 : vector<8x64xf32>
    %63 = vector.extract_strided_slice %62 {offsets = [0, 0], sizes = [8, 32], strides = [1, 1]} : vector<8x64xf32> to vector<8x32xf32>
    %c0_25 = arith.constant 0 : index
    %c0_26 = arith.constant 0 : index
    %c0_27 = arith.constant 0 : index
    %64 = vector.load %arg20[%c0_25, %c0_26, %c0_27] : memref<8x8x32xf32, #tpu.memory_space<vmem>>, vector<1x8x32xf32>
    %65 = vector.shape_cast %64 : vector<1x8x32xf32> to vector<8x32xf32>
    %66 = vector.shape_cast %63 : vector<8x32xf32> to vector<1x8x32xf32>
    tpu.vector_store %arg20[%c0_25, %c0_26, %c0_27], %66 {strides = array<i32>} : memref<8x8x32xf32, #tpu.memory_space<vmem>>, vector<1x8x32xf32>,
    %67 = vector.extract_strided_slice %62 {offsets = [0, 32], sizes = [8, 32], strides = [1, 1]} : vector<8x64xf32> to vector<8x32xf32>
    %c7 = arith.constant 7 : index
    %c0_28 = arith.constant 0 : index
    %c0_29 = arith.constant 0 : index
    %68 = vector.load %arg21[%c7, %c0_28, %c0_29] : memref<8x8x32xf32, #tpu.memory_space<vmem>>, vector<1x8x32xf32>
    %69 = vector.shape_cast %68 : vector<1x8x32xf32> to vector<8x32xf32>
    %70 = vector.shape_cast %67 : vector<8x32xf32> to vector<1x8x32xf32>
    tpu.vector_store %arg21[%c7, %c0_28, %c0_29], %70 {strides = array<i32>} : memref<8x8x32xf32, #tpu.memory_space<vmem>>, vector<1x8x32xf32>,
    %71 = vector.extract_strided_slice %26 {offsets = [1, 0, 0], sizes = [1, 8, 192], strides = [1, 1, 1]} : vector<8x8x192xf32> to vector<1x8x192xf32>
    %72 = vector.shape_cast %71 : vector<1x8x192xf32> to vector<8x192xf32>
    %73 = vector.extract_strided_slice %26 {offsets = [6, 0, 0], sizes = [1, 8, 192], strides = [1, 1, 1]} : vector<8x8x192xf32> to vector<1x8x192xf32>
    %74 = vector.shape_cast %73 : vector<1x8x192xf32> to vector<8x192xf32>
    %75 = vector.extract_strided_slice %72 {offsets = [0, 0], sizes = [8, 32], strides = [1, 1]} : vector<8x192xf32> to vector<8x32xf32>
    %76 = vector.extract_strided_slice %74 {offsets = [0, 96], sizes = [8, 32], strides = [1, 1]} : vector<8x192xf32> to vector<8x32xf32>
    %77 = vector.extract_strided_slice %72 {offsets = [0, 32], sizes = [8, 32], strides = [1, 1]} : vector<8x192xf32> to vector<8x32xf32>
    %78 = vector.extract_strided_slice %74 {offsets = [0, 128], sizes = [8, 32], strides = [1, 1]} : vector<8x192xf32> to vector<8x32xf32>
    %79 = tpu.concatenate %75, %76, %77, %78 in 1 : vector<8x32xf32>, vector<8x32xf32>, vector<8x32xf32>, vector<8x32xf32> -> vector<8x128xf32>
    %80 = vector.extract_strided_slice %72 {offsets = [0, 64], sizes = [8, 32], strides = [1, 1]} : vector<8x192xf32> to vector<8x32xf32>
    %81 = vector.extract_strided_slice %74 {offsets = [0, 160], sizes = [8, 32], strides = [1, 1]} : vector<8x192xf32> to vector<8x32xf32>
    %82 = tpu.concatenate %80, %81 in 1 : vector<8x32xf32>, vector<8x32xf32> -> vector<8x64xf32>
    %cst_30 = arith.constant dense<0.000000e+00> : vector<8x192xf32>
    %83 = tpu.matmul %62, %27, %cst_30 {dimension_numbers = #tpu.dot_dimension_numbers<[1], [0], [0], [1], [0, 0, 1, 1], [], []>} : vector<8x64xf32>, vector<64x192xf32>, vector<8x192xf32> -> vector<8x192xf32>
    %84 = vector.extract_strided_slice %83 {offsets = [0, 0], sizes = [8, 128], strides = [1, 1]} : vector<8x192xf32> to vector<8x128xf32>
    %85 = arith.addf %79, %84 : vector<8x128xf32>
    %86 = arith.negf %85 : vector<8x128xf32>
    %87 = math.exp %86 : vector<8x128xf32>
    %cst_31 = arith.constant 1.000000e+00 : f32
    %88 = vector.broadcast %cst_31 : f32 to vector<8x128xf32>
    %89 = arith.addf %88, %87 : vector<8x128xf32>
    %90 = arith.divf %88, %89 : vector<8x128xf32>
    %91 = vector.extract_strided_slice %90 {offsets = [0, 0], sizes = [8, 64], strides = [1, 1]} : vector<8x128xf32> to vector<8x64xf32>
    %92 = vector.extract_strided_slice %83 {offsets = [0, 128], sizes = [8, 64], strides = [1, 1]} : vector<8x192xf32> to vector<8x64xf32>
    %93 = vector.broadcast %28 : vector<1x64xf32> to vector<8x64xf32>
    %94 = arith.addf %92, %93 : vector<8x64xf32>
    %95 = arith.mulf %91, %94 : vector<8x64xf32>
    %96 = arith.addf %82, %95 : vector<8x64xf32>
    %97 = math.tanh %96 : vector<8x64xf32>
    %98 = vector.extract_strided_slice %90 {offsets = [0, 64], sizes = [8, 64], strides = [1, 1]} : vector<8x128xf32> to vector<8x64xf32>
    %cst_32 = arith.constant 1.000000e+00 : f32
    %99 = vector.broadcast %cst_32 : f32 to vector<8x64xf32>
    %100 = arith.subf %99, %98 : vector<8x64xf32>
    %101 = arith.mulf %100, %97 : vector<8x64xf32>
    %102 = arith.mulf %98, %62 : vector<8x64xf32>
    %103 = arith.addf %101, %102 : vector<8x64xf32>
    %104 = vector.extract_strided_slice %103 {offsets = [0, 0], sizes = [8, 32], strides = [1, 1]} : vector<8x64xf32> to vector<8x32xf32>
    %c1 = arith.constant 1 : index
    %c0_33 = arith.constant 0 : index
    %c0_34 = arith.constant 0 : index
    %105 = vector.load %arg20[%c1, %c0_33, %c0_34] : memref<8x8x32xf32, #tpu.memory_space<vmem>>, vector<1x8x32xf32>
    %106 = vector.shape_cast %105 : vector<1x8x32xf32> to vector<8x32xf32>
    %107 = vector.shape_cast %104 : vector<8x32xf32> to vector<1x8x32xf32>
    tpu.vector_store %arg20[%c1, %c0_33, %c0_34], %107 {strides = array<i32>} : memref<8x8x32xf32, #tpu.memory_space<vmem>>, vector<1x8x32xf32>,
    %108 = vector.extract_strided_slice %103 {offsets = [0, 32], sizes = [8, 32], strides = [1, 1]} : vector<8x64xf32> to vector<8x32xf32>
    %c6 = arith.constant 6 : index
    %c0_35 = arith.constant 0 : index
    %c0_36 = arith.constant 0 : index
    %109 = vector.load %arg21[%c6, %c0_35, %c0_36] : memref<8x8x32xf32, #tpu.memory_space<vmem>>, vector<1x8x32xf32>
    %110 = vector.shape_cast %109 : vector<1x8x32xf32> to vector<8x32xf32>
    %111 = vector.shape_cast %108 : vector<8x32xf32> to vector<1x8x32xf32>
    tpu.vector_store %arg21[%c6, %c0_35, %c0_36], %111 {strides = array<i32>} : memref<8x8x32xf32, #tpu.memory_space<vmem>>, vector<1x8x32xf32>,
    %112 = vector.extract_strided_slice %26 {offsets = [2, 0, 0], sizes = [1, 8, 192], strides = [1, 1, 1]} : vector<8x8x192xf32> to vector<1x8x192xf32>
    %113 = vector.shape_cast %112 : vector<1x8x192xf32> to vector<8x192xf32>
    %114 = vector.extract_strided_slice %26 {offsets = [5, 0, 0], sizes = [1, 8, 192], strides = [1, 1, 1]} : vector<8x8x192xf32> to vector<1x8x192xf32>
    %115 = vector.shape_cast %114 : vector<1x8x192xf32> to vector<8x192xf32>
    %116 = vector.extract_strided_slice %113 {offsets = [0, 0], sizes = [8, 32], strides = [1, 1]} : vector<8x192xf32> to vector<8x32xf32>
    %117 = vector.extract_strided_slice %115 {offsets = [0, 96], sizes = [8, 32], strides = [1, 1]} : vector<8x192xf32> to vector<8x32xf32>
    %118 = vector.extract_strided_slice %113 {offsets = [0, 32], sizes = [8, 32], strides = [1, 1]} : vector<8x192xf32> to vector<8x32xf32>
    %119 = vector.extract_strided_slice %115 {offsets = [0, 128], sizes = [8, 32], strides = [1, 1]} : vector<8x192xf32> to vector<8x32xf32>
    %120 = tpu.concatenate %116, %117, %118, %119 in 1 : vector<8x32xf32>, vector<8x32xf32>, vector<8x32xf32>, vector<8x32xf32> -> vector<8x128xf32>
    %121 = vector.extract_strided_slice %113 {offsets = [0, 64], sizes = [8, 32], strides = [1, 1]} : vector<8x192xf32> to vector<8x32xf32>
    %122 = vector.extract_strided_slice %115 {offsets = [0, 160], sizes = [8, 32], strides = [1, 1]} : vector<8x192xf32> to vector<8x32xf32>
    %123 = tpu.concatenate %121, %122 in 1 : vector<8x32xf32>, vector<8x32xf32> -> vector<8x64xf32>
    %cst_37 = arith.constant dense<0.000000e+00> : vector<8x192xf32>
    %124 = tpu.matmul %103, %27, %cst_37 {dimension_numbers = #tpu.dot_dimension_numbers<[1], [0], [0], [1], [0, 0, 1, 1], [], []>} : vector<8x64xf32>, vector<64x192xf32>, vector<8x192xf32> -> vector<8x192xf32>
    %125 = vector.extract_strided_slice %124 {offsets = [0, 0], sizes = [8, 128], strides = [1, 1]} : vector<8x192xf32> to vector<8x128xf32>
    %126 = arith.addf %120, %125 : vector<8x128xf32>
    %127 = arith.negf %126 : vector<8x128xf32>
    %128 = math.exp %127 : vector<8x128xf32>
    %cst_38 = arith.constant 1.000000e+00 : f32
    %129 = vector.broadcast %cst_38 : f32 to vector<8x128xf32>
    %130 = arith.addf %129, %128 : vector<8x128xf32>
    %131 = arith.divf %129, %130 : vector<8x128xf32>
    %132 = vector.extract_strided_slice %131 {offsets = [0, 0], sizes = [8, 64], strides = [1, 1]} : vector<8x128xf32> to vector<8x64xf32>
    %133 = vector.extract_strided_slice %124 {offsets = [0, 128], sizes = [8, 64], strides = [1, 1]} : vector<8x192xf32> to vector<8x64xf32>
    %134 = vector.broadcast %28 : vector<1x64xf32> to vector<8x64xf32>
    %135 = arith.addf %133, %134 : vector<8x64xf32>
    %136 = arith.mulf %132, %135 : vector<8x64xf32>
    %137 = arith.addf %123, %136 : vector<8x64xf32>
    %138 = math.tanh %137 : vector<8x64xf32>
    %139 = vector.extract_strided_slice %131 {offsets = [0, 64], sizes = [8, 64], strides = [1, 1]} : vector<8x128xf32> to vector<8x64xf32>
    %cst_39 = arith.constant 1.000000e+00 : f32
    %140 = vector.broadcast %cst_39 : f32 to vector<8x64xf32>
    %141 = arith.subf %140, %139 : vector<8x64xf32>
    %142 = arith.mulf %141, %138 : vector<8x64xf32>
    %143 = arith.mulf %139, %103 : vector<8x64xf32>
    %144 = arith.addf %142, %143 : vector<8x64xf32>
    %145 = vector.extract_strided_slice %144 {offsets = [0, 0], sizes = [8, 32], strides = [1, 1]} : vector<8x64xf32> to vector<8x32xf32>
    %c2 = arith.constant 2 : index
    %c0_40 = arith.constant 0 : index
    %c0_41 = arith.constant 0 : index
    %146 = vector.load %arg20[%c2, %c0_40, %c0_41] : memref<8x8x32xf32, #tpu.memory_space<vmem>>, vector<1x8x32xf32>
    %147 = vector.shape_cast %146 : vector<1x8x32xf32> to vector<8x32xf32>
    %148 = vector.shape_cast %145 : vector<8x32xf32> to vector<1x8x32xf32>
    tpu.vector_store %arg20[%c2, %c0_40, %c0_41], %148 {strides = array<i32>} : memref<8x8x32xf32, #tpu.memory_space<vmem>>, vector<1x8x32xf32>,
    %149 = vector.extract_strided_slice %144 {offsets = [0, 32], sizes = [8, 32], strides = [1, 1]} : vector<8x64xf32> to vector<8x32xf32>
    %c5 = arith.constant 5 : index
    %c0_42 = arith.constant 0 : index
    %c0_43 = arith.constant 0 : index
    %150 = vector.load %arg21[%c5, %c0_42, %c0_43] : memref<8x8x32xf32, #tpu.memory_space<vmem>>, vector<1x8x32xf32>
    %151 = vector.shape_cast %150 : vector<1x8x32xf32> to vector<8x32xf32>
    %152 = vector.shape_cast %149 : vector<8x32xf32> to vector<1x8x32xf32>
    tpu.vector_store %arg21[%c5, %c0_42, %c0_43], %152 {strides = array<i32>} : memref<8x8x32xf32, #tpu.memory_space<vmem>>, vector<1x8x32xf32>,
    %153 = vector.extract_strided_slice %26 {offsets = [3, 0, 0], sizes = [1, 8, 192], strides = [1, 1, 1]} : vector<8x8x192xf32> to vector<1x8x192xf32>
    %154 = vector.shape_cast %153 : vector<1x8x192xf32> to vector<8x192xf32>
    %155 = vector.extract_strided_slice %26 {offsets = [4, 0, 0], sizes = [1, 8, 192], strides = [1, 1, 1]} : vector<8x8x192xf32> to vector<1x8x192xf32>
    %156 = vector.shape_cast %155 : vector<1x8x192xf32> to vector<8x192xf32>
    %157 = vector.extract_strided_slice %154 {offsets = [0, 0], sizes = [8, 32], strides = [1, 1]} : vector<8x192xf32> to vector<8x32xf32>
    %158 = vector.extract_strided_slice %156 {offsets = [0, 96], sizes = [8, 32], strides = [1, 1]} : vector<8x192xf32> to vector<8x32xf32>
    %159 = vector.extract_strided_slice %154 {offsets = [0, 32], sizes = [8, 32], strides = [1, 1]} : vector<8x192xf32> to vector<8x32xf32>
    %160 = vector.extract_strided_slice %156 {offsets = [0, 128], sizes = [8, 32], strides = [1, 1]} : vector<8x192xf32> to vector<8x32xf32>
    %161 = tpu.concatenate %157, %158, %159, %160 in 1 : vector<8x32xf32>, vector<8x32xf32>, vector<8x32xf32>, vector<8x32xf32> -> vector<8x128xf32>
    %162 = vector.extract_strided_slice %154 {offsets = [0, 64], sizes = [8, 32], strides = [1, 1]} : vector<8x192xf32> to vector<8x32xf32>
    %163 = vector.extract_strided_slice %156 {offsets = [0, 160], sizes = [8, 32], strides = [1, 1]} : vector<8x192xf32> to vector<8x32xf32>
    %164 = tpu.concatenate %162, %163 in 1 : vector<8x32xf32>, vector<8x32xf32> -> vector<8x64xf32>
    %cst_44 = arith.constant dense<0.000000e+00> : vector<8x192xf32>
    %165 = tpu.matmul %144, %27, %cst_44 {dimension_numbers = #tpu.dot_dimension_numbers<[1], [0], [0], [1], [0, 0, 1, 1], [], []>} : vector<8x64xf32>, vector<64x192xf32>, vector<8x192xf32> -> vector<8x192xf32>
    %166 = vector.extract_strided_slice %165 {offsets = [0, 0], sizes = [8, 128], strides = [1, 1]} : vector<8x192xf32> to vector<8x128xf32>
    %167 = arith.addf %161, %166 : vector<8x128xf32>
    %168 = arith.negf %167 : vector<8x128xf32>
    %169 = math.exp %168 : vector<8x128xf32>
    %cst_45 = arith.constant 1.000000e+00 : f32
    %170 = vector.broadcast %cst_45 : f32 to vector<8x128xf32>
    %171 = arith.addf %170, %169 : vector<8x128xf32>
    %172 = arith.divf %170, %171 : vector<8x128xf32>
    %173 = vector.extract_strided_slice %172 {offsets = [0, 0], sizes = [8, 64], strides = [1, 1]} : vector<8x128xf32> to vector<8x64xf32>
    %174 = vector.extract_strided_slice %165 {offsets = [0, 128], sizes = [8, 64], strides = [1, 1]} : vector<8x192xf32> to vector<8x64xf32>
    %175 = vector.broadcast %28 : vector<1x64xf32> to vector<8x64xf32>
    %176 = arith.addf %174, %175 : vector<8x64xf32>
    %177 = arith.mulf %173, %176 : vector<8x64xf32>
    %178 = arith.addf %164, %177 : vector<8x64xf32>
    %179 = math.tanh %178 : vector<8x64xf32>
    %180 = vector.extract_strided_slice %172 {offsets = [0, 64], sizes = [8, 64], strides = [1, 1]} : vector<8x128xf32> to vector<8x64xf32>
    %cst_46 = arith.constant 1.000000e+00 : f32
    %181 = vector.broadcast %cst_46 : f32 to vector<8x64xf32>
    %182 = arith.subf %181, %180 : vector<8x64xf32>
    %183 = arith.mulf %182, %179 : vector<8x64xf32>
    %184 = arith.mulf %180, %144 : vector<8x64xf32>
    %185 = arith.addf %183, %184 : vector<8x64xf32>
    %186 = vector.extract_strided_slice %185 {offsets = [0, 0], sizes = [8, 32], strides = [1, 1]} : vector<8x64xf32> to vector<8x32xf32>
    %c3 = arith.constant 3 : index
    %c0_47 = arith.constant 0 : index
    %c0_48 = arith.constant 0 : index
    %187 = vector.load %arg20[%c3, %c0_47, %c0_48] : memref<8x8x32xf32, #tpu.memory_space<vmem>>, vector<1x8x32xf32>
    %188 = vector.shape_cast %187 : vector<1x8x32xf32> to vector<8x32xf32>
    %189 = vector.shape_cast %186 : vector<8x32xf32> to vector<1x8x32xf32>
    tpu.vector_store %arg20[%c3, %c0_47, %c0_48], %189 {strides = array<i32>} : memref<8x8x32xf32, #tpu.memory_space<vmem>>, vector<1x8x32xf32>,
    %190 = vector.extract_strided_slice %185 {offsets = [0, 32], sizes = [8, 32], strides = [1, 1]} : vector<8x64xf32> to vector<8x32xf32>
    %c4 = arith.constant 4 : index
    %c0_49 = arith.constant 0 : index
    %c0_50 = arith.constant 0 : index
    %191 = vector.load %arg21[%c4, %c0_49, %c0_50] : memref<8x8x32xf32, #tpu.memory_space<vmem>>, vector<1x8x32xf32>
    %192 = vector.shape_cast %191 : vector<1x8x32xf32> to vector<8x32xf32>
    %193 = vector.shape_cast %190 : vector<8x32xf32> to vector<1x8x32xf32>
    tpu.vector_store %arg21[%c4, %c0_49, %c0_50], %193 {strides = array<i32>} : memref<8x8x32xf32, #tpu.memory_space<vmem>>, vector<1x8x32xf32>,
    %194 = vector.extract_strided_slice %26 {offsets = [4, 0, 0], sizes = [1, 8, 192], strides = [1, 1, 1]} : vector<8x8x192xf32> to vector<1x8x192xf32>
    %195 = vector.shape_cast %194 : vector<1x8x192xf32> to vector<8x192xf32>
    %196 = vector.extract_strided_slice %26 {offsets = [3, 0, 0], sizes = [1, 8, 192], strides = [1, 1, 1]} : vector<8x8x192xf32> to vector<1x8x192xf32>
    %197 = vector.shape_cast %196 : vector<1x8x192xf32> to vector<8x192xf32>
    %198 = vector.extract_strided_slice %195 {offsets = [0, 0], sizes = [8, 32], strides = [1, 1]} : vector<8x192xf32> to vector<8x32xf32>
    %199 = vector.extract_strided_slice %197 {offsets = [0, 96], sizes = [8, 32], strides = [1, 1]} : vector<8x192xf32> to vector<8x32xf32>
    %200 = vector.extract_strided_slice %195 {offsets = [0, 32], sizes = [8, 32], strides = [1, 1]} : vector<8x192xf32> to vector<8x32xf32>
    %201 = vector.extract_strided_slice %197 {offsets = [0, 128], sizes = [8, 32], strides = [1, 1]} : vector<8x192xf32> to vector<8x32xf32>
    %202 = tpu.concatenate %198, %199, %200, %201 in 1 : vector<8x32xf32>, vector<8x32xf32>, vector<8x32xf32>, vector<8x32xf32> -> vector<8x128xf32>
    %203 = vector.extract_strided_slice %195 {offsets = [0, 64], sizes = [8, 32], strides = [1, 1]} : vector<8x192xf32> to vector<8x32xf32>
    %204 = vector.extract_strided_slice %197 {offsets = [0, 160], sizes = [8, 32], strides = [1, 1]} : vector<8x192xf32> to vector<8x32xf32>
    %205 = tpu.concatenate %203, %204 in 1 : vector<8x32xf32>, vector<8x32xf32> -> vector<8x64xf32>
    %cst_51 = arith.constant dense<0.000000e+00> : vector<8x192xf32>
    %206 = tpu.matmul %185, %27, %cst_51 {dimension_numbers = #tpu.dot_dimension_numbers<[1], [0], [0], [1], [0, 0, 1, 1], [], []>} : vector<8x64xf32>, vector<64x192xf32>, vector<8x192xf32> -> vector<8x192xf32>
    %207 = vector.extract_strided_slice %206 {offsets = [0, 0], sizes = [8, 128], strides = [1, 1]} : vector<8x192xf32> to vector<8x128xf32>
    %208 = arith.addf %202, %207 : vector<8x128xf32>
    %209 = arith.negf %208 : vector<8x128xf32>
    %210 = math.exp %209 : vector<8x128xf32>
    %cst_52 = arith.constant 1.000000e+00 : f32
    %211 = vector.broadcast %cst_52 : f32 to vector<8x128xf32>
    %212 = arith.addf %211, %210 : vector<8x128xf32>
    %213 = arith.divf %211, %212 : vector<8x128xf32>
    %214 = vector.extract_strided_slice %213 {offsets = [0, 0], sizes = [8, 64], strides = [1, 1]} : vector<8x128xf32> to vector<8x64xf32>
    %215 = vector.extract_strided_slice %206 {offsets = [0, 128], sizes = [8, 64], strides = [1, 1]} : vector<8x192xf32> to vector<8x64xf32>
    %216 = vector.broadcast %28 : vector<1x64xf32> to vector<8x64xf32>
    %217 = arith.addf %215, %216 : vector<8x64xf32>
    %218 = arith.mulf %214, %217 : vector<8x64xf32>
    %219 = arith.addf %205, %218 : vector<8x64xf32>
    %220 = math.tanh %219 : vector<8x64xf32>
    %221 = vector.extract_strided_slice %213 {offsets = [0, 64], sizes = [8, 64], strides = [1, 1]} : vector<8x128xf32> to vector<8x64xf32>
    %cst_53 = arith.constant 1.000000e+00 : f32
    %222 = vector.broadcast %cst_53 : f32 to vector<8x64xf32>
    %223 = arith.subf %222, %221 : vector<8x64xf32>
    %224 = arith.mulf %223, %220 : vector<8x64xf32>
    %225 = arith.mulf %221, %185 : vector<8x64xf32>
    %226 = arith.addf %224, %225 : vector<8x64xf32>
    %227 = vector.extract_strided_slice %226 {offsets = [0, 0], sizes = [8, 32], strides = [1, 1]} : vector<8x64xf32> to vector<8x32xf32>
    %c4_54 = arith.constant 4 : index
    %c0_55 = arith.constant 0 : index
    %c0_56 = arith.constant 0 : index
    %228 = vector.load %arg20[%c4_54, %c0_55, %c0_56] : memref<8x8x32xf32, #tpu.memory_space<vmem>>, vector<1x8x32xf32>
    %229 = vector.shape_cast %228 : vector<1x8x32xf32> to vector<8x32xf32>
    %230 = vector.shape_cast %227 : vector<8x32xf32> to vector<1x8x32xf32>
    tpu.vector_store %arg20[%c4_54, %c0_55, %c0_56], %230 {strides = array<i32>} : memref<8x8x32xf32, #tpu.memory_space<vmem>>, vector<1x8x32xf32>,
    %231 = vector.extract_strided_slice %226 {offsets = [0, 32], sizes = [8, 32], strides = [1, 1]} : vector<8x64xf32> to vector<8x32xf32>
    %c3_57 = arith.constant 3 : index
    %c0_58 = arith.constant 0 : index
    %c0_59 = arith.constant 0 : index
    %232 = vector.load %arg21[%c3_57, %c0_58, %c0_59] : memref<8x8x32xf32, #tpu.memory_space<vmem>>, vector<1x8x32xf32>
    %233 = vector.shape_cast %232 : vector<1x8x32xf32> to vector<8x32xf32>
    %234 = vector.shape_cast %231 : vector<8x32xf32> to vector<1x8x32xf32>
    tpu.vector_store %arg21[%c3_57, %c0_58, %c0_59], %234 {strides = array<i32>} : memref<8x8x32xf32, #tpu.memory_space<vmem>>, vector<1x8x32xf32>,
    %235 = vector.extract_strided_slice %26 {offsets = [5, 0, 0], sizes = [1, 8, 192], strides = [1, 1, 1]} : vector<8x8x192xf32> to vector<1x8x192xf32>
    %236 = vector.shape_cast %235 : vector<1x8x192xf32> to vector<8x192xf32>
    %237 = vector.extract_strided_slice %26 {offsets = [2, 0, 0], sizes = [1, 8, 192], strides = [1, 1, 1]} : vector<8x8x192xf32> to vector<1x8x192xf32>
    %238 = vector.shape_cast %237 : vector<1x8x192xf32> to vector<8x192xf32>
    %239 = vector.extract_strided_slice %236 {offsets = [0, 0], sizes = [8, 32], strides = [1, 1]} : vector<8x192xf32> to vector<8x32xf32>
    %240 = vector.extract_strided_slice %238 {offsets = [0, 96], sizes = [8, 32], strides = [1, 1]} : vector<8x192xf32> to vector<8x32xf32>
    %241 = vector.extract_strided_slice %236 {offsets = [0, 32], sizes = [8, 32], strides = [1, 1]} : vector<8x192xf32> to vector<8x32xf32>
    %242 = vector.extract_strided_slice %238 {offsets = [0, 128], sizes = [8, 32], strides = [1, 1]} : vector<8x192xf32> to vector<8x32xf32>
    %243 = tpu.concatenate %239, %240, %241, %242 in 1 : vector<8x32xf32>, vector<8x32xf32>, vector<8x32xf32>, vector<8x32xf32> -> vector<8x128xf32>
    %244 = vector.extract_strided_slice %236 {offsets = [0, 64], sizes = [8, 32], strides = [1, 1]} : vector<8x192xf32> to vector<8x32xf32>
    %245 = vector.extract_strided_slice %238 {offsets = [0, 160], sizes = [8, 32], strides = [1, 1]} : vector<8x192xf32> to vector<8x32xf32>
    %246 = tpu.concatenate %244, %245 in 1 : vector<8x32xf32>, vector<8x32xf32> -> vector<8x64xf32>
    %cst_60 = arith.constant dense<0.000000e+00> : vector<8x192xf32>
    %247 = tpu.matmul %226, %27, %cst_60 {dimension_numbers = #tpu.dot_dimension_numbers<[1], [0], [0], [1], [0, 0, 1, 1], [], []>} : vector<8x64xf32>, vector<64x192xf32>, vector<8x192xf32> -> vector<8x192xf32>
    %248 = vector.extract_strided_slice %247 {offsets = [0, 0], sizes = [8, 128], strides = [1, 1]} : vector<8x192xf32> to vector<8x128xf32>
    %249 = arith.addf %243, %248 : vector<8x128xf32>
    %250 = arith.negf %249 : vector<8x128xf32>
    %251 = math.exp %250 : vector<8x128xf32>
    %cst_61 = arith.constant 1.000000e+00 : f32
    %252 = vector.broadcast %cst_61 : f32 to vector<8x128xf32>
    %253 = arith.addf %252, %251 : vector<8x128xf32>
    %254 = arith.divf %252, %253 : vector<8x128xf32>
    %255 = vector.extract_strided_slice %254 {offsets = [0, 0], sizes = [8, 64], strides = [1, 1]} : vector<8x128xf32> to vector<8x64xf32>
    %256 = vector.extract_strided_slice %247 {offsets = [0, 128], sizes = [8, 64], strides = [1, 1]} : vector<8x192xf32> to vector<8x64xf32>
    %257 = vector.broadcast %28 : vector<1x64xf32> to vector<8x64xf32>
    %258 = arith.addf %256, %257 : vector<8x64xf32>
    %259 = arith.mulf %255, %258 : vector<8x64xf32>
    %260 = arith.addf %246, %259 : vector<8x64xf32>
    %261 = math.tanh %260 : vector<8x64xf32>
    %262 = vector.extract_strided_slice %254 {offsets = [0, 64], sizes = [8, 64], strides = [1, 1]} : vector<8x128xf32> to vector<8x64xf32>
    %cst_62 = arith.constant 1.000000e+00 : f32
    %263 = vector.broadcast %cst_62 : f32 to vector<8x64xf32>
    %264 = arith.subf %263, %262 : vector<8x64xf32>
    %265 = arith.mulf %264, %261 : vector<8x64xf32>
    %266 = arith.mulf %262, %226 : vector<8x64xf32>
    %267 = arith.addf %265, %266 : vector<8x64xf32>
    %268 = vector.extract_strided_slice %267 {offsets = [0, 0], sizes = [8, 32], strides = [1, 1]} : vector<8x64xf32> to vector<8x32xf32>
    %c5_63 = arith.constant 5 : index
    %c0_64 = arith.constant 0 : index
    %c0_65 = arith.constant 0 : index
    %269 = vector.load %arg20[%c5_63, %c0_64, %c0_65] : memref<8x8x32xf32, #tpu.memory_space<vmem>>, vector<1x8x32xf32>
    %270 = vector.shape_cast %269 : vector<1x8x32xf32> to vector<8x32xf32>
    %271 = vector.shape_cast %268 : vector<8x32xf32> to vector<1x8x32xf32>
    tpu.vector_store %arg20[%c5_63, %c0_64, %c0_65], %271 {strides = array<i32>} : memref<8x8x32xf32, #tpu.memory_space<vmem>>, vector<1x8x32xf32>,
    %272 = vector.extract_strided_slice %267 {offsets = [0, 32], sizes = [8, 32], strides = [1, 1]} : vector<8x64xf32> to vector<8x32xf32>
    %c2_66 = arith.constant 2 : index
    %c0_67 = arith.constant 0 : index
    %c0_68 = arith.constant 0 : index
    %273 = vector.load %arg21[%c2_66, %c0_67, %c0_68] : memref<8x8x32xf32, #tpu.memory_space<vmem>>, vector<1x8x32xf32>
    %274 = vector.shape_cast %273 : vector<1x8x32xf32> to vector<8x32xf32>
    %275 = vector.shape_cast %272 : vector<8x32xf32> to vector<1x8x32xf32>
    tpu.vector_store %arg21[%c2_66, %c0_67, %c0_68], %275 {strides = array<i32>} : memref<8x8x32xf32, #tpu.memory_space<vmem>>, vector<1x8x32xf32>,
    %276 = vector.extract_strided_slice %26 {offsets = [6, 0, 0], sizes = [1, 8, 192], strides = [1, 1, 1]} : vector<8x8x192xf32> to vector<1x8x192xf32>
    %277 = vector.shape_cast %276 : vector<1x8x192xf32> to vector<8x192xf32>
    %278 = vector.extract_strided_slice %26 {offsets = [1, 0, 0], sizes = [1, 8, 192], strides = [1, 1, 1]} : vector<8x8x192xf32> to vector<1x8x192xf32>
    %279 = vector.shape_cast %278 : vector<1x8x192xf32> to vector<8x192xf32>
    %280 = vector.extract_strided_slice %277 {offsets = [0, 0], sizes = [8, 32], strides = [1, 1]} : vector<8x192xf32> to vector<8x32xf32>
    %281 = vector.extract_strided_slice %279 {offsets = [0, 96], sizes = [8, 32], strides = [1, 1]} : vector<8x192xf32> to vector<8x32xf32>
    %282 = vector.extract_strided_slice %277 {offsets = [0, 32], sizes = [8, 32], strides = [1, 1]} : vector<8x192xf32> to vector<8x32xf32>
    %283 = vector.extract_strided_slice %279 {offsets = [0, 128], sizes = [8, 32], strides = [1, 1]} : vector<8x192xf32> to vector<8x32xf32>
    %284 = tpu.concatenate %280, %281, %282, %283 in 1 : vector<8x32xf32>, vector<8x32xf32>, vector<8x32xf32>, vector<8x32xf32> -> vector<8x128xf32>
    %285 = vector.extract_strided_slice %277 {offsets = [0, 64], sizes = [8, 32], strides = [1, 1]} : vector<8x192xf32> to vector<8x32xf32>
    %286 = vector.extract_strided_slice %279 {offsets = [0, 160], sizes = [8, 32], strides = [1, 1]} : vector<8x192xf32> to vector<8x32xf32>
    %287 = tpu.concatenate %285, %286 in 1 : vector<8x32xf32>, vector<8x32xf32> -> vector<8x64xf32>
    %cst_69 = arith.constant dense<0.000000e+00> : vector<8x192xf32>
    %288 = tpu.matmul %267, %27, %cst_69 {dimension_numbers = #tpu.dot_dimension_numbers<[1], [0], [0], [1], [0, 0, 1, 1], [], []>} : vector<8x64xf32>, vector<64x192xf32>, vector<8x192xf32> -> vector<8x192xf32>
    %289 = vector.extract_strided_slice %288 {offsets = [0, 0], sizes = [8, 128], strides = [1, 1]} : vector<8x192xf32> to vector<8x128xf32>
    %290 = arith.addf %284, %289 : vector<8x128xf32>
    %291 = arith.negf %290 : vector<8x128xf32>
    %292 = math.exp %291 : vector<8x128xf32>
    %cst_70 = arith.constant 1.000000e+00 : f32
    %293 = vector.broadcast %cst_70 : f32 to vector<8x128xf32>
    %294 = arith.addf %293, %292 : vector<8x128xf32>
    %295 = arith.divf %293, %294 : vector<8x128xf32>
    %296 = vector.extract_strided_slice %295 {offsets = [0, 0], sizes = [8, 64], strides = [1, 1]} : vector<8x128xf32> to vector<8x64xf32>
    %297 = vector.extract_strided_slice %288 {offsets = [0, 128], sizes = [8, 64], strides = [1, 1]} : vector<8x192xf32> to vector<8x64xf32>
    %298 = vector.broadcast %28 : vector<1x64xf32> to vector<8x64xf32>
    %299 = arith.addf %297, %298 : vector<8x64xf32>
    %300 = arith.mulf %296, %299 : vector<8x64xf32>
    %301 = arith.addf %287, %300 : vector<8x64xf32>
    %302 = math.tanh %301 : vector<8x64xf32>
    %303 = vector.extract_strided_slice %295 {offsets = [0, 64], sizes = [8, 64], strides = [1, 1]} : vector<8x128xf32> to vector<8x64xf32>
    %cst_71 = arith.constant 1.000000e+00 : f32
    %304 = vector.broadcast %cst_71 : f32 to vector<8x64xf32>
    %305 = arith.subf %304, %303 : vector<8x64xf32>
    %306 = arith.mulf %305, %302 : vector<8x64xf32>
    %307 = arith.mulf %303, %267 : vector<8x64xf32>
    %308 = arith.addf %306, %307 : vector<8x64xf32>
    %309 = vector.extract_strided_slice %308 {offsets = [0, 0], sizes = [8, 32], strides = [1, 1]} : vector<8x64xf32> to vector<8x32xf32>
    %c6_72 = arith.constant 6 : index
    %c0_73 = arith.constant 0 : index
    %c0_74 = arith.constant 0 : index
    %310 = vector.load %arg20[%c6_72, %c0_73, %c0_74] : memref<8x8x32xf32, #tpu.memory_space<vmem>>, vector<1x8x32xf32>
    %311 = vector.shape_cast %310 : vector<1x8x32xf32> to vector<8x32xf32>
    %312 = vector.shape_cast %309 : vector<8x32xf32> to vector<1x8x32xf32>
    tpu.vector_store %arg20[%c6_72, %c0_73, %c0_74], %312 {strides = array<i32>} : memref<8x8x32xf32, #tpu.memory_space<vmem>>, vector<1x8x32xf32>,
    %313 = vector.extract_strided_slice %308 {offsets = [0, 32], sizes = [8, 32], strides = [1, 1]} : vector<8x64xf32> to vector<8x32xf32>
    %c1_75 = arith.constant 1 : index
    %c0_76 = arith.constant 0 : index
    %c0_77 = arith.constant 0 : index
    %314 = vector.load %arg21[%c1_75, %c0_76, %c0_77] : memref<8x8x32xf32, #tpu.memory_space<vmem>>, vector<1x8x32xf32>
    %315 = vector.shape_cast %314 : vector<1x8x32xf32> to vector<8x32xf32>
    %316 = vector.shape_cast %313 : vector<8x32xf32> to vector<1x8x32xf32>
    tpu.vector_store %arg21[%c1_75, %c0_76, %c0_77], %316 {strides = array<i32>} : memref<8x8x32xf32, #tpu.memory_space<vmem>>, vector<1x8x32xf32>,
    %317 = vector.extract_strided_slice %26 {offsets = [7, 0, 0], sizes = [1, 8, 192], strides = [1, 1, 1]} : vector<8x8x192xf32> to vector<1x8x192xf32>
    %318 = vector.shape_cast %317 : vector<1x8x192xf32> to vector<8x192xf32>
    %319 = vector.extract_strided_slice %26 {offsets = [0, 0, 0], sizes = [1, 8, 192], strides = [1, 1, 1]} : vector<8x8x192xf32> to vector<1x8x192xf32>
    %320 = vector.shape_cast %319 : vector<1x8x192xf32> to vector<8x192xf32>
    %321 = vector.extract_strided_slice %318 {offsets = [0, 0], sizes = [8, 32], strides = [1, 1]} : vector<8x192xf32> to vector<8x32xf32>
    %322 = vector.extract_strided_slice %320 {offsets = [0, 96], sizes = [8, 32], strides = [1, 1]} : vector<8x192xf32> to vector<8x32xf32>
    %323 = vector.extract_strided_slice %318 {offsets = [0, 32], sizes = [8, 32], strides = [1, 1]} : vector<8x192xf32> to vector<8x32xf32>
    %324 = vector.extract_strided_slice %320 {offsets = [0, 128], sizes = [8, 32], strides = [1, 1]} : vector<8x192xf32> to vector<8x32xf32>
    %325 = tpu.concatenate %321, %322, %323, %324 in 1 : vector<8x32xf32>, vector<8x32xf32>, vector<8x32xf32>, vector<8x32xf32> -> vector<8x128xf32>
    %326 = vector.extract_strided_slice %318 {offsets = [0, 64], sizes = [8, 32], strides = [1, 1]} : vector<8x192xf32> to vector<8x32xf32>
    %327 = vector.extract_strided_slice %320 {offsets = [0, 160], sizes = [8, 32], strides = [1, 1]} : vector<8x192xf32> to vector<8x32xf32>
    %328 = tpu.concatenate %326, %327 in 1 : vector<8x32xf32>, vector<8x32xf32> -> vector<8x64xf32>
    %cst_78 = arith.constant dense<0.000000e+00> : vector<8x192xf32>
    %329 = tpu.matmul %308, %27, %cst_78 {dimension_numbers = #tpu.dot_dimension_numbers<[1], [0], [0], [1], [0, 0, 1, 1], [], []>} : vector<8x64xf32>, vector<64x192xf32>, vector<8x192xf32> -> vector<8x192xf32>
    %330 = vector.extract_strided_slice %329 {offsets = [0, 0], sizes = [8, 128], strides = [1, 1]} : vector<8x192xf32> to vector<8x128xf32>
    %331 = arith.addf %325, %330 : vector<8x128xf32>
    %332 = arith.negf %331 : vector<8x128xf32>
    %333 = math.exp %332 : vector<8x128xf32>
    %cst_79 = arith.constant 1.000000e+00 : f32
    %334 = vector.broadcast %cst_79 : f32 to vector<8x128xf32>
    %335 = arith.addf %334, %333 : vector<8x128xf32>
    %336 = arith.divf %334, %335 : vector<8x128xf32>
    %337 = vector.extract_strided_slice %336 {offsets = [0, 0], sizes = [8, 64], strides = [1, 1]} : vector<8x128xf32> to vector<8x64xf32>
    %338 = vector.extract_strided_slice %329 {offsets = [0, 128], sizes = [8, 64], strides = [1, 1]} : vector<8x192xf32> to vector<8x64xf32>
    %339 = vector.broadcast %28 : vector<1x64xf32> to vector<8x64xf32>
    %340 = arith.addf %338, %339 : vector<8x64xf32>
    %341 = arith.mulf %337, %340 : vector<8x64xf32>
    %342 = arith.addf %328, %341 : vector<8x64xf32>
    %343 = math.tanh %342 : vector<8x64xf32>
    %344 = vector.extract_strided_slice %336 {offsets = [0, 64], sizes = [8, 64], strides = [1, 1]} : vector<8x128xf32> to vector<8x64xf32>
    %cst_80 = arith.constant 1.000000e+00 : f32
    %345 = vector.broadcast %cst_80 : f32 to vector<8x64xf32>
    %346 = arith.subf %345, %344 : vector<8x64xf32>
    %347 = arith.mulf %346, %343 : vector<8x64xf32>
    %348 = arith.mulf %344, %308 : vector<8x64xf32>
    %349 = arith.addf %347, %348 : vector<8x64xf32>
    %350 = vector.extract_strided_slice %349 {offsets = [0, 0], sizes = [8, 32], strides = [1, 1]} : vector<8x64xf32> to vector<8x32xf32>
    %c7_81 = arith.constant 7 : index
    %c0_82 = arith.constant 0 : index
    %c0_83 = arith.constant 0 : index
    %351 = vector.load %arg20[%c7_81, %c0_82, %c0_83] : memref<8x8x32xf32, #tpu.memory_space<vmem>>, vector<1x8x32xf32>
    %352 = vector.shape_cast %351 : vector<1x8x32xf32> to vector<8x32xf32>
    %353 = vector.shape_cast %350 : vector<8x32xf32> to vector<1x8x32xf32>
    tpu.vector_store %arg20[%c7_81, %c0_82, %c0_83], %353 {strides = array<i32>} : memref<8x8x32xf32, #tpu.memory_space<vmem>>, vector<1x8x32xf32>,
    %354 = vector.extract_strided_slice %349 {offsets = [0, 32], sizes = [8, 32], strides = [1, 1]} : vector<8x64xf32> to vector<8x32xf32>
    %c0_84 = arith.constant 0 : index
    %c0_85 = arith.constant 0 : index
    %c0_86 = arith.constant 0 : index
    %355 = vector.load %arg21[%c0_84, %c0_85, %c0_86] : memref<8x8x32xf32, #tpu.memory_space<vmem>>, vector<1x8x32xf32>
    %356 = vector.shape_cast %355 : vector<1x8x32xf32> to vector<8x32xf32>
    %357 = vector.shape_cast %354 : vector<8x32xf32> to vector<1x8x32xf32>
    tpu.vector_store %arg21[%c0_84, %c0_85, %c0_86], %357 {strides = array<i32>} : memref<8x8x32xf32, #tpu.memory_space<vmem>>, vector<1x8x32xf32>,
    %c0_87 = arith.constant 0 : index
    %c0_88 = arith.constant 0 : index
    %c0_89 = arith.constant 0 : index
    %358 = vector.load %arg20[%c0_87, %c0_88, %c0_89] : memref<8x8x32xf32, #tpu.memory_space<vmem>>, vector<8x8x32xf32>
    %c0_90 = arith.constant 0 : index
    %c0_91 = arith.constant 0 : index
    %c0_92 = arith.constant 0 : index
    %359 = vector.load %arg21[%c0_90, %c0_91, %c0_92] : memref<8x8x32xf32, #tpu.memory_space<vmem>>, vector<8x8x32xf32>
    %360 = tpu.concatenate %358, %359 in 2 : vector<8x8x32xf32>, vector<8x8x32xf32> -> vector<8x8x64xf32>
    %361 = vector.shape_cast %360 : vector<8x8x64xf32> to vector<64x64xf32>
    %c0_93 = arith.constant 0 : index
    %c0_94 = arith.constant 0 : index
    %362 = vector.load %arg11[%c0_93, %c0_94] : memref<64x192xf32, #tpu.memory_space<vmem>>, vector<64x192xf32>
    %cst_95 = arith.constant dense<0.000000e+00> : vector<64x192xf32>
    %363 = tpu.matmul %361, %362, %cst_95 {dimension_numbers = #tpu.dot_dimension_numbers<[1], [0], [0], [1], [0, 0, 1, 1], [], []>} : vector<64x64xf32>, vector<64x192xf32>, vector<64x192xf32> -> vector<64x192xf32>
    %c0_96 = arith.constant 0 : index
    %c0_97 = arith.constant 0 : index
    %364 = vector.load %arg12[%c0_96, %c0_97] : memref<1x192xf32, #tpu.memory_space<vmem>>, vector<1x192xf32>
    %365 = vector.broadcast %364 : vector<1x192xf32> to vector<64x192xf32>
    %366 = arith.addf %363, %365 : vector<64x192xf32>
    %367 = vector.shape_cast %366 : vector<64x192xf32> to vector<8x8x192xf32>
    %c0_98 = arith.constant 0 : index
    %c0_99 = arith.constant 0 : index
    %368 = vector.load %arg13[%c0_98, %c0_99] : memref<64x192xf32, #tpu.memory_space<vmem>>, vector<64x192xf32>
    %c0_100 = arith.constant 0 : index
    %c0_101 = arith.constant 0 : index
    %369 = vector.load %arg14[%c0_100, %c0_101] : memref<1x64xf32, #tpu.memory_space<vmem>>, vector<1x64xf32>
    %cst_102 = arith.constant 0.000000e+00 : f32
    %370 = vector.broadcast %cst_102 : f32 to vector<8x64xf32>
    %371 = vector.extract_strided_slice %367 {offsets = [0, 0, 0], sizes = [1, 8, 192], strides = [1, 1, 1]} : vector<8x8x192xf32> to vector<1x8x192xf32>
    %372 = vector.shape_cast %371 : vector<1x8x192xf32> to vector<8x192xf32>
    %373 = vector.extract_strided_slice %367 {offsets = [7, 0, 0], sizes = [1, 8, 192], strides = [1, 1, 1]} : vector<8x8x192xf32> to vector<1x8x192xf32>
    %374 = vector.shape_cast %373 : vector<1x8x192xf32> to vector<8x192xf32>
    %375 = vector.extract_strided_slice %372 {offsets = [0, 0], sizes = [8, 32], strides = [1, 1]} : vector<8x192xf32> to vector<8x32xf32>
    %376 = vector.extract_strided_slice %374 {offsets = [0, 96], sizes = [8, 32], strides = [1, 1]} : vector<8x192xf32> to vector<8x32xf32>
    %377 = vector.extract_strided_slice %372 {offsets = [0, 32], sizes = [8, 32], strides = [1, 1]} : vector<8x192xf32> to vector<8x32xf32>
    %378 = vector.extract_strided_slice %374 {offsets = [0, 128], sizes = [8, 32], strides = [1, 1]} : vector<8x192xf32> to vector<8x32xf32>
    %379 = tpu.concatenate %375, %376, %377, %378 in 1 : vector<8x32xf32>, vector<8x32xf32>, vector<8x32xf32>, vector<8x32xf32> -> vector<8x128xf32>
    %380 = vector.extract_strided_slice %372 {offsets = [0, 64], sizes = [8, 32], strides = [1, 1]} : vector<8x192xf32> to vector<8x32xf32>
    %381 = vector.extract_strided_slice %374 {offsets = [0, 160], sizes = [8, 32], strides = [1, 1]} : vector<8x192xf32> to vector<8x32xf32>
    %382 = tpu.concatenate %380, %381 in 1 : vector<8x32xf32>, vector<8x32xf32> -> vector<8x64xf32>
    %cst_103 = arith.constant dense<0.000000e+00> : vector<8x192xf32>
    %383 = tpu.matmul %370, %368, %cst_103 {dimension_numbers = #tpu.dot_dimension_numbers<[1], [0], [0], [1], [0, 0, 1, 1], [], []>} : vector<8x64xf32>, vector<64x192xf32>, vector<8x192xf32> -> vector<8x192xf32>
    %384 = vector.extract_strided_slice %383 {offsets = [0, 0], sizes = [8, 128], strides = [1, 1]} : vector<8x192xf32> to vector<8x128xf32>
    %385 = arith.addf %379, %384 : vector<8x128xf32>
    %386 = arith.negf %385 : vector<8x128xf32>
    %387 = math.exp %386 : vector<8x128xf32>
    %cst_104 = arith.constant 1.000000e+00 : f32
    %388 = vector.broadcast %cst_104 : f32 to vector<8x128xf32>
    %389 = arith.addf %388, %387 : vector<8x128xf32>
    %390 = arith.divf %388, %389 : vector<8x128xf32>
    %391 = vector.extract_strided_slice %390 {offsets = [0, 0], sizes = [8, 64], strides = [1, 1]} : vector<8x128xf32> to vector<8x64xf32>
    %392 = vector.extract_strided_slice %383 {offsets = [0, 128], sizes = [8, 64], strides = [1, 1]} : vector<8x192xf32> to vector<8x64xf32>
    %393 = vector.broadcast %369 : vector<1x64xf32> to vector<8x64xf32>
    %394 = arith.addf %392, %393 : vector<8x64xf32>
    %395 = arith.mulf %391, %394 : vector<8x64xf32>
    %396 = arith.addf %382, %395 : vector<8x64xf32>
    %397 = math.tanh %396 : vector<8x64xf32>
    %398 = vector.extract_strided_slice %390 {offsets = [0, 64], sizes = [8, 64], strides = [1, 1]} : vector<8x128xf32> to vector<8x64xf32>
    %cst_105 = arith.constant 1.000000e+00 : f32
    %399 = vector.broadcast %cst_105 : f32 to vector<8x64xf32>
    %400 = arith.subf %399, %398 : vector<8x64xf32>
    %401 = arith.mulf %400, %397 : vector<8x64xf32>
    %402 = arith.mulf %398, %370 : vector<8x64xf32>
    %403 = arith.addf %401, %402 : vector<8x64xf32>
    %404 = vector.extract_strided_slice %403 {offsets = [0, 0], sizes = [8, 32], strides = [1, 1]} : vector<8x64xf32> to vector<8x32xf32>
    %c0_106 = arith.constant 0 : index
    %c0_107 = arith.constant 0 : index
    %c0_108 = arith.constant 0 : index
    %405 = vector.load %arg20[%c0_106, %c0_107, %c0_108] : memref<8x8x32xf32, #tpu.memory_space<vmem>>, vector<1x8x32xf32>
    %406 = vector.shape_cast %405 : vector<1x8x32xf32> to vector<8x32xf32>
    %407 = vector.shape_cast %404 : vector<8x32xf32> to vector<1x8x32xf32>
    tpu.vector_store %arg20[%c0_106, %c0_107, %c0_108], %407 {strides = array<i32>} : memref<8x8x32xf32, #tpu.memory_space<vmem>>, vector<1x8x32xf32>,
    %408 = vector.extract_strided_slice %403 {offsets = [0, 32], sizes = [8, 32], strides = [1, 1]} : vector<8x64xf32> to vector<8x32xf32>
    %c7_109 = arith.constant 7 : index
    %c0_110 = arith.constant 0 : index
    %c0_111 = arith.constant 0 : index
    %409 = vector.load %arg21[%c7_109, %c0_110, %c0_111] : memref<8x8x32xf32, #tpu.memory_space<vmem>>, vector<1x8x32xf32>
    %410 = vector.shape_cast %409 : vector<1x8x32xf32> to vector<8x32xf32>
    %411 = vector.shape_cast %408 : vector<8x32xf32> to vector<1x8x32xf32>
    tpu.vector_store %arg21[%c7_109, %c0_110, %c0_111], %411 {strides = array<i32>} : memref<8x8x32xf32, #tpu.memory_space<vmem>>, vector<1x8x32xf32>,
    %412 = vector.extract_strided_slice %367 {offsets = [1, 0, 0], sizes = [1, 8, 192], strides = [1, 1, 1]} : vector<8x8x192xf32> to vector<1x8x192xf32>
    %413 = vector.shape_cast %412 : vector<1x8x192xf32> to vector<8x192xf32>
    %414 = vector.extract_strided_slice %367 {offsets = [6, 0, 0], sizes = [1, 8, 192], strides = [1, 1, 1]} : vector<8x8x192xf32> to vector<1x8x192xf32>
    %415 = vector.shape_cast %414 : vector<1x8x192xf32> to vector<8x192xf32>
    %416 = vector.extract_strided_slice %413 {offsets = [0, 0], sizes = [8, 32], strides = [1, 1]} : vector<8x192xf32> to vector<8x32xf32>
    %417 = vector.extract_strided_slice %415 {offsets = [0, 96], sizes = [8, 32], strides = [1, 1]} : vector<8x192xf32> to vector<8x32xf32>
    %418 = vector.extract_strided_slice %413 {offsets = [0, 32], sizes = [8, 32], strides = [1, 1]} : vector<8x192xf32> to vector<8x32xf32>
    %419 = vector.extract_strided_slice %415 {offsets = [0, 128], sizes = [8, 32], strides = [1, 1]} : vector<8x192xf32> to vector<8x32xf32>
    %420 = tpu.concatenate %416, %417, %418, %419 in 1 : vector<8x32xf32>, vector<8x32xf32>, vector<8x32xf32>, vector<8x32xf32> -> vector<8x128xf32>
    %421 = vector.extract_strided_slice %413 {offsets = [0, 64], sizes = [8, 32], strides = [1, 1]} : vector<8x192xf32> to vector<8x32xf32>
    %422 = vector.extract_strided_slice %415 {offsets = [0, 160], sizes = [8, 32], strides = [1, 1]} : vector<8x192xf32> to vector<8x32xf32>
    %423 = tpu.concatenate %421, %422 in 1 : vector<8x32xf32>, vector<8x32xf32> -> vector<8x64xf32>
    %cst_112 = arith.constant dense<0.000000e+00> : vector<8x192xf32>
    %424 = tpu.matmul %403, %368, %cst_112 {dimension_numbers = #tpu.dot_dimension_numbers<[1], [0], [0], [1], [0, 0, 1, 1], [], []>} : vector<8x64xf32>, vector<64x192xf32>, vector<8x192xf32> -> vector<8x192xf32>
    %425 = vector.extract_strided_slice %424 {offsets = [0, 0], sizes = [8, 128], strides = [1, 1]} : vector<8x192xf32> to vector<8x128xf32>
    %426 = arith.addf %420, %425 : vector<8x128xf32>
    %427 = arith.negf %426 : vector<8x128xf32>
    %428 = math.exp %427 : vector<8x128xf32>
    %cst_113 = arith.constant 1.000000e+00 : f32
    %429 = vector.broadcast %cst_113 : f32 to vector<8x128xf32>
    %430 = arith.addf %429, %428 : vector<8x128xf32>
    %431 = arith.divf %429, %430 : vector<8x128xf32>
    %432 = vector.extract_strided_slice %431 {offsets = [0, 0], sizes = [8, 64], strides = [1, 1]} : vector<8x128xf32> to vector<8x64xf32>
    %433 = vector.extract_strided_slice %424 {offsets = [0, 128], sizes = [8, 64], strides = [1, 1]} : vector<8x192xf32> to vector<8x64xf32>
    %434 = vector.broadcast %369 : vector<1x64xf32> to vector<8x64xf32>
    %435 = arith.addf %433, %434 : vector<8x64xf32>
    %436 = arith.mulf %432, %435 : vector<8x64xf32>
    %437 = arith.addf %423, %436 : vector<8x64xf32>
    %438 = math.tanh %437 : vector<8x64xf32>
    %439 = vector.extract_strided_slice %431 {offsets = [0, 64], sizes = [8, 64], strides = [1, 1]} : vector<8x128xf32> to vector<8x64xf32>
    %cst_114 = arith.constant 1.000000e+00 : f32
    %440 = vector.broadcast %cst_114 : f32 to vector<8x64xf32>
    %441 = arith.subf %440, %439 : vector<8x64xf32>
    %442 = arith.mulf %441, %438 : vector<8x64xf32>
    %443 = arith.mulf %439, %403 : vector<8x64xf32>
    %444 = arith.addf %442, %443 : vector<8x64xf32>
    %445 = vector.extract_strided_slice %444 {offsets = [0, 0], sizes = [8, 32], strides = [1, 1]} : vector<8x64xf32> to vector<8x32xf32>
    %c1_115 = arith.constant 1 : index
    %c0_116 = arith.constant 0 : index
    %c0_117 = arith.constant 0 : index
    %446 = vector.load %arg20[%c1_115, %c0_116, %c0_117] : memref<8x8x32xf32, #tpu.memory_space<vmem>>, vector<1x8x32xf32>
    %447 = vector.shape_cast %446 : vector<1x8x32xf32> to vector<8x32xf32>
    %448 = vector.shape_cast %445 : vector<8x32xf32> to vector<1x8x32xf32>
    tpu.vector_store %arg20[%c1_115, %c0_116, %c0_117], %448 {strides = array<i32>} : memref<8x8x32xf32, #tpu.memory_space<vmem>>, vector<1x8x32xf32>,
    %449 = vector.extract_strided_slice %444 {offsets = [0, 32], sizes = [8, 32], strides = [1, 1]} : vector<8x64xf32> to vector<8x32xf32>
    %c6_118 = arith.constant 6 : index
    %c0_119 = arith.constant 0 : index
    %c0_120 = arith.constant 0 : index
    %450 = vector.load %arg21[%c6_118, %c0_119, %c0_120] : memref<8x8x32xf32, #tpu.memory_space<vmem>>, vector<1x8x32xf32>
    %451 = vector.shape_cast %450 : vector<1x8x32xf32> to vector<8x32xf32>
    %452 = vector.shape_cast %449 : vector<8x32xf32> to vector<1x8x32xf32>
    tpu.vector_store %arg21[%c6_118, %c0_119, %c0_120], %452 {strides = array<i32>} : memref<8x8x32xf32, #tpu.memory_space<vmem>>, vector<1x8x32xf32>,
    %453 = vector.extract_strided_slice %367 {offsets = [2, 0, 0], sizes = [1, 8, 192], strides = [1, 1, 1]} : vector<8x8x192xf32> to vector<1x8x192xf32>
    %454 = vector.shape_cast %453 : vector<1x8x192xf32> to vector<8x192xf32>
    %455 = vector.extract_strided_slice %367 {offsets = [5, 0, 0], sizes = [1, 8, 192], strides = [1, 1, 1]} : vector<8x8x192xf32> to vector<1x8x192xf32>
    %456 = vector.shape_cast %455 : vector<1x8x192xf32> to vector<8x192xf32>
    %457 = vector.extract_strided_slice %454 {offsets = [0, 0], sizes = [8, 32], strides = [1, 1]} : vector<8x192xf32> to vector<8x32xf32>
    %458 = vector.extract_strided_slice %456 {offsets = [0, 96], sizes = [8, 32], strides = [1, 1]} : vector<8x192xf32> to vector<8x32xf32>
    %459 = vector.extract_strided_slice %454 {offsets = [0, 32], sizes = [8, 32], strides = [1, 1]} : vector<8x192xf32> to vector<8x32xf32>
    %460 = vector.extract_strided_slice %456 {offsets = [0, 128], sizes = [8, 32], strides = [1, 1]} : vector<8x192xf32> to vector<8x32xf32>
    %461 = tpu.concatenate %457, %458, %459, %460 in 1 : vector<8x32xf32>, vector<8x32xf32>, vector<8x32xf32>, vector<8x32xf32> -> vector<8x128xf32>
    %462 = vector.extract_strided_slice %454 {offsets = [0, 64], sizes = [8, 32], strides = [1, 1]} : vector<8x192xf32> to vector<8x32xf32>
    %463 = vector.extract_strided_slice %456 {offsets = [0, 160], sizes = [8, 32], strides = [1, 1]} : vector<8x192xf32> to vector<8x32xf32>
    %464 = tpu.concatenate %462, %463 in 1 : vector<8x32xf32>, vector<8x32xf32> -> vector<8x64xf32>
    %cst_121 = arith.constant dense<0.000000e+00> : vector<8x192xf32>
    %465 = tpu.matmul %444, %368, %cst_121 {dimension_numbers = #tpu.dot_dimension_numbers<[1], [0], [0], [1], [0, 0, 1, 1], [], []>} : vector<8x64xf32>, vector<64x192xf32>, vector<8x192xf32> -> vector<8x192xf32>
    %466 = vector.extract_strided_slice %465 {offsets = [0, 0], sizes = [8, 128], strides = [1, 1]} : vector<8x192xf32> to vector<8x128xf32>
    %467 = arith.addf %461, %466 : vector<8x128xf32>
    %468 = arith.negf %467 : vector<8x128xf32>
    %469 = math.exp %468 : vector<8x128xf32>
    %cst_122 = arith.constant 1.000000e+00 : f32
    %470 = vector.broadcast %cst_122 : f32 to vector<8x128xf32>
    %471 = arith.addf %470, %469 : vector<8x128xf32>
    %472 = arith.divf %470, %471 : vector<8x128xf32>
    %473 = vector.extract_strided_slice %472 {offsets = [0, 0], sizes = [8, 64], strides = [1, 1]} : vector<8x128xf32> to vector<8x64xf32>
    %474 = vector.extract_strided_slice %465 {offsets = [0, 128], sizes = [8, 64], strides = [1, 1]} : vector<8x192xf32> to vector<8x64xf32>
    %475 = vector.broadcast %369 : vector<1x64xf32> to vector<8x64xf32>
    %476 = arith.addf %474, %475 : vector<8x64xf32>
    %477 = arith.mulf %473, %476 : vector<8x64xf32>
    %478 = arith.addf %464, %477 : vector<8x64xf32>
    %479 = math.tanh %478 : vector<8x64xf32>
    %480 = vector.extract_strided_slice %472 {offsets = [0, 64], sizes = [8, 64], strides = [1, 1]} : vector<8x128xf32> to vector<8x64xf32>
    %cst_123 = arith.constant 1.000000e+00 : f32
    %481 = vector.broadcast %cst_123 : f32 to vector<8x64xf32>
    %482 = arith.subf %481, %480 : vector<8x64xf32>
    %483 = arith.mulf %482, %479 : vector<8x64xf32>
    %484 = arith.mulf %480, %444 : vector<8x64xf32>
    %485 = arith.addf %483, %484 : vector<8x64xf32>
    %486 = vector.extract_strided_slice %485 {offsets = [0, 0], sizes = [8, 32], strides = [1, 1]} : vector<8x64xf32> to vector<8x32xf32>
    %c2_124 = arith.constant 2 : index
    %c0_125 = arith.constant 0 : index
    %c0_126 = arith.constant 0 : index
    %487 = vector.load %arg20[%c2_124, %c0_125, %c0_126] : memref<8x8x32xf32, #tpu.memory_space<vmem>>, vector<1x8x32xf32>
    %488 = vector.shape_cast %487 : vector<1x8x32xf32> to vector<8x32xf32>
    %489 = vector.shape_cast %486 : vector<8x32xf32> to vector<1x8x32xf32>
    tpu.vector_store %arg20[%c2_124, %c0_125, %c0_126], %489 {strides = array<i32>} : memref<8x8x32xf32, #tpu.memory_space<vmem>>, vector<1x8x32xf32>,
    %490 = vector.extract_strided_slice %485 {offsets = [0, 32], sizes = [8, 32], strides = [1, 1]} : vector<8x64xf32> to vector<8x32xf32>
    %c5_127 = arith.constant 5 : index
    %c0_128 = arith.constant 0 : index
    %c0_129 = arith.constant 0 : index
    %491 = vector.load %arg21[%c5_127, %c0_128, %c0_129] : memref<8x8x32xf32, #tpu.memory_space<vmem>>, vector<1x8x32xf32>
    %492 = vector.shape_cast %491 : vector<1x8x32xf32> to vector<8x32xf32>
    %493 = vector.shape_cast %490 : vector<8x32xf32> to vector<1x8x32xf32>
    tpu.vector_store %arg21[%c5_127, %c0_128, %c0_129], %493 {strides = array<i32>} : memref<8x8x32xf32, #tpu.memory_space<vmem>>, vector<1x8x32xf32>,
    %494 = vector.extract_strided_slice %367 {offsets = [3, 0, 0], sizes = [1, 8, 192], strides = [1, 1, 1]} : vector<8x8x192xf32> to vector<1x8x192xf32>
    %495 = vector.shape_cast %494 : vector<1x8x192xf32> to vector<8x192xf32>
    %496 = vector.extract_strided_slice %367 {offsets = [4, 0, 0], sizes = [1, 8, 192], strides = [1, 1, 1]} : vector<8x8x192xf32> to vector<1x8x192xf32>
    %497 = vector.shape_cast %496 : vector<1x8x192xf32> to vector<8x192xf32>
    %498 = vector.extract_strided_slice %495 {offsets = [0, 0], sizes = [8, 32], strides = [1, 1]} : vector<8x192xf32> to vector<8x32xf32>
    %499 = vector.extract_strided_slice %497 {offsets = [0, 96], sizes = [8, 32], strides = [1, 1]} : vector<8x192xf32> to vector<8x32xf32>
    %500 = vector.extract_strided_slice %495 {offsets = [0, 32], sizes = [8, 32], strides = [1, 1]} : vector<8x192xf32> to vector<8x32xf32>
    %501 = vector.extract_strided_slice %497 {offsets = [0, 128], sizes = [8, 32], strides = [1, 1]} : vector<8x192xf32> to vector<8x32xf32>
    %502 = tpu.concatenate %498, %499, %500, %501 in 1 : vector<8x32xf32>, vector<8x32xf32>, vector<8x32xf32>, vector<8x32xf32> -> vector<8x128xf32>
    %503 = vector.extract_strided_slice %495 {offsets = [0, 64], sizes = [8, 32], strides = [1, 1]} : vector<8x192xf32> to vector<8x32xf32>
    %504 = vector.extract_strided_slice %497 {offsets = [0, 160], sizes = [8, 32], strides = [1, 1]} : vector<8x192xf32> to vector<8x32xf32>
    %505 = tpu.concatenate %503, %504 in 1 : vector<8x32xf32>, vector<8x32xf32> -> vector<8x64xf32>
    %cst_130 = arith.constant dense<0.000000e+00> : vector<8x192xf32>
    %506 = tpu.matmul %485, %368, %cst_130 {dimension_numbers = #tpu.dot_dimension_numbers<[1], [0], [0], [1], [0, 0, 1, 1], [], []>} : vector<8x64xf32>, vector<64x192xf32>, vector<8x192xf32> -> vector<8x192xf32>
    %507 = vector.extract_strided_slice %506 {offsets = [0, 0], sizes = [8, 128], strides = [1, 1]} : vector<8x192xf32> to vector<8x128xf32>
    %508 = arith.addf %502, %507 : vector<8x128xf32>
    %509 = arith.negf %508 : vector<8x128xf32>
    %510 = math.exp %509 : vector<8x128xf32>
    %cst_131 = arith.constant 1.000000e+00 : f32
    %511 = vector.broadcast %cst_131 : f32 to vector<8x128xf32>
    %512 = arith.addf %511, %510 : vector<8x128xf32>
    %513 = arith.divf %511, %512 : vector<8x128xf32>
    %514 = vector.extract_strided_slice %513 {offsets = [0, 0], sizes = [8, 64], strides = [1, 1]} : vector<8x128xf32> to vector<8x64xf32>
    %515 = vector.extract_strided_slice %506 {offsets = [0, 128], sizes = [8, 64], strides = [1, 1]} : vector<8x192xf32> to vector<8x64xf32>
    %516 = vector.broadcast %369 : vector<1x64xf32> to vector<8x64xf32>
    %517 = arith.addf %515, %516 : vector<8x64xf32>
    %518 = arith.mulf %514, %517 : vector<8x64xf32>
    %519 = arith.addf %505, %518 : vector<8x64xf32>
    %520 = math.tanh %519 : vector<8x64xf32>
    %521 = vector.extract_strided_slice %513 {offsets = [0, 64], sizes = [8, 64], strides = [1, 1]} : vector<8x128xf32> to vector<8x64xf32>
    %cst_132 = arith.constant 1.000000e+00 : f32
    %522 = vector.broadcast %cst_132 : f32 to vector<8x64xf32>
    %523 = arith.subf %522, %521 : vector<8x64xf32>
    %524 = arith.mulf %523, %520 : vector<8x64xf32>
    %525 = arith.mulf %521, %485 : vector<8x64xf32>
    %526 = arith.addf %524, %525 : vector<8x64xf32>
    %527 = vector.extract_strided_slice %526 {offsets = [0, 0], sizes = [8, 32], strides = [1, 1]} : vector<8x64xf32> to vector<8x32xf32>
    %c3_133 = arith.constant 3 : index
    %c0_134 = arith.constant 0 : index
    %c0_135 = arith.constant 0 : index
    %528 = vector.load %arg20[%c3_133, %c0_134, %c0_135] : memref<8x8x32xf32, #tpu.memory_space<vmem>>, vector<1x8x32xf32>
    %529 = vector.shape_cast %528 : vector<1x8x32xf32> to vector<8x32xf32>
    %530 = vector.shape_cast %527 : vector<8x32xf32> to vector<1x8x32xf32>
    tpu.vector_store %arg20[%c3_133, %c0_134, %c0_135], %530 {strides = array<i32>} : memref<8x8x32xf32, #tpu.memory_space<vmem>>, vector<1x8x32xf32>,
    %531 = vector.extract_strided_slice %526 {offsets = [0, 32], sizes = [8, 32], strides = [1, 1]} : vector<8x64xf32> to vector<8x32xf32>
    %c4_136 = arith.constant 4 : index
    %c0_137 = arith.constant 0 : index
    %c0_138 = arith.constant 0 : index
    %532 = vector.load %arg21[%c4_136, %c0_137, %c0_138] : memref<8x8x32xf32, #tpu.memory_space<vmem>>, vector<1x8x32xf32>
    %533 = vector.shape_cast %532 : vector<1x8x32xf32> to vector<8x32xf32>
    %534 = vector.shape_cast %531 : vector<8x32xf32> to vector<1x8x32xf32>
    tpu.vector_store %arg21[%c4_136, %c0_137, %c0_138], %534 {strides = array<i32>} : memref<8x8x32xf32, #tpu.memory_space<vmem>>, vector<1x8x32xf32>,
    %535 = vector.extract_strided_slice %367 {offsets = [4, 0, 0], sizes = [1, 8, 192], strides = [1, 1, 1]} : vector<8x8x192xf32> to vector<1x8x192xf32>
    %536 = vector.shape_cast %535 : vector<1x8x192xf32> to vector<8x192xf32>
    %537 = vector.extract_strided_slice %367 {offsets = [3, 0, 0], sizes = [1, 8, 192], strides = [1, 1, 1]} : vector<8x8x192xf32> to vector<1x8x192xf32>
    %538 = vector.shape_cast %537 : vector<1x8x192xf32> to vector<8x192xf32>
    %539 = vector.extract_strided_slice %536 {offsets = [0, 0], sizes = [8, 32], strides = [1, 1]} : vector<8x192xf32> to vector<8x32xf32>
    %540 = vector.extract_strided_slice %538 {offsets = [0, 96], sizes = [8, 32], strides = [1, 1]} : vector<8x192xf32> to vector<8x32xf32>
    %541 = vector.extract_strided_slice %536 {offsets = [0, 32], sizes = [8, 32], strides = [1, 1]} : vector<8x192xf32> to vector<8x32xf32>
    %542 = vector.extract_strided_slice %538 {offsets = [0, 128], sizes = [8, 32], strides = [1, 1]} : vector<8x192xf32> to vector<8x32xf32>
    %543 = tpu.concatenate %539, %540, %541, %542 in 1 : vector<8x32xf32>, vector<8x32xf32>, vector<8x32xf32>, vector<8x32xf32> -> vector<8x128xf32>
    %544 = vector.extract_strided_slice %536 {offsets = [0, 64], sizes = [8, 32], strides = [1, 1]} : vector<8x192xf32> to vector<8x32xf32>
    %545 = vector.extract_strided_slice %538 {offsets = [0, 160], sizes = [8, 32], strides = [1, 1]} : vector<8x192xf32> to vector<8x32xf32>
    %546 = tpu.concatenate %544, %545 in 1 : vector<8x32xf32>, vector<8x32xf32> -> vector<8x64xf32>
    %cst_139 = arith.constant dense<0.000000e+00> : vector<8x192xf32>
    %547 = tpu.matmul %526, %368, %cst_139 {dimension_numbers = #tpu.dot_dimension_numbers<[1], [0], [0], [1], [0, 0, 1, 1], [], []>} : vector<8x64xf32>, vector<64x192xf32>, vector<8x192xf32> -> vector<8x192xf32>
    %548 = vector.extract_strided_slice %547 {offsets = [0, 0], sizes = [8, 128], strides = [1, 1]} : vector<8x192xf32> to vector<8x128xf32>
    %549 = arith.addf %543, %548 : vector<8x128xf32>
    %550 = arith.negf %549 : vector<8x128xf32>
    %551 = math.exp %550 : vector<8x128xf32>
    %cst_140 = arith.constant 1.000000e+00 : f32
    %552 = vector.broadcast %cst_140 : f32 to vector<8x128xf32>
    %553 = arith.addf %552, %551 : vector<8x128xf32>
    %554 = arith.divf %552, %553 : vector<8x128xf32>
    %555 = vector.extract_strided_slice %554 {offsets = [0, 0], sizes = [8, 64], strides = [1, 1]} : vector<8x128xf32> to vector<8x64xf32>
    %556 = vector.extract_strided_slice %547 {offsets = [0, 128], sizes = [8, 64], strides = [1, 1]} : vector<8x192xf32> to vector<8x64xf32>
    %557 = vector.broadcast %369 : vector<1x64xf32> to vector<8x64xf32>
    %558 = arith.addf %556, %557 : vector<8x64xf32>
    %559 = arith.mulf %555, %558 : vector<8x64xf32>
    %560 = arith.addf %546, %559 : vector<8x64xf32>
    %561 = math.tanh %560 : vector<8x64xf32>
    %562 = vector.extract_strided_slice %554 {offsets = [0, 64], sizes = [8, 64], strides = [1, 1]} : vector<8x128xf32> to vector<8x64xf32>
    %cst_141 = arith.constant 1.000000e+00 : f32
    %563 = vector.broadcast %cst_141 : f32 to vector<8x64xf32>
    %564 = arith.subf %563, %562 : vector<8x64xf32>
    %565 = arith.mulf %564, %561 : vector<8x64xf32>
    %566 = arith.mulf %562, %526 : vector<8x64xf32>
    %567 = arith.addf %565, %566 : vector<8x64xf32>
    %568 = vector.extract_strided_slice %567 {offsets = [0, 0], sizes = [8, 32], strides = [1, 1]} : vector<8x64xf32> to vector<8x32xf32>
    %c4_142 = arith.constant 4 : index
    %c0_143 = arith.constant 0 : index
    %c0_144 = arith.constant 0 : index
    %569 = vector.load %arg20[%c4_142, %c0_143, %c0_144] : memref<8x8x32xf32, #tpu.memory_space<vmem>>, vector<1x8x32xf32>
    %570 = vector.shape_cast %569 : vector<1x8x32xf32> to vector<8x32xf32>
    %571 = vector.shape_cast %568 : vector<8x32xf32> to vector<1x8x32xf32>
    tpu.vector_store %arg20[%c4_142, %c0_143, %c0_144], %571 {strides = array<i32>} : memref<8x8x32xf32, #tpu.memory_space<vmem>>, vector<1x8x32xf32>,
    %572 = vector.extract_strided_slice %567 {offsets = [0, 32], sizes = [8, 32], strides = [1, 1]} : vector<8x64xf32> to vector<8x32xf32>
    %c3_145 = arith.constant 3 : index
    %c0_146 = arith.constant 0 : index
    %c0_147 = arith.constant 0 : index
    %573 = vector.load %arg21[%c3_145, %c0_146, %c0_147] : memref<8x8x32xf32, #tpu.memory_space<vmem>>, vector<1x8x32xf32>
    %574 = vector.shape_cast %573 : vector<1x8x32xf32> to vector<8x32xf32>
    %575 = vector.shape_cast %572 : vector<8x32xf32> to vector<1x8x32xf32>
    tpu.vector_store %arg21[%c3_145, %c0_146, %c0_147], %575 {strides = array<i32>} : memref<8x8x32xf32, #tpu.memory_space<vmem>>, vector<1x8x32xf32>,
    %576 = vector.extract_strided_slice %367 {offsets = [5, 0, 0], sizes = [1, 8, 192], strides = [1, 1, 1]} : vector<8x8x192xf32> to vector<1x8x192xf32>
    %577 = vector.shape_cast %576 : vector<1x8x192xf32> to vector<8x192xf32>
    %578 = vector.extract_strided_slice %367 {offsets = [2, 0, 0], sizes = [1, 8, 192], strides = [1, 1, 1]} : vector<8x8x192xf32> to vector<1x8x192xf32>
    %579 = vector.shape_cast %578 : vector<1x8x192xf32> to vector<8x192xf32>
    %580 = vector.extract_strided_slice %577 {offsets = [0, 0], sizes = [8, 32], strides = [1, 1]} : vector<8x192xf32> to vector<8x32xf32>
    %581 = vector.extract_strided_slice %579 {offsets = [0, 96], sizes = [8, 32], strides = [1, 1]} : vector<8x192xf32> to vector<8x32xf32>
    %582 = vector.extract_strided_slice %577 {offsets = [0, 32], sizes = [8, 32], strides = [1, 1]} : vector<8x192xf32> to vector<8x32xf32>
    %583 = vector.extract_strided_slice %579 {offsets = [0, 128], sizes = [8, 32], strides = [1, 1]} : vector<8x192xf32> to vector<8x32xf32>
    %584 = tpu.concatenate %580, %581, %582, %583 in 1 : vector<8x32xf32>, vector<8x32xf32>, vector<8x32xf32>, vector<8x32xf32> -> vector<8x128xf32>
    %585 = vector.extract_strided_slice %577 {offsets = [0, 64], sizes = [8, 32], strides = [1, 1]} : vector<8x192xf32> to vector<8x32xf32>
    %586 = vector.extract_strided_slice %579 {offsets = [0, 160], sizes = [8, 32], strides = [1, 1]} : vector<8x192xf32> to vector<8x32xf32>
    %587 = tpu.concatenate %585, %586 in 1 : vector<8x32xf32>, vector<8x32xf32> -> vector<8x64xf32>
    %cst_148 = arith.constant dense<0.000000e+00> : vector<8x192xf32>
    %588 = tpu.matmul %567, %368, %cst_148 {dimension_numbers = #tpu.dot_dimension_numbers<[1], [0], [0], [1], [0, 0, 1, 1], [], []>} : vector<8x64xf32>, vector<64x192xf32>, vector<8x192xf32> -> vector<8x192xf32>
    %589 = vector.extract_strided_slice %588 {offsets = [0, 0], sizes = [8, 128], strides = [1, 1]} : vector<8x192xf32> to vector<8x128xf32>
    %590 = arith.addf %584, %589 : vector<8x128xf32>
    %591 = arith.negf %590 : vector<8x128xf32>
    %592 = math.exp %591 : vector<8x128xf32>
    %cst_149 = arith.constant 1.000000e+00 : f32
    %593 = vector.broadcast %cst_149 : f32 to vector<8x128xf32>
    %594 = arith.addf %593, %592 : vector<8x128xf32>
    %595 = arith.divf %593, %594 : vector<8x128xf32>
    %596 = vector.extract_strided_slice %595 {offsets = [0, 0], sizes = [8, 64], strides = [1, 1]} : vector<8x128xf32> to vector<8x64xf32>
    %597 = vector.extract_strided_slice %588 {offsets = [0, 128], sizes = [8, 64], strides = [1, 1]} : vector<8x192xf32> to vector<8x64xf32>
    %598 = vector.broadcast %369 : vector<1x64xf32> to vector<8x64xf32>
    %599 = arith.addf %597, %598 : vector<8x64xf32>
    %600 = arith.mulf %596, %599 : vector<8x64xf32>
    %601 = arith.addf %587, %600 : vector<8x64xf32>
    %602 = math.tanh %601 : vector<8x64xf32>
    %603 = vector.extract_strided_slice %595 {offsets = [0, 64], sizes = [8, 64], strides = [1, 1]} : vector<8x128xf32> to vector<8x64xf32>
    %cst_150 = arith.constant 1.000000e+00 : f32
    %604 = vector.broadcast %cst_150 : f32 to vector<8x64xf32>
    %605 = arith.subf %604, %603 : vector<8x64xf32>
    %606 = arith.mulf %605, %602 : vector<8x64xf32>
    %607 = arith.mulf %603, %567 : vector<8x64xf32>
    %608 = arith.addf %606, %607 : vector<8x64xf32>
    %609 = vector.extract_strided_slice %608 {offsets = [0, 0], sizes = [8, 32], strides = [1, 1]} : vector<8x64xf32> to vector<8x32xf32>
    %c5_151 = arith.constant 5 : index
    %c0_152 = arith.constant 0 : index
    %c0_153 = arith.constant 0 : index
    %610 = vector.load %arg20[%c5_151, %c0_152, %c0_153] : memref<8x8x32xf32, #tpu.memory_space<vmem>>, vector<1x8x32xf32>
    %611 = vector.shape_cast %610 : vector<1x8x32xf32> to vector<8x32xf32>
    %612 = vector.shape_cast %609 : vector<8x32xf32> to vector<1x8x32xf32>
    tpu.vector_store %arg20[%c5_151, %c0_152, %c0_153], %612 {strides = array<i32>} : memref<8x8x32xf32, #tpu.memory_space<vmem>>, vector<1x8x32xf32>,
    %613 = vector.extract_strided_slice %608 {offsets = [0, 32], sizes = [8, 32], strides = [1, 1]} : vector<8x64xf32> to vector<8x32xf32>
    %c2_154 = arith.constant 2 : index
    %c0_155 = arith.constant 0 : index
    %c0_156 = arith.constant 0 : index
    %614 = vector.load %arg21[%c2_154, %c0_155, %c0_156] : memref<8x8x32xf32, #tpu.memory_space<vmem>>, vector<1x8x32xf32>
    %615 = vector.shape_cast %614 : vector<1x8x32xf32> to vector<8x32xf32>
    %616 = vector.shape_cast %613 : vector<8x32xf32> to vector<1x8x32xf32>
    tpu.vector_store %arg21[%c2_154, %c0_155, %c0_156], %616 {strides = array<i32>} : memref<8x8x32xf32, #tpu.memory_space<vmem>>, vector<1x8x32xf32>,
    %617 = vector.extract_strided_slice %367 {offsets = [6, 0, 0], sizes = [1, 8, 192], strides = [1, 1, 1]} : vector<8x8x192xf32> to vector<1x8x192xf32>
    %618 = vector.shape_cast %617 : vector<1x8x192xf32> to vector<8x192xf32>
    %619 = vector.extract_strided_slice %367 {offsets = [1, 0, 0], sizes = [1, 8, 192], strides = [1, 1, 1]} : vector<8x8x192xf32> to vector<1x8x192xf32>
    %620 = vector.shape_cast %619 : vector<1x8x192xf32> to vector<8x192xf32>
    %621 = vector.extract_strided_slice %618 {offsets = [0, 0], sizes = [8, 32], strides = [1, 1]} : vector<8x192xf32> to vector<8x32xf32>
    %622 = vector.extract_strided_slice %620 {offsets = [0, 96], sizes = [8, 32], strides = [1, 1]} : vector<8x192xf32> to vector<8x32xf32>
    %623 = vector.extract_strided_slice %618 {offsets = [0, 32], sizes = [8, 32], strides = [1, 1]} : vector<8x192xf32> to vector<8x32xf32>
    %624 = vector.extract_strided_slice %620 {offsets = [0, 128], sizes = [8, 32], strides = [1, 1]} : vector<8x192xf32> to vector<8x32xf32>
    %625 = tpu.concatenate %621, %622, %623, %624 in 1 : vector<8x32xf32>, vector<8x32xf32>, vector<8x32xf32>, vector<8x32xf32> -> vector<8x128xf32>
    %626 = vector.extract_strided_slice %618 {offsets = [0, 64], sizes = [8, 32], strides = [1, 1]} : vector<8x192xf32> to vector<8x32xf32>
    %627 = vector.extract_strided_slice %620 {offsets = [0, 160], sizes = [8, 32], strides = [1, 1]} : vector<8x192xf32> to vector<8x32xf32>
    %628 = tpu.concatenate %626, %627 in 1 : vector<8x32xf32>, vector<8x32xf32> -> vector<8x64xf32>
    %cst_157 = arith.constant dense<0.000000e+00> : vector<8x192xf32>
    %629 = tpu.matmul %608, %368, %cst_157 {dimension_numbers = #tpu.dot_dimension_numbers<[1], [0], [0], [1], [0, 0, 1, 1], [], []>} : vector<8x64xf32>, vector<64x192xf32>, vector<8x192xf32> -> vector<8x192xf32>
    %630 = vector.extract_strided_slice %629 {offsets = [0, 0], sizes = [8, 128], strides = [1, 1]} : vector<8x192xf32> to vector<8x128xf32>
    %631 = arith.addf %625, %630 : vector<8x128xf32>
    %632 = arith.negf %631 : vector<8x128xf32>
    %633 = math.exp %632 : vector<8x128xf32>
    %cst_158 = arith.constant 1.000000e+00 : f32
    %634 = vector.broadcast %cst_158 : f32 to vector<8x128xf32>
    %635 = arith.addf %634, %633 : vector<8x128xf32>
    %636 = arith.divf %634, %635 : vector<8x128xf32>
    %637 = vector.extract_strided_slice %636 {offsets = [0, 0], sizes = [8, 64], strides = [1, 1]} : vector<8x128xf32> to vector<8x64xf32>
    %638 = vector.extract_strided_slice %629 {offsets = [0, 128], sizes = [8, 64], strides = [1, 1]} : vector<8x192xf32> to vector<8x64xf32>
    %639 = vector.broadcast %369 : vector<1x64xf32> to vector<8x64xf32>
    %640 = arith.addf %638, %639 : vector<8x64xf32>
    %641 = arith.mulf %637, %640 : vector<8x64xf32>
    %642 = arith.addf %628, %641 : vector<8x64xf32>
    %643 = math.tanh %642 : vector<8x64xf32>
    %644 = vector.extract_strided_slice %636 {offsets = [0, 64], sizes = [8, 64], strides = [1, 1]} : vector<8x128xf32> to vector<8x64xf32>
    %cst_159 = arith.constant 1.000000e+00 : f32
    %645 = vector.broadcast %cst_159 : f32 to vector<8x64xf32>
    %646 = arith.subf %645, %644 : vector<8x64xf32>
    %647 = arith.mulf %646, %643 : vector<8x64xf32>
    %648 = arith.mulf %644, %608 : vector<8x64xf32>
    %649 = arith.addf %647, %648 : vector<8x64xf32>
    %650 = vector.extract_strided_slice %649 {offsets = [0, 0], sizes = [8, 32], strides = [1, 1]} : vector<8x64xf32> to vector<8x32xf32>
    %c6_160 = arith.constant 6 : index
    %c0_161 = arith.constant 0 : index
    %c0_162 = arith.constant 0 : index
    %651 = vector.load %arg20[%c6_160, %c0_161, %c0_162] : memref<8x8x32xf32, #tpu.memory_space<vmem>>, vector<1x8x32xf32>
    %652 = vector.shape_cast %651 : vector<1x8x32xf32> to vector<8x32xf32>
    %653 = vector.shape_cast %650 : vector<8x32xf32> to vector<1x8x32xf32>
    tpu.vector_store %arg20[%c6_160, %c0_161, %c0_162], %653 {strides = array<i32>} : memref<8x8x32xf32, #tpu.memory_space<vmem>>, vector<1x8x32xf32>,
    %654 = vector.extract_strided_slice %649 {offsets = [0, 32], sizes = [8, 32], strides = [1, 1]} : vector<8x64xf32> to vector<8x32xf32>
    %c1_163 = arith.constant 1 : index
    %c0_164 = arith.constant 0 : index
    %c0_165 = arith.constant 0 : index
    %655 = vector.load %arg21[%c1_163, %c0_164, %c0_165] : memref<8x8x32xf32, #tpu.memory_space<vmem>>, vector<1x8x32xf32>
    %656 = vector.shape_cast %655 : vector<1x8x32xf32> to vector<8x32xf32>
    %657 = vector.shape_cast %654 : vector<8x32xf32> to vector<1x8x32xf32>
    tpu.vector_store %arg21[%c1_163, %c0_164, %c0_165], %657 {strides = array<i32>} : memref<8x8x32xf32, #tpu.memory_space<vmem>>, vector<1x8x32xf32>,
    %658 = vector.extract_strided_slice %367 {offsets = [7, 0, 0], sizes = [1, 8, 192], strides = [1, 1, 1]} : vector<8x8x192xf32> to vector<1x8x192xf32>
    %659 = vector.shape_cast %658 : vector<1x8x192xf32> to vector<8x192xf32>
    %660 = vector.extract_strided_slice %367 {offsets = [0, 0, 0], sizes = [1, 8, 192], strides = [1, 1, 1]} : vector<8x8x192xf32> to vector<1x8x192xf32>
    %661 = vector.shape_cast %660 : vector<1x8x192xf32> to vector<8x192xf32>
    %662 = vector.extract_strided_slice %659 {offsets = [0, 0], sizes = [8, 32], strides = [1, 1]} : vector<8x192xf32> to vector<8x32xf32>
    %663 = vector.extract_strided_slice %661 {offsets = [0, 96], sizes = [8, 32], strides = [1, 1]} : vector<8x192xf32> to vector<8x32xf32>
    %664 = vector.extract_strided_slice %659 {offsets = [0, 32], sizes = [8, 32], strides = [1, 1]} : vector<8x192xf32> to vector<8x32xf32>
    %665 = vector.extract_strided_slice %661 {offsets = [0, 128], sizes = [8, 32], strides = [1, 1]} : vector<8x192xf32> to vector<8x32xf32>
    %666 = tpu.concatenate %662, %663, %664, %665 in 1 : vector<8x32xf32>, vector<8x32xf32>, vector<8x32xf32>, vector<8x32xf32> -> vector<8x128xf32>
    %667 = vector.extract_strided_slice %659 {offsets = [0, 64], sizes = [8, 32], strides = [1, 1]} : vector<8x192xf32> to vector<8x32xf32>
    %668 = vector.extract_strided_slice %661 {offsets = [0, 160], sizes = [8, 32], strides = [1, 1]} : vector<8x192xf32> to vector<8x32xf32>
    %669 = tpu.concatenate %667, %668 in 1 : vector<8x32xf32>, vector<8x32xf32> -> vector<8x64xf32>
    %cst_166 = arith.constant dense<0.000000e+00> : vector<8x192xf32>
    %670 = tpu.matmul %649, %368, %cst_166 {dimension_numbers = #tpu.dot_dimension_numbers<[1], [0], [0], [1], [0, 0, 1, 1], [], []>} : vector<8x64xf32>, vector<64x192xf32>, vector<8x192xf32> -> vector<8x192xf32>
    %671 = vector.extract_strided_slice %670 {offsets = [0, 0], sizes = [8, 128], strides = [1, 1]} : vector<8x192xf32> to vector<8x128xf32>
    %672 = arith.addf %666, %671 : vector<8x128xf32>
    %673 = arith.negf %672 : vector<8x128xf32>
    %674 = math.exp %673 : vector<8x128xf32>
    %cst_167 = arith.constant 1.000000e+00 : f32
    %675 = vector.broadcast %cst_167 : f32 to vector<8x128xf32>
    %676 = arith.addf %675, %674 : vector<8x128xf32>
    %677 = arith.divf %675, %676 : vector<8x128xf32>
    %678 = vector.extract_strided_slice %677 {offsets = [0, 0], sizes = [8, 64], strides = [1, 1]} : vector<8x128xf32> to vector<8x64xf32>
    %679 = vector.extract_strided_slice %670 {offsets = [0, 128], sizes = [8, 64], strides = [1, 1]} : vector<8x192xf32> to vector<8x64xf32>
    %680 = vector.broadcast %369 : vector<1x64xf32> to vector<8x64xf32>
    %681 = arith.addf %679, %680 : vector<8x64xf32>
    %682 = arith.mulf %678, %681 : vector<8x64xf32>
    %683 = arith.addf %669, %682 : vector<8x64xf32>
    %684 = math.tanh %683 : vector<8x64xf32>
    %685 = vector.extract_strided_slice %677 {offsets = [0, 64], sizes = [8, 64], strides = [1, 1]} : vector<8x128xf32> to vector<8x64xf32>
    %cst_168 = arith.constant 1.000000e+00 : f32
    %686 = vector.broadcast %cst_168 : f32 to vector<8x64xf32>
    %687 = arith.subf %686, %685 : vector<8x64xf32>
    %688 = arith.mulf %687, %684 : vector<8x64xf32>
    %689 = arith.mulf %685, %649 : vector<8x64xf32>
    %690 = arith.addf %688, %689 : vector<8x64xf32>
    %691 = vector.extract_strided_slice %690 {offsets = [0, 0], sizes = [8, 32], strides = [1, 1]} : vector<8x64xf32> to vector<8x32xf32>
    %c7_169 = arith.constant 7 : index
    %c0_170 = arith.constant 0 : index
    %c0_171 = arith.constant 0 : index
    %692 = vector.load %arg20[%c7_169, %c0_170, %c0_171] : memref<8x8x32xf32, #tpu.memory_space<vmem>>, vector<1x8x32xf32>
    %693 = vector.shape_cast %692 : vector<1x8x32xf32> to vector<8x32xf32>
    %694 = vector.shape_cast %691 : vector<8x32xf32> to vector<1x8x32xf32>
    tpu.vector_store %arg20[%c7_169, %c0_170, %c0_171], %694 {strides = array<i32>} : memref<8x8x32xf32, #tpu.memory_space<vmem>>, vector<1x8x32xf32>,
    %695 = vector.extract_strided_slice %690 {offsets = [0, 32], sizes = [8, 32], strides = [1, 1]} : vector<8x64xf32> to vector<8x32xf32>
    %c0_172 = arith.constant 0 : index
    %c0_173 = arith.constant 0 : index
    %c0_174 = arith.constant 0 : index
    %696 = vector.load %arg21[%c0_172, %c0_173, %c0_174] : memref<8x8x32xf32, #tpu.memory_space<vmem>>, vector<1x8x32xf32>
    %697 = vector.shape_cast %696 : vector<1x8x32xf32> to vector<8x32xf32>
    %698 = vector.shape_cast %695 : vector<8x32xf32> to vector<1x8x32xf32>
    tpu.vector_store %arg21[%c0_172, %c0_173, %c0_174], %698 {strides = array<i32>} : memref<8x8x32xf32, #tpu.memory_space<vmem>>, vector<1x8x32xf32>,
    %c0_175 = arith.constant 0 : index
    %c0_176 = arith.constant 0 : index
    %c0_177 = arith.constant 0 : index
    %699 = vector.load %arg20[%c0_175, %c0_176, %c0_177] : memref<8x8x32xf32, #tpu.memory_space<vmem>>, vector<8x8x32xf32>
    %c0_178 = arith.constant 0 : index
    %c0_179 = arith.constant 0 : index
    %c0_180 = arith.constant 0 : index
    %700 = vector.load %arg21[%c0_178, %c0_179, %c0_180] : memref<8x8x32xf32, #tpu.memory_space<vmem>>, vector<8x8x32xf32>
    %701 = tpu.concatenate %699, %700 in 2 : vector<8x8x32xf32>, vector<8x8x32xf32> -> vector<8x8x64xf32>
    %702 = vector.shape_cast %701 : vector<8x8x64xf32> to vector<64x64xf32>
    %c0_181 = arith.constant 0 : index
    %c0_182 = arith.constant 0 : index
    %703 = vector.load %arg15[%c0_181, %c0_182] : memref<64x16xf32, #tpu.memory_space<vmem>>, vector<64x16xf32>
    %cst_183 = arith.constant dense<0.000000e+00> : vector<64x16xf32>
    %704 = tpu.matmul %702, %703, %cst_183 {dimension_numbers = #tpu.dot_dimension_numbers<[1], [0], [0], [1], [0, 0, 1, 1], [], []>} : vector<64x64xf32>, vector<64x16xf32>, vector<64x16xf32> -> vector<64x16xf32>
    %c0_184 = arith.constant 0 : index
    %c0_185 = arith.constant 0 : index
    %705 = vector.load %arg16[%c0_184, %c0_185] : memref<1x16xf32, #tpu.memory_space<vmem>>, vector<1x16xf32>
    %706 = vector.broadcast %705 : vector<1x16xf32> to vector<64x16xf32>
    %707 = arith.addf %704, %706 : vector<64x16xf32>
    %708 = vector.shape_cast %707 : vector<64x16xf32> to vector<8x8x16xf32>
    %c0_186 = arith.constant 0 : index
    %c0_187 = arith.constant 0 : index
    %c0_188 = arith.constant 0 : index
    %709 = vector.load %arg2[%c0_186, %c0_187, %c0_188] : memref<8x8x1xf32, #tpu.memory_space<vmem>>, vector<8x8x1xf32>
    %c0_189 = arith.constant 0 : index
    %c0_190 = arith.constant 0 : index
    %c0_191 = arith.constant 0 : index
    %710 = vector.load %arg4[%c0_189, %c0_190, %c0_191] : memref<8x4x16xf32, #tpu.memory_space<vmem>>, vector<8x4x16xf32>
    %c0_192 = arith.constant 0 : index
    %c0_193 = arith.constant 0 : index
    %711 = vector.load %arg3[%c0_192, %c0_193] : memref<4x16xf32, #tpu.memory_space<vmem>>, vector<4x16xf32>
    %cst_194 = arith.constant 1.000000e+00 : f32
    %712 = vector.broadcast %cst_194 : f32 to vector<8x8x1xf32>
    %713 = arith.subf %712, %709 : vector<8x8x1xf32>
    %714 = vector.broadcast %713 : vector<8x8x1xf32> to vector<8x8x16xf32>
    %715 = arith.mulf %708, %714 : vector<8x8x16xf32>
    %716 = vector.extract_strided_slice %715 {offsets = [0, 0, 0], sizes = [8, 4, 16], strides = [1, 1, 1]} : vector<8x8x16xf32> to vector<8x4x16xf32>
    %717 = vector.extract_strided_slice %715 {offsets = [0, 4, 0], sizes = [8, 4, 16], strides = [1, 1, 1]} : vector<8x8x16xf32> to vector<8x4x16xf32>
    %718 = arith.addf %716, %717 : vector<8x4x16xf32>
    %719 = vector.extract_strided_slice %718 {offsets = [0, 0, 0], sizes = [1, 4, 16], strides = [1, 1, 1]} : vector<8x4x16xf32> to vector<1x4x16xf32>
    %720 = vector.shape_cast %719 : vector<1x4x16xf32> to vector<4x16xf32>
    %c0_195 = arith.constant 0 : index
    %c0_196 = arith.constant 0 : index
    %721 = vector.load %arg17[%c0_195, %c0_196] : memref<4x128xf32, #tpu.memory_space<vmem>>, vector<4x16xf32>
    tpu.vector_store %arg17[%c0_195, %c0_196], %720 {strides = array<i32>} : memref<4x128xf32, #tpu.memory_space<vmem>>, vector<4x16xf32>,
    %722 = vector.extract_strided_slice %718 {offsets = [1, 0, 0], sizes = [1, 4, 16], strides = [1, 1, 1]} : vector<8x4x16xf32> to vector<1x4x16xf32>
    %723 = vector.shape_cast %722 : vector<1x4x16xf32> to vector<4x16xf32>
    %c0_197 = arith.constant 0 : index
    %c16 = arith.constant 16 : index
    %724 = vector.load %arg17[%c0_197, %c16] : memref<4x128xf32, #tpu.memory_space<vmem>>, vector<4x16xf32>
    tpu.vector_store %arg17[%c0_197, %c16], %723 {strides = array<i32>} : memref<4x128xf32, #tpu.memory_space<vmem>>, vector<4x16xf32>,
    %725 = vector.extract_strided_slice %718 {offsets = [2, 0, 0], sizes = [1, 4, 16], strides = [1, 1, 1]} : vector<8x4x16xf32> to vector<1x4x16xf32>
    %726 = vector.shape_cast %725 : vector<1x4x16xf32> to vector<4x16xf32>
    %c0_198 = arith.constant 0 : index
    %c32 = arith.constant 32 : index
    %727 = vector.load %arg17[%c0_198, %c32] : memref<4x128xf32, #tpu.memory_space<vmem>>, vector<4x16xf32>
    tpu.vector_store %arg17[%c0_198, %c32], %726 {strides = array<i32>} : memref<4x128xf32, #tpu.memory_space<vmem>>, vector<4x16xf32>,
    %728 = vector.extract_strided_slice %718 {offsets = [3, 0, 0], sizes = [1, 4, 16], strides = [1, 1, 1]} : vector<8x4x16xf32> to vector<1x4x16xf32>
    %729 = vector.shape_cast %728 : vector<1x4x16xf32> to vector<4x16xf32>
    %c0_199 = arith.constant 0 : index
    %c48 = arith.constant 48 : index
    %730 = vector.load %arg17[%c0_199, %c48] : memref<4x128xf32, #tpu.memory_space<vmem>>, vector<4x16xf32>
    tpu.vector_store %arg17[%c0_199, %c48], %729 {strides = array<i32>} : memref<4x128xf32, #tpu.memory_space<vmem>>, vector<4x16xf32>,
    %731 = vector.extract_strided_slice %718 {offsets = [4, 0, 0], sizes = [1, 4, 16], strides = [1, 1, 1]} : vector<8x4x16xf32> to vector<1x4x16xf32>
    %732 = vector.shape_cast %731 : vector<1x4x16xf32> to vector<4x16xf32>
    %c0_200 = arith.constant 0 : index
    %c64 = arith.constant 64 : index
    %733 = vector.load %arg17[%c0_200, %c64] : memref<4x128xf32, #tpu.memory_space<vmem>>, vector<4x16xf32>
    tpu.vector_store %arg17[%c0_200, %c64], %732 {strides = array<i32>} : memref<4x128xf32, #tpu.memory_space<vmem>>, vector<4x16xf32>,
    %734 = vector.extract_strided_slice %718 {offsets = [5, 0, 0], sizes = [1, 4, 16], strides = [1, 1, 1]} : vector<8x4x16xf32> to vector<1x4x16xf32>
    %735 = vector.shape_cast %734 : vector<1x4x16xf32> to vector<4x16xf32>
    %c0_201 = arith.constant 0 : index
    %c80 = arith.constant 80 : index
    %736 = vector.load %arg17[%c0_201, %c80] : memref<4x128xf32, #tpu.memory_space<vmem>>, vector<4x16xf32>
    tpu.vector_store %arg17[%c0_201, %c80], %735 {strides = array<i32>} : memref<4x128xf32, #tpu.memory_space<vmem>>, vector<4x16xf32>,
    %737 = vector.extract_strided_slice %718 {offsets = [6, 0, 0], sizes = [1, 4, 16], strides = [1, 1, 1]} : vector<8x4x16xf32> to vector<1x4x16xf32>
    %738 = vector.shape_cast %737 : vector<1x4x16xf32> to vector<4x16xf32>
    %c0_202 = arith.constant 0 : index
    %c96 = arith.constant 96 : index
    %739 = vector.load %arg17[%c0_202, %c96] : memref<4x128xf32, #tpu.memory_space<vmem>>, vector<4x16xf32>
    tpu.vector_store %arg17[%c0_202, %c96], %738 {strides = array<i32>} : memref<4x128xf32, #tpu.memory_space<vmem>>, vector<4x16xf32>,
    %740 = vector.extract_strided_slice %718 {offsets = [7, 0, 0], sizes = [1, 4, 16], strides = [1, 1, 1]} : vector<8x4x16xf32> to vector<1x4x16xf32>
    %741 = vector.shape_cast %740 : vector<1x4x16xf32> to vector<4x16xf32>
    %c0_203 = arith.constant 0 : index
    %c112 = arith.constant 112 : index
    %742 = vector.load %arg17[%c0_203, %c112] : memref<4x128xf32, #tpu.memory_space<vmem>>, vector<4x16xf32>
    tpu.vector_store %arg17[%c0_203, %c112], %741 {strides = array<i32>} : memref<4x128xf32, #tpu.memory_space<vmem>>, vector<4x16xf32>,
    %743 = arith.subf %718, %710 : vector<8x4x16xf32>
    %744 = arith.mulf %743, %743 : vector<8x4x16xf32>
    %745 = vector.shape_cast %711 : vector<4x16xf32> to vector<1x4x16xf32>
    %746 = vector.broadcast %745 : vector<1x4x16xf32> to vector<8x4x16xf32>
    %747 = arith.mulf %744, %746 : vector<8x4x16xf32>
    %748 = vector.shape_cast %747 : vector<8x4x16xf32> to vector<1x8x4x16xf32>
    %cst_204 = arith.constant dense<0.000000e+00> : vector<1xf32>
    %749 = vector.multi_reduction <add>, %748, %cst_204 [1, 2, 3] : vector<1x8x4x16xf32> to vector<1xf32>
    %750 = vector.shape_cast %749 : vector<1xf32> to vector<1x1x1x1xf32>
    %751 = vector.extract %750[0, 0, 0, 0] : f32 from vector<1x1x1x1xf32>
    %c0_205 = arith.constant 0 : index
    %c0_206 = arith.constant 0 : index
    %752 = memref.load %arg18[%c0_205, %c0_206] : memref<1x1xf32, #tpu.memory_space<smem>>
    memref.store %751, %arg18[%c0_205, %c0_206] : memref<1x1xf32, #tpu.memory_space<smem>>
    %cst_207 = arith.constant 0.000000e+00 : f32
    %c0_208 = arith.constant 0 : index
    %c0_209 = arith.constant 0 : index
    %753 = memref.load %arg19[%c0_208, %c0_209] : memref<1x1xf32, #tpu.memory_space<smem>>
    memref.store %cst_207, %arg19[%c0_208, %c0_209] : memref<1x1xf32, #tpu.memory_space<smem>>
    return
  }
}

</mosaic_0001>

<bundles_post_ra>
// kernel: tpu_custom_call.1
= control target key start
LH: loop header
LB: loop body
LE: loop exit
PB: predicated region body
PF: predicated region fallthrough
CT: control target
= control target key end

     0   :  { %s4848_s0 = inlined_call_operand.vmem [shape: f32[64,16], index: 0, kind: input, shape index: {}]   ;;  %s4849_s1 = inlined_call_operand.vmem [shape: f32[64,1], index: 1, kind: input, shape index: {}]   ;;  %s4850_s2 = inlined_call_operand.vmem [shape: f32[8,8,1], index: 2, kind: input, shape index: {}]   ;;  %s4851_s3 = inlined_call_operand.hbm [shape: f32[4,16], index: 3, kind: input, shape index: {}]   ;;  %s4852_s4 = inlined_call_operand.vmem [shape: f32[8,4,16], index: 4, kind: input, shape index: {}]   ;;  %s4853_s5 = inlined_call_operand.hbm [shape: f32[16,32], index: 5, kind: input, shape index: {}]   ;;  %s4854_s6 = inlined_call_operand.vmem [shape: f32[1,32], index: 6, kind: input, shape index: {}]   ;;  %s4855_s7 = inlined_call_operand.hbm [shape: f32[32,192], index: 7, kind: input, shape index: {}]   ;;  %s4856_s8 = inlined_call_operand.vmem [shape: f32[1,192], index: 8, kind: input, shape index: {}]   ;;  %s4857_s9 = inlined_call_operand.vmem [shape: f32[64,192], index: 9, kind: input, shape index: {}]   ;;  %s4858_s10 = inlined_call_operand.vmem [shape: f32[1,64], index: 10, kind: input, shape index: {}]   ;;  %s4859_s11 = inlined_call_operand.vmem [shape: f32[64,192], index: 11, kind: input, shape index: {}]   ;;  %s4860_s12 = inlined_call_operand.vmem [shape: f32[1,192], index: 12, kind: input, shape index: {}]   ;;  %s4861_s13 = inlined_call_operand.hbm [shape: f32[64,192], index: 13, kind: input, shape index: {}]   ;;  %s4862_s14 = inlined_call_operand.vmem [shape: f32[1,64], index: 14, kind: input, shape index: {}]   ;;  %s4863_s15 = inlined_call_operand.vmem [shape: f32[64,16], index: 15, kind: input, shape index: {}]   ;;  %s4864_s16 = inlined_call_operand.vmem [shape: f32[1,16], index: 16, kind: input, shape index: {}]   ;;  %s4865_s17 = inlined_call_operand.hbm [shape: f32[4,128], index: 17, kind: output, shape index: {0}]   ;;  %s4866_s18 = inlined_call_operand.hbm [shape: f32[1,1], index: 18, kind: output, shape index: {1}]   ;;  %s4867_s19 = inlined_call_operand.hbm [shape: f32[1,1], index: 19, kind: output, shape index: {2}]  }
   0x1   :  { %4871 = sst [smem:[#allocation23_spill]] %s4848_s0 }
   0x2   :  { %4872 = sst [smem:[#allocation24_spill]] %s4849_s1 }
   0x3   :  { %4873 = sst [smem:[#allocation25_spill]] %s4850_s2 }
   0x4   :  { %4874 = sst [smem:[#allocation26_spill]] %s4851_s3 }
   0x5   :  { %25 = vsyncpa [#allocation5], 0 }
   0x6   :  { %26 = vsyncpa [#allocation9], 0 }
   0x7   :  { %27 = vsyncpa [#allocation12], 0 }
   0x8   :  { %28 = vsyncpa [#allocation6], 0 }
   0x9   :  { %29 = vsyncpa [#allocation7], 0 }
   0xa   :  { %30 = vsyncpa [#allocation16], 0  ;;  %s3529_s0 = smov [#allocation8]  }
   0xb   :  { %s54_s30 = sshll.u32 %s3529_s0, 4  ;;  %s55_s30 = int_to_ptr.vmem [resolvable:$true] %s54_s30 }
   0xc   :  { %s3409_s20 = scalar_lea.vmem %s55_s30, 256  ;;  %p3414_p1 = scmp.lt.s32.totalorder %s55_s30, %s55_s30 }
   0xd   :  { %p3410_p0 = scmp.ne.s32.totalorder %s55_s30, %s3409_s20  ;;  %p3415_p2 = scmp.lt.s32.totalorder %s3409_s20, %s3409_s20 }
   0xf   :  { %p3416_p3 = por %p3415_p2, %p3414_p1 }
  0x11   :  { %p3417_p4 = pnand %p3416_p3, %p3410_p0 }
  0x13   :  { %3420 = shalt.err (!%p3417_p4)
}
  0x14   :  { %s3530_s21 = smov 128   ;;  %s3531_s1 = smov 8  }
  0x15   :  { %60 = dma.hbm_to_vmem [thread:$0]  %s4853_s5, 256, %s55_s30, [#allocation9], %s3530_s21, %s3530_s21, %s3531_s1  }
  0x16   :  { %s3532_s23 = smov [#allocation4]   ;;  %s3533_s25 = smov [#allocation10]  }
  0x17   :  { %s43_s24 = sshll.u32 %s3532_s23, 4  ;;  %s68_s3 = sshll.u32 %s3533_s25, 4  ;;  %s44_s24 = int_to_ptr.vmem [resolvable:$true] %s43_s24  ;;  %s69_s3 = int_to_ptr.vmem [resolvable:$true] %s68_s3 }
  0x18   :  { %s3429_s26 = scalar_lea.vmem %s44_s24, 64  ;;  %p3434_p6 = scmp.lt.s32.totalorder %s44_s24, %s44_s24 }
  0x19   :  { %p3430_p5 = scmp.ne.s32.totalorder %s44_s24, %s3429_s26  ;;  %p3435_p7 = scmp.lt.s32.totalorder %s3429_s26, %s3429_s26 }
  0x1b   :  { %p3436_p8 = por %p3435_p7, %p3434_p6 }
  0x1d   :  { %p3437_p9 = pnand %p3436_p8, %p3430_p5 }
  0x1f   :  { %3440 = shalt.err (!%p3437_p9)
}
  0x20   :  { %s4875_s29 = sld [smem:[#allocation26_spill]]  ;;  %s3449_s0 = scalar_lea.vmem %s69_s3, 1024 }
  0x21   :  { %p3450_p10 = scmp.ne.s32.totalorder %s69_s3, %s3449_s0  ;;  %p3454_p11 = scmp.lt.s32.totalorder %s69_s3, %s69_s3 }
  0x22   :  { %p3455_p12 = scmp.lt.s32.totalorder %s3449_s0, %s3449_s0 }
  0x24   :  { %p3456_p13 = por %p3455_p12, %p3454_p11 }
  0x26   :  { %46 = dma.hbm_to_vmem [thread:$0]  %s4875_s29, 64, %s44_s24, [#allocation5]  }
  0x27   :  { %p3457_p0 = pnand %p3456_p13, %p3450_p10 }
  0x29   :  { %3460 = shalt.err (!%p3457_p0)
}
  0x2a   :  { %s3534_s5 = smov 256   ;;  %s3535_s30 = smov 16  }
  0x2b   :  { %74 = dma.hbm_to_vmem [thread:$0]  %s4855_s7, 1024, %s69_s3, [#allocation9], %s3534_s5, %s3534_s5, %s3535_s30  }
  0x2c   :  { %s3536_s1 = smov [#allocation11]  }
  0x2d   :  { %s90_s22 = sshll.u32 %s3536_s1, 4  ;;  %s91_s22 = int_to_ptr.vmem [resolvable:$true] %s90_s22 }
  0x2e   :  { %s3469_s2 = scalar_lea.vmem %s91_s22, 2048  ;;  %p3474_p2 = scmp.lt.s32.totalorder %s91_s22, %s91_s22 }
  0x2f   :  { %p3470_p1 = scmp.ne.s32.totalorder %s91_s22, %s3469_s2  ;;  %p3475_p3 = scmp.lt.s32.totalorder %s3469_s2, %s3469_s2 }
  0x31   :  { %p3476_p4 = por %p3475_p3, %p3474_p2 }
  0x33   :  { %p3477_p5 = pnand %p3476_p4, %p3470_p1 }
  0x35   :  { %3480 = shalt.err (!%p3477_p5)
}
  0x36   :  { %96 = dma.hbm_to_vmem [thread:$0]  %s4861_s13, 2048, %s91_s22, [#allocation12], %s3534_s5, %s3534_s5, %s3535_s30  }
  0x37   :  { %3517 = dma.done.wait [#allocation5], 64  }
  0x38   :  { %3518 = vsyncadd [#allocation5], 4294967232 }
  0x39   :  { %3519 = dma.done.wait [#allocation9], 1280  }
  0x3a   :  { %3520 = vsyncadd [#allocation9], 4294966016 }
  0x3b   :  { %3521 = dma.done.wait [#allocation12], 2048  }
  0x3c   :  { %3522 = vsyncadd [#allocation12], 4294965248  ;;  %v3537_v0 = vmov 0   ;;  %vm140_vm0 = vcmask 130048   ;;  %v132_v1 = vld [vmem:[#allocation8 + $0x8] sm:$0xff]  ;;  %v131_v2 = vld [vmem:[#allocation8] sm:$0xff] }
  0x3d   :  { %3287 = vset.pattern.permute.xlu0 %v3537_v0  ;;  %3288 = vset.pattern.permute.xlu1 %v3537_v0  ;;  %s4876_s3 = sld [smem:[#allocation23_spill]]  ;;  %v389_v19 = vld [vmem:[#allocation10 + $0x38] sm:$0xff]  ;;  %v388_v20 = vld [vmem:[#allocation10 + $0x30] sm:$0xff]  ;;  %v387_v21 = vld [vmem:[#allocation10 + $0x28] sm:$0xff]  ;;  %v3538_v27 = vmov 0.0   ;;  %vm402_vm3 = vcmask 261120  }
  0x3e   :  { %3221 = vmatprep.subr.mxu0 %v132_v1  ;;  %s4877_s5 = sld [smem:[#allocation24_spill]]  ;;  %451 = vmatprep.subr.mxu1 %v389_v19  ;;  %v386_v22 = vld [vmem:[#allocation10 + $0x20] sm:$0xff]  ;;  %v385_v23 = vld [vmem:[#allocation10 + $0x18] sm:$0xff]  ;;  %v384_v24 = vld [vmem:[#allocation10 + $0x10] sm:$0xff]  ;;  %vm570_vm10 = vcmask 523264   ;;  %vm572_vm11 = vcmask 785408  }
  0x3f   :  { %3222 = vmatpush3.msra.mxu0 %v132_v1  ;;  %452 = vmatpush1.msra.mxu1 %v388_v20  ;;  %v383_v25 = vld [vmem:[#allocation10 + $0x8] sm:$0xff]  ;;  %v382_v26 = vld [vmem:[#allocation10] sm:$0xff]  ;;  %v3734_v30 = vld [vmem:[%s4857_s9 + $0x68] sm:$0xff]  ;;  %vm2983_vm12 = vcmask 125952   ;;  %s3542_s26 = smov 48   ;;  %s3543_s28 = smov 80  }
  0x40   :  { %3223 = vmatprep.subr.mxu0 %v131_v2  ;;  %453 = vmatprep.subr.mxu1 %v387_v21  ;;  %v3724_v28 = vld [vmem:[%s4857_s9 + $0x78] sm:$0xff]  ;;  %v3729_v29 = vld [vmem:[%s4857_s9 + $0x70] sm:$0xff]  ;;  %v3740_v31 = vld [vmem:[%s4857_s9 + $0x60] sm:$0xff]  ;;  %s3546_s29 = smov [#allocation15]   ;;  %vm2989_vm13 = vcmask 257152   ;;  %vm2995_vm14 = vcmask 388352  }
  0x41   :  { %3224 = vmatpush3.msra.mxu0 %v131_v2  ;;  %454 = vmatpush1.msra.mxu1 %v386_v22  ;;  %v3747_v32 = vld [vmem:[%s4857_s9 + $0x58] sm:$0xff]  ;;  %v3753_v33 = vld [vmem:[%s4857_s9 + $0x50] sm:$0xff]  ;;  %v3759_v34 = vld [vmem:[%s4857_s9 + $0x48] sm:$0xff]  ;;  %vm3001_vm15 = vcmask 519552  }
  0x42   :  { %455 = vmatprep.subr.mxu1 %v385_v23  ;;  %491 = vmatprep.mubr.f32.mxu1 %v3538_v27  ;;  %v3765_v35 = vld [vmem:[%s4857_s9 + $0x40] sm:$0xff]  ;;  %v3771_v36 = vld [vmem:[%s4857_s9 + $0x38] sm:$0xff]  ;;  %v3777_v37 = vld [vmem:[%s4857_s9 + $0x30] sm:$0xff] }
  0x43   :  { %v123_v3 = vld [vmem:[%s4876_s3] sm:$0xff]  ;;  %v124_v4 = vld [vmem:[%s4876_s3 + $0x8] sm:$0xff]  ;;  %v125_v5 = vld [vmem:[%s4876_s3 + $0x10] sm:$0xff]  ;;  %456 = vmatpush1.msra.mxu1 %v384_v24  ;;  %597 = vmatprep.subr.mxu0 %v3724_v28 }
  0x44   :  { %3225 = vmatprep.mubr.msk.f32.mxu0 %vm140_vm0, %v123_v3  ;;  %v115_v6 = vld [vmem:[%s4877_s5] sm:$0xff]  ;;  %v117_v7 = vld [vmem:[%s4877_s5 + $0x10] sm:$0xff]  ;;  %v116_v8 = vld [vmem:[%s4877_s5 + $0x8] sm:$0xff]  ;;  %457 = vmatprep.subr.mxu1 %v383_v25 }
  0x45   :  { %336 = vperm.xlu0 %3287, %v115_v6   ;;  %3226 = vmatmul.mubr.msk.f32.vlgmr.msra.gmra.mxu0 %vm140_vm0, %v124_v4  ;;  %v126_v9 = vld [vmem:[%s4876_s3 + $0x18] sm:$0xff]  ;;  %v127_v11 = vld [vmem:[%s4876_s3 + $0x20] sm:$0xff]  ;;  %v128_v13 = vld [vmem:[%s4876_s3 + $0x28] sm:$0xff] }
  0x46   :  { %346 = vperm.xlu1 %3288, %v117_v7   ;;  %3228 = vmatprep.mubr.msk.f32.mxu0 %vm140_vm0, %v125_v5  ;;  %v118_v10 = vld [vmem:[%s4877_s5 + $0x18] sm:$0xff]  ;;  %v119_v12 = vld [vmem:[%s4877_s5 + $0x20] sm:$0xff]  ;;  %v120_v14 = vld [vmem:[%s4877_s5 + $0x28] sm:$0xff] }
  0x47   :  { %v129_v15 = vld [vmem:[%s4876_s3 + $0x30] sm:$0xff]  ;;  %v130_v17 = vld [vmem:[%s4876_s3 + $0x38] sm:$0xff]  ;;  %458 = vmatpush1.msra.mxu1 %v382_v26  ;;  %598 = vmatpush1.msra.mxu0 %v3729_v29  ;;  %v3783_v38 = vld [vmem:[%s4857_s9 + $0x28] sm:$0xff]  ;;  %s3539_s3 = smov 32  }
  0x48   :  { %v121_v16 = vld [vmem:[%s4877_s5 + $0x30] sm:$0xff]  ;;  %v122_v18 = vld [vmem:[%s4877_s5 + $0x38] sm:$0xff]  ;;  %846 = vmatprep.subr.mxu1 %v3724_v28  ;;  %599 = vmatprep.subr.mxu0 %v3734_v30  ;;  %v3789_v39 = vld [vmem:[%s4857_s9 + $0x20] sm:$0xff]  ;;  %s3541_s5 = smov 96  }
  0x49   :  { %341 = vperm.xlu0 %3287, %v116_v8   ;;  %3229 = vmatmul.mubr.msk.f32.gmra.mxu0 %vm140_vm0, %v126_v9  ;;  %v3795_v40 = vld [vmem:[%s4857_s9 + $0x18] sm:$0xff]  ;;  %v3801_v41 = vld [vmem:[%s4857_s9 + $0x10] sm:$0xff]  ;;  %v3807_v42 = vld [vmem:[%s4857_s9 + $0x8] sm:$0xff] }
  0x4a   :  { %351 = vperm.xlu1 %3288, %v118_v10   ;;  %3231 = vmatprep.mubr.msk.f32.mxu0 %vm140_vm0, %v127_v11  ;;  %v3813_v43 = vld [vmem:[%s4857_s9] sm:$0xff] }
  0x4b   :  { %600 = vmatpush1.msra.mxu0 %v3740_v31  ;;  %v3121_v44 = vld [vmem:[%s4854_s6] ss:$0 sm:$0xff] }
  0x4c   :  { %601 = vmatprep.subr.mxu0 %v3747_v32 }
  0x4d   :  { %356 = vperm.xlu0 %3287, %v119_v12   ;;  %3232 = vmatmul.mubr.msk.f32.gmra.mxu0 %vm140_vm0, %v128_v13 }
  0x4e   :  { %361 = vperm.xlu1 %3288, %v120_v14   ;;  %3234 = vmatprep.mubr.msk.f32.mxu0 %vm140_vm0, %v129_v15 }
  0x4f   :  { %602 = vmatpush1.msra.mxu0 %v3753_v33 }
  0x50   :  { %603 = vmatprep.subr.mxu0 %v3759_v34 }
  0x51   :  { %366 = vperm.xlu0 %3287, %v121_v16   ;;  %3235 = vmatmul.mubr.msk.f32.gmra.mxu0 %vm140_vm0, %v130_v17  ;;  %vm3007_vm0 = vcmask 650752  }
  0x52   :  { %371 = vperm.xlu1 %3288, %v122_v18   ;;  %645 = vmatprep.mubr.f32.mxu0 %v3538_v27 }
  0x53   :  { %604 = vmatpush1.msra.mxu0 %v3765_v35 }
  0x54   :  { %605 = vmatprep.subr.mxu0 %v3771_v36 }
  0x55   :  { %606 = vmatpush1.msra.mxu0 %v3777_v37 }
  0x56   :  { %607 = vmatprep.subr.mxu0 %v3783_v38 }
  0x57   :  { %608 = vmatpush1.msra.mxu0 %v3789_v39 }
  0x58   :  { %609 = vmatprep.subr.mxu0 %v3795_v40 }
  0x59   :  { %610 = vmatpush1.msra.mxu0 %v3801_v41 }
  0x5a   :  { %611 = vmatprep.subr.mxu0 %v3807_v42 }
  0x5b   :  { %612 = vmatpush1.msra.mxu0 %v3813_v43 }
  0x5c   :  { %646 = vmatmul.mubr.f32.vlgmr.msra.gmra.mxu0 %v3538_v27  ;;  %724 = vmatprep.subr.mxu0 %v3724_v28 }
  0x5d   :  { %725 = vmatpush1.msra.mxu0 %v3729_v29  ;;  %772 = vmatprep.mubr.f32.mxu0 %v3538_v27 }
  0x5e   :  { %726 = vmatprep.subr.mxu0 %v3734_v30 }
  0x5f   :  { %727 = vmatpush1.msra.mxu0 %v3740_v31 }
  0x60   :  { %728 = vmatprep.subr.mxu0 %v3747_v32 }
  0x61   :  { %729 = vmatpush1.msra.mxu0 %v3753_v33 }
  0x62   :  { %730 = vmatprep.subr.mxu0 %v3759_v34 }
  0x63   :  { %731 = vmatpush1.msra.mxu0 %v3765_v35 }
  0x64   :  { %732 = vmatprep.subr.mxu0 %v3771_v36 }
  0x65   :  { %733 = vmatpush1.msra.mxu0 %v3777_v37 }
  0x66   :  { %734 = vmatprep.subr.mxu0 %v3783_v38 }
  0x67   :  { %735 = vmatpush1.msra.mxu0 %v3789_v39 }
  0x68   :  { %736 = vmatprep.subr.mxu0 %v3795_v40 }
  0x69   :  { %737 = vmatpush1.msra.mxu0 %v3801_v41 }
  0x6a   :  { %738 = vmatprep.subr.mxu0 %v3807_v42 }
  0x6b   :  { %739 = vmatpush1.msra.mxu0 %v3813_v43 }
  0x6c   :  { %968 = vmatprep.subr.mxu0 %v3724_v28 }
  0xc0   :  { %v337_v22 = vpop.permute.xlu0 %336 }
 0x105   :  { %v3227_v45 = vpop.f32.mrf.mxu0 }
 0x106   :  { %v237_v46 = vadd.f32 %v3227_v45, %v3121_v44 }
 0x107   :  { %v231_v47 = vpop.f32.mrf.mxu0 }
 0x108   :  { %v279_v48 = vmin.f32 %v237_v46, 0.0  ;;  %v232_v49 = vadd.f32 %v3121_v44, %v231_v47  ;;  %vm271_vm1 = vcmp.gt.f32.partialorder %v237_v46, 0.0 }
 0x109   :  { %v3230_v50 = vpop.f32.mrf.mxu0 }
 0x10a   :  { %v288_v51 = vmul.f32 1.442695, %v279_v48  ;;  %v278_v52 = vmin.f32 %v232_v49, 0.0  ;;  %v3840_v53 = vadd.f32 %v3230_v50, %v3121_v44  ;;  %vm270_vm2 = vcmp.gt.f32.partialorder %v232_v49, 0.0 }
 0x10b   :  { %v241_v54 = vpop.f32.mrf.mxu0 }
 0x10c   :  { %3289 = vpow2.f32 %v288_v51  ;;  %v286_v55 = vmul.f32 1.442695, %v278_v52  ;;  %v281_v56 = vmin.f32 %v3840_v53, 0.0  ;;  %v242_v57 = vadd.f32 %v3121_v44, %v241_v54 }
 0x10d   :  { %v3233_v58 = vpop.f32.mrf.mxu0  ;;  %vm273_vm5 = vcmp.gt.f32.partialorder %v3840_v53, 0.0 }
 0x10e   :  { %3291 = vpow2.f32 %v286_v55  ;;  %v292_v59 = vmul.f32 1.442695, %v281_v56  ;;  %v3843_v60 = vadd.f32 %v3233_v58, %v3121_v44  ;;  %v280_v61 = vmin.f32 %v242_v57, 0.0  ;;  %v342_v55 = vpop.permute.xlu0 %341  ;;  %v347_v56 = vpop.permute.xlu1 %346 }
 0x10f   :  { %v251_v62 = vpop.f32.mrf.mxu0  ;;  %vm272_vm4 = vcmp.gt.f32.partialorder %v242_v57, 0.0 }
 0x110   :  { %3293 = vpow2.f32 %v292_v59  ;;  %v283_v63 = vmin.f32 %v3843_v60, 0.0  ;;  %v3846_v0 = vadd.f32 %v3121_v44, %v251_v62  ;;  %v290_v1 = vmul.f32 1.442695, %v280_v61 }
 0x111   :  { %v3236_v2 = vpop.f32.mrf.mxu0  ;;  %vm275_vm7 = vcmp.gt.f32.partialorder %v3843_v60, 0.0 }
 0x112   :  { %v282_v3 = vmin.f32 %v3846_v0, 0.0  ;;  %3295 = vpow2.f32 %v290_v1  ;;  %v296_v5 = vmul.f32 1.442695, %v283_v63  ;;  %v3849_v7 = vadd.f32 %v3236_v2, %v3121_v44 }
 0x113   :  { %v261_v4 = vpop.f32.mrf.mxu0  ;;  %vm274_vm6 = vcmp.gt.f32.partialorder %v3846_v0, 0.0 }
 0x114   :  { %v294_v6 = vmul.f32 1.442695, %v282_v3  ;;  %v3851_v8 = vadd.f32 %v3121_v44, %v261_v4  ;;  %v285_v10 = vmin.f32 %v3849_v7, 0.0  ;;  %v352_v4 = vpop.permute.xlu1 %351  ;;  %vm277_vm9 = vcmp.gt.f32.partialorder %v3849_v7, 0.0 }
 0x116   :  { %3297 = vpow2.f32 %v294_v6  ;;  %v284_v9 = vmin.f32 %v3851_v8, 0.0  ;;  %v300_v15 = vmul.f32 1.442695, %v285_v10  ;;  %vm276_vm8 = vcmp.gt.f32.partialorder %v3851_v8, 0.0 }
 0x117   :  { %3299 = vpow2.f32 %v296_v5 }
 0x118   :  { %v298_v12 = vmul.f32 1.442695, %v284_v9 }
 0x119   :  { %v3290_v11 = vpop.eup %3289 }
 0x11a   :  { %v3131_v13 = vadd.f32 -1.0, %v3290_v11  ;;  %3301 = vpow2.f32 %v298_v12  ;;  %v357_v11 = vpop.permute.xlu0 %356 }
 0x11b   :  { %v3292_v14 = vpop.eup %3291  ;;  %3303 = vpow2.f32 %v300_v15  ;;  %v362_v15 = vpop.permute.xlu1 %361 }
 0x11c   :  { %v3130_v16 = vadd.f32 -1.0, %v3292_v14  ;;  %v311_v17 = vmul.f32 1.6732632, %v3131_v13 }
 0x11d   :  { %v3294_v18 = vpop.eup %3293 }
 0x11e   :  { %v310_v19 = vmul.f32 1.6732632, %v3130_v16  ;;  %v319_v23 = vsel %vm271_vm1, %v237_v46, %v311_v17  ;;  %v3133_v24 = vadd.f32 -1.0, %v3294_v18  ;;  %vm3013_vm1 = vcmask 781952  }
 0x11f   :  { %v3296_v20 = vpop.eup %3295  ;;  %v327_v47 = vmul.f32 1.050701, %v319_v23  ;;  %v392_v23 = vlaneseq }
 0x120   :  { %v318_v21 = vsel %vm270_vm2, %v232_v49, %v310_v19  ;;  %v3132_v26 = vadd.f32 -1.0, %v3296_v20  ;;  %v313_v51 = vmul.f32 1.6732632, %v3133_v24  ;;  %v367_v19 = vpop.permute.xlu0 %366  ;;  %vm3019_vm2 = vcmask 913152  }
 0x121   :  { %v326_v25 = vmul.f32 1.050701, %v318_v21  ;;  %v375_v46 = vmul.f32 %v342_v55, %v327_v47  ;;  %v372_v21 = vpop.permute.xlu1 %371  ;;  %v3897_v24 = vshrl.u32 %v392_v23, 7 }
 0x122   :  { %v312_v48 = vmul.f32 1.6732632, %v3132_v26  ;;  %v321_v59 = vsel %vm273_vm5, %v3840_v53, %v313_v51 }
 0x123   :  { %v3298_v44 = vpop.eup %3297  ;;  %v374_v45 = vmul.f32 %v337_v22, %v326_v25  ;;  %v329_v63 = vmul.f32 1.050701, %v321_v59  ;;  %v390_v25 = vld [vmem:[%s4856_s8] sm:$0x3]  ;;  %v398_v26 = vsub.s32 1, %v3897_v24  ;;  %s3540_s8 = smov 64  }
 0x124   :  { %v3134_v50 = vadd.f32 -1.0, %v3298_v44  ;;  %v3300_v52 = vpop.eup %3299  ;;  %v320_v54 = vsel %vm272_vm4, %v242_v57, %v312_v48 }
 0x125   :  { %3138 = vmatmul.mubr.msk.f32.vlgmr.msra.gmra.mxu1 %vm402_vm3, %v374_v45  ;;  %v328_v49 = vmul.f32 1.050701, %v320_v54  ;;  %v3135_v61 = vadd.f32 -1.0, %v3300_v52  ;;  %v377_v6 = vmul.f32 %v352_v4, %v329_v63  ;;  %v399_v45 = vrot.slane %v390_v25, %v398_v26 }
 0x126   :  { %497 = vmatprep.mubr.f32.mxu1 %v3538_v27  ;;  %847 = vmatpush1.msra.mxu1 %v3729_v29  ;;  %v314_v58 = vmul.f32 1.6732632, %v3134_v50 }
 0x127   :  { %848 = vmatprep.subr.mxu1 %v3734_v30  ;;  %v3302_v57 = vpop.eup %3301  ;;  %v376_v62 = vmul.f32 %v347_v56, %v328_v49  ;;  %v315_v2 = vmul.f32 1.6732632, %v3135_v61 }
 0x128   :  { %849 = vmatpush1.msra.mxu1 %v3740_v31  ;;  %v322_v53 = vsel %vm274_vm6, %v3846_v0, %v314_v58  ;;  %v3136_v1 = vadd.f32 -1.0, %v3302_v57  ;;  %v3304_v3 = vpop.eup %3303 }
 0x129   :  { %3139 = vmatmul.mubr.msk.f32.gmra.mxu1 %vm402_vm3, %v375_v46  ;;  %850 = vmatprep.subr.mxu1 %v3747_v32  ;;  %v330_v5 = vmul.f32 1.050701, %v322_v53  ;;  %v323_v9 = vsel %vm275_vm7, %v3843_v60, %v315_v2  ;;  %v3137_v10 = vadd.f32 -1.0, %v3304_v3 }
 0x12a   :  { %503 = vmatprep.mubr.f32.mxu1 %v3538_v27  ;;  %851 = vmatpush1.msra.mxu1 %v3753_v33  ;;  %v316_v0 = vmul.f32 1.6732632, %v3136_v1  ;;  %v331_v13 = vmul.f32 1.050701, %v323_v9 }
 0x12b   :  { %852 = vmatprep.subr.mxu1 %v3759_v34  ;;  %v378_v12 = vmul.f32 %v357_v11, %v330_v5  ;;  %v317_v14 = vmul.f32 1.6732632, %v3137_v10 }
 0x12c   :  { %853 = vmatpush1.msra.mxu1 %v3765_v35  ;;  %v324_v60 = vsel %vm276_vm8, %v3851_v8, %v316_v0  ;;  %v379_v17 = vmul.f32 %v362_v15, %v331_v13 }
 0x12d   :  { %3140 = vmatmul.mubr.msk.f32.gmra.mxu1 %vm402_vm3, %v376_v62  ;;  %854 = vmatprep.subr.mxu1 %v3771_v36  ;;  %v332_v16 = vmul.f32 1.050701, %v324_v60  ;;  %v325_v18 = vsel %vm277_vm9, %v3849_v7, %v317_v14  ;;  %v394_v7 = vsub.s32 0, %v3897_v24 }
 0x12e   :  { %509 = vmatprep.mubr.f32.mxu1 %v3538_v27  ;;  %855 = vmatpush1.msra.mxu1 %v3777_v37  ;;  %v333_v20 = vmul.f32 1.050701, %v325_v18 }
 0x12f   :  { %856 = vmatprep.subr.mxu1 %v3783_v38  ;;  %v380_v8 = vmul.f32 %v367_v19, %v332_v16  ;;  %v395_v44 = vrot.slane %v390_v25, %v394_v7 }
 0x130   :  { %857 = vmatpush1.msra.mxu1 %v3789_v39  ;;  %v381_v22 = vmul.f32 %v372_v21, %v333_v20  ;;  %v647_v20 = vpop.f32.mrf.mxu0 }
 0x131   :  { %3141 = vmatmul.mubr.msk.f32.gmra.mxu1 %vm402_vm3, %v377_v6  ;;  %858 = vmatprep.subr.mxu1 %v3795_v40 }
 0x132   :  { %515 = vmatprep.mubr.f32.mxu1 %v3538_v27  ;;  %859 = vmatpush1.msra.mxu1 %v3801_v41 }
 0x133   :  { %860 = vmatprep.subr.mxu1 %v3807_v42 }
 0x134   :  { %861 = vmatpush1.msra.mxu1 %v3813_v43 }
 0x135   :  { %3142 = vmatmul.mubr.msk.f32.gmra.mxu1 %vm402_vm3, %v378_v12  ;;  %1082 = vmatprep.subr.mxu1 %v3724_v28 }
 0x136   :  { %521 = vmatprep.mubr.f32.mxu1 %v3538_v27 }
 0x139   :  { %3143 = vmatmul.mubr.msk.f32.gmra.mxu1 %vm402_vm3, %v379_v17 }
 0x13a   :  { %527 = vmatprep.mubr.f32.mxu1 %v3538_v27 }
 0x13d   :  { %3144 = vmatmul.mubr.msk.f32.gmra.mxu1 %vm402_vm3, %v380_v8 }
 0x13e   :  { %533 = vmatprep.mubr.f32.mxu1 %v3538_v27 }
 0x141   :  { %3145 = vmatmul.mubr.msk.f32.gmra.mxu1 %vm402_vm3, %v381_v22 }
 0x142   :  { %894 = vmatprep.mubr.f32.mxu1 %v3538_v27 }
 0x1e5   :  { %v493_v47 = vpop.f32.mrf.mxu1 }
 0x1e6   :  { %v494_v48 = vadd.f32 %v493_v47, %v395_v44  ;;  %v649_v47 = vpop.f32.mrf.mxu0 }
 0x1e7   :  { %v495_v50 = vpop.f32.mrf.mxu1 }
 0x1e8   :  { %v3908_v51 = vadd.f32 %v495_v50, %v399_v45  ;;  %562 = vrot.lane.b32.xlu1 %v494_v48, %s3539_s3 }
 0x1e9   :  { %v499_v52 = vpop.f32.mrf.mxu1 }
 0x1ea   :  { %v3911_v54 = vadd.f32 %v499_v52, %v395_v44 }
 0x1eb   :  { %v501_v55 = vpop.f32.mrf.mxu1 }
 0x1ec   :  { %v3913_v46 = vadd.f32 %v501_v55, %v399_v45  ;;  %574 = vrot.lane.b32.xlu1 %v494_v48, %s3540_s8 }
 0x1ed   :  { %v505_v49 = vpop.f32.mrf.mxu1 }
 0x1ee   :  { %v3916_v56 = vadd.f32 %v505_v49, %v395_v44 }
 0x1ef   :  { %v507_v58 = vpop.f32.mrf.mxu1 }
 0x1f0   :  { %v3918_v59 = vadd.f32 %v507_v58, %v399_v45 }
 0x1f1   :  { %v511_v61 = vpop.f32.mrf.mxu1 }
 0x1f2   :  { %v3920_v57 = vadd.f32 %v511_v61, %v395_v44 }
 0x1f3   :  { %v513_v62 = vpop.f32.mrf.mxu1 }
 0x1f4   :  { %v3922_v63 = vadd.f32 %v513_v62, %v399_v45 }
 0x1f5   :  { %v517_v53 = vpop.f32.mrf.mxu1 }
 0x1f6   :  { %v3924_v1 = vadd.f32 %v517_v53, %v395_v44 }
 0x1f7   :  { %v519_v2 = vpop.f32.mrf.mxu1 }
 0x1f8   :  { %v3926_v3 = vadd.f32 %v519_v2, %v399_v45 }
 0x1f9   :  { %v523_v4 = vpop.f32.mrf.mxu1 }
 0x1fa   :  { %v3928_v5 = vadd.f32 %v523_v4, %v395_v44 }
 0x1fb   :  { %v525_v6 = vpop.f32.mrf.mxu1 }
 0x1fc   :  { %v3930_v0 = vadd.f32 %v525_v6, %v399_v45 }
 0x1fd   :  { %v529_v9 = vpop.f32.mrf.mxu1 }
 0x1fe   :  { %v3932_v10 = vadd.f32 %v529_v9, %v395_v44 }
 0x1ff   :  { %v531_v11 = vpop.f32.mrf.mxu1 }
 0x200   :  { %v3934_v12 = vadd.f32 %v531_v11, %v399_v45 }
 0x201   :  { %v535_v13 = vpop.f32.mrf.mxu1 }
 0x202   :  { %v3936_v60 = vadd.f32 %v535_v13, %v395_v44 }
 0x203   :  { %v537_v14 = vpop.f32.mrf.mxu1 }
 0x204   :  { %558 = vrot.lane.b32.xlu0 %v3936_v60, %s3540_s8  ;;  %v538_v15 = vadd.f32 %v537_v14, %v399_v45  ;;  %v3950_v45 = vld [vmem:[%s4858_s10] ss:$0 sm:$0xff] }
 0x205   :  { %v665_v50 = vadd.f32 %v3950_v45, %v649_v47 }
 0x208   :  { %566 = vrot.lane.b32.xlu0 %v538_v15, %s3541_s5 }
 0x25a   :  { %v563_v18 = vpop.permute.xlu1 %562 }
 0x276   :  { %v3941_v16 = vpop.permute.xlu0 %558 }
 0x277   :  { %v569_v17 = vsel %vm402_vm3, %v494_v48, %v3941_v16  ;;  %v3952_v48 = vpop.permute.xlu1 %574 }
 0x278   :  { %v571_v19 = vsel %vm570_vm10, %v569_v17, %v563_v18  ;;  %v577_v49 = vsel %vm402_vm3, %v3952_v48, %v538_v15 }
 0x27a   :  { %v567_v8 = vpop.permute.xlu0 %566 }
 0x27b   :  { %v573_v21 = vsel %vm572_vm11, %v571_v19, %v567_v8 }
 0x27c   :  { %v652_v22 = vadd.f32 %v647_v20, %v573_v21 }
 0x27e   :  { %v3146_v23 = vmul.f32 -1.442695, %v652_v22 }
 0x280   :  { %3305 = vpow2.f32 %v3146_v23 }
 0x28d   :  { %v3306_v25 = vpop.eup %3305 }
 0x28e   :  { %v656_v44 = vadd.f32 1.0, %v3306_v25 }
 0x290   :  { %3307 = vrcp.f32 %v656_v44 }
 0x29d   :  { %v3308_v52 = vpop.eup %3307 }
 0x29e   :  { %v666_v55 = vmul.f32 %v3308_v52, %v665_v50  ;;  %v669_v62 = vsub.f32 1.0, %v3308_v52  ;;  %v675_v2 = vmul.f32 0.0, %v3308_v52 }
 0x2a0   :  { %v667_v58 = vadd.f32 %v666_v55, %v577_v49 }
 0x2a2   :  { %3309 = vtanh.f32 %v667_v58 }
 0x2af   :  { %v3310_v61 = vpop.eup %3309 }
 0x2b0   :  { %671 = vrot.lane.b32.xlu0 %v3310_v61, %s3540_s8 }
 0x2b4   :  { %688 = vrot.lane.b32.xlu0 %v3932_v10, %s3540_s8 }
 0x2b8   :  { %696 = vrot.lane.b32.xlu0 %v3934_v12, %s3541_s5 }
 0x322   :  { %v672_v53 = vpop.permute.xlu0 %671 }
 0x323   :  { %v674_v4 = vmul.f32 %v672_v53, %v669_v62 }
 0x325   :  { %v3962_v6 = vadd.f32 %v675_v2, %v674_v4 }
 0x326   :  { %v3989_v11 = vpop.permute.xlu0 %688 }
 0x327   :  { %678 = vrot.lane.b32.xlu1 %v3962_v6, %s3540_s8  ;;  %v699_v14 = vsel %vm402_vm3, %v3911_v54, %v3989_v11 }
 0x32a   :  { %v697_v17 = vpop.permute.xlu0 %696 }
 0x32b   :  { %692 = vrot.lane.b32.xlu1 %v3911_v54, %s3539_s3 }
 0x32f   :  { %702 = vrot.lane.b32.xlu1 %v3911_v54, %s3540_s8 }
 0x399   :  { %v679_v9 = vpop.permute.xlu1 %678 }
 0x39a   :  { %681 = vst.msk [vmem:[#allocation2] sm:$0xff] %vm402_vm3, %v679_v9  ;;  %3148 = vmatmul.mubr.msk.f32.vlgmr.msra.gmra.mxu0 %vm570_vm10, %v679_v9 }
 0x39b   :  { %969 = vmatpush1.msra.mxu0 %v3729_v29  ;;  %1016 = vmatprep.mubr.f32.mxu0 %v3538_v27 }
 0x39c   :  { %970 = vmatprep.subr.mxu0 %v3734_v30 }
 0x39d   :  { %971 = vmatpush1.msra.mxu0 %v3740_v31  ;;  %v693_v13 = vpop.permute.xlu1 %692 }
 0x39e   :  { %972 = vmatprep.subr.mxu0 %v3747_v32  ;;  %v700_v15 = vsel %vm570_vm10, %v699_v14, %v693_v13 }
 0x39f   :  { %973 = vmatpush1.msra.mxu0 %v3753_v33  ;;  %v701_v18 = vsel %vm572_vm11, %v700_v15, %v697_v17 }
 0x3a0   :  { %974 = vmatprep.subr.mxu0 %v3759_v34 }
 0x3a1   :  { %975 = vmatpush1.msra.mxu0 %v3765_v35  ;;  %v3996_v25 = vpop.permute.xlu1 %702 }
 0x3a2   :  { %976 = vmatprep.subr.mxu0 %v3771_v36  ;;  %v705_v54 = vsel %vm402_vm3, %v3996_v25, %v3934_v12 }
 0x3a3   :  { %977 = vmatpush1.msra.mxu0 %v3777_v37 }
 0x3a4   :  { %978 = vmatprep.subr.mxu0 %v3783_v38 }
 0x3a5   :  { %979 = vmatpush1.msra.mxu0 %v3789_v39 }
 0x3a6   :  { %980 = vmatprep.subr.mxu0 %v3795_v40 }
 0x3a7   :  { %981 = vmatpush1.msra.mxu0 %v3801_v41 }
 0x3a8   :  { %982 = vmatprep.subr.mxu0 %v3807_v42 }
 0x3a9   :  { %983 = vmatpush1.msra.mxu0 %v3813_v43 }
 0x3aa   :  { %1196 = vmatprep.subr.mxu0 %v3724_v28 }
 0x45a   :  { %v774_v19 = vpop.f32.mrf.mxu0 }
 0x45b   :  { %v779_v8 = vadd.f32 %v774_v19, %v701_v18 }
 0x45c   :  { %v776_v23 = vpop.f32.mrf.mxu0 }
 0x45d   :  { %v3149_v20 = vmul.f32 -1.442695, %v779_v8  ;;  %v786_v44 = vadd.f32 %v3950_v45, %v776_v23 }
 0x45f   :  { %3311 = vpow2.f32 %v3149_v20 }
 0x46c   :  { %v3312_v21 = vpop.eup %3311 }
 0x46d   :  { %v783_v22 = vadd.f32 1.0, %v3312_v21 }
 0x46f   :  { %3313 = vrcp.f32 %v783_v22 }
 0x47c   :  { %v3314_v47 = vpop.eup %3313 }
 0x47d   :  { %v787_v50 = vmul.f32 %v3314_v47, %v786_v44  ;;  %v790_v49 = vsub.f32 1.0, %v3314_v47  ;;  %v796_v61 = vmul.f32 %v3314_v47, %v3962_v6 }
 0x47f   :  { %v788_v52 = vadd.f32 %v787_v50, %v705_v54 }
 0x481   :  { %3315 = vtanh.f32 %v788_v52 }
 0x48e   :  { %v3316_v55 = vpop.eup %3315 }
 0x48f   :  { %792 = vrot.lane.b32.xlu0 %v3316_v55, %s3540_s8 }
 0x493   :  { %810 = vrot.lane.b32.xlu0 %v3928_v5, %s3540_s8 }
 0x497   :  { %818 = vrot.lane.b32.xlu0 %v3930_v0, %s3541_s5 }
 0x501   :  { %v793_v58 = vpop.permute.xlu0 %792 }
 0x502   :  { %v795_v62 = vmul.f32 %v793_v58, %v790_v49 }
 0x504   :  { %v4008_v53 = vadd.f32 %v796_v61, %v795_v62 }
 0x505   :  { %v4035_v2 = vpop.permute.xlu0 %810 }
 0x506   :  { %799 = vrot.lane.b32.xlu1 %v4008_v53, %s3540_s8  ;;  %v821_v9 = vsel %vm402_vm3, %v3916_v56, %v4035_v2 }
 0x509   :  { %v819_v14 = vpop.permute.xlu0 %818 }
 0x50a   :  { %814 = vrot.lane.b32.xlu1 %v3916_v56, %s3539_s3 }
 0x50e   :  { %824 = vrot.lane.b32.xlu1 %v3916_v56, %s3540_s8 }
 0x578   :  { %v800_v12 = vpop.permute.xlu1 %799 }
 0x579   :  { %803 = vst.msk [vmem:[#allocation2 + $0x8] sm:$0xff] %vm402_vm3, %v800_v12  ;;  %3150 = vmatmul.mubr.msk.f32.vlgmr.msra.gmra.mxu1 %vm570_vm10, %v800_v12 }
 0x57a   :  { %1083 = vmatpush1.msra.mxu1 %v3729_v29  ;;  %1130 = vmatprep.mubr.f32.mxu1 %v3538_v27 }
 0x57b   :  { %1084 = vmatprep.subr.mxu1 %v3734_v30 }
 0x57c   :  { %1085 = vmatpush1.msra.mxu1 %v3740_v31  ;;  %v815_v4 = vpop.permute.xlu1 %814 }
 0x57d   :  { %1086 = vmatprep.subr.mxu1 %v3747_v32  ;;  %v822_v13 = vsel %vm570_vm10, %v821_v9, %v815_v4 }
 0x57e   :  { %1087 = vmatpush1.msra.mxu1 %v3753_v33  ;;  %v823_v15 = vsel %vm572_vm11, %v822_v13, %v819_v14 }
 0x57f   :  { %1088 = vmatprep.subr.mxu1 %v3759_v34 }
 0x580   :  { %1089 = vmatpush1.msra.mxu1 %v3765_v35  ;;  %v4042_v22 = vpop.permute.xlu1 %824 }
 0x581   :  { %1090 = vmatprep.subr.mxu1 %v3771_v36  ;;  %v827_v56 = vsel %vm402_vm3, %v4042_v22, %v3930_v0 }
 0x582   :  { %1091 = vmatpush1.msra.mxu1 %v3777_v37 }
 0x583   :  { %1092 = vmatprep.subr.mxu1 %v3783_v38 }
 0x584   :  { %1093 = vmatpush1.msra.mxu1 %v3789_v39 }
 0x585   :  { %1094 = vmatprep.subr.mxu1 %v3795_v40 }
 0x586   :  { %1095 = vmatpush1.msra.mxu1 %v3801_v41 }
 0x587   :  { %1096 = vmatprep.subr.mxu1 %v3807_v42 }
 0x588   :  { %1097 = vmatpush1.msra.mxu1 %v3813_v43 }
 0x589   :  { %1310 = vmatprep.subr.mxu1 %v3724_v28 }
 0x639   :  { %v896_v17 = vpop.f32.mrf.mxu1 }
 0x63a   :  { %v901_v18 = vadd.f32 %v896_v17, %v823_v15 }
 0x63b   :  { %v898_v21 = vpop.f32.mrf.mxu1 }
 0x63c   :  { %v3151_v19 = vmul.f32 -1.442695, %v901_v18  ;;  %v908_v23 = vadd.f32 %v3950_v45, %v898_v21 }
 0x63e   :  { %3317 = vpow2.f32 %v3151_v19 }
 0x64b   :  { %v3318_v8 = vpop.eup %3317 }
 0x64c   :  { %v905_v20 = vadd.f32 1.0, %v3318_v8 }
 0x64e   :  { %3319 = vrcp.f32 %v905_v20 }
 0x65b   :  { %v3320_v44 = vpop.eup %3319 }
 0x65c   :  { %v909_v47 = vmul.f32 %v3320_v44, %v908_v23  ;;  %v912_v52 = vsub.f32 1.0, %v3320_v44  ;;  %v918_v49 = vmul.f32 %v3320_v44, %v4008_v53 }
 0x65e   :  { %v910_v50 = vadd.f32 %v909_v47, %v827_v56 }
 0x660   :  { %3321 = vtanh.f32 %v910_v50 }
 0x66d   :  { %v3322_v54 = vpop.eup %3321 }
 0x66e   :  { %914 = vrot.lane.b32.xlu0 %v3322_v54, %s3540_s8 }
 0x672   :  { %932 = vrot.lane.b32.xlu0 %v3924_v1, %s3540_s8 }
 0x676   :  { %940 = vrot.lane.b32.xlu0 %v3926_v3, %s3541_s5 }
 0x6e0   :  { %v915_v55 = vpop.permute.xlu0 %914 }
 0x6e1   :  { %v917_v58 = vmul.f32 %v915_v55, %v912_v52 }
 0x6e3   :  { %v4054_v61 = vadd.f32 %v918_v49, %v917_v58 }
 0x6e4   :  { %v4081_v62 = vpop.permute.xlu0 %932 }
 0x6e5   :  { %921 = vrot.lane.b32.xlu1 %v4054_v61, %s3540_s8  ;;  %v943_v4 = vsel %vm402_vm3, %v3920_v57, %v4081_v62 }
 0x6e8   :  { %v941_v13 = vpop.permute.xlu0 %940 }
 0x6e9   :  { %936 = vrot.lane.b32.xlu1 %v3920_v57, %s3539_s3 }
 0x6ed   :  { %946 = vrot.lane.b32.xlu1 %v3920_v57, %s3540_s8 }
 0x757   :  { %v922_v0 = vpop.permute.xlu1 %921 }
 0x758   :  { %925 = vst.msk [vmem:[#allocation2 + $0x10] sm:$0xff] %vm402_vm3, %v922_v0  ;;  %3152 = vmatmul.mubr.msk.f32.vlgmr.msra.gmra.mxu0 %vm570_vm10, %v922_v0 }
 0x759   :  { %1197 = vmatpush1.msra.mxu0 %v3729_v29  ;;  %1244 = vmatprep.mubr.f32.mxu0 %v3538_v27 }
 0x75a   :  { %1198 = vmatprep.subr.mxu0 %v3734_v30 }
 0x75b   :  { %1199 = vmatpush1.msra.mxu0 %v3740_v31  ;;  %v937_v12 = vpop.permute.xlu1 %936 }
 0x75c   :  { %1200 = vmatprep.subr.mxu0 %v3747_v32  ;;  %v944_v9 = vsel %vm570_vm10, %v943_v4, %v937_v12 }
 0x75d   :  { %1201 = vmatpush1.msra.mxu0 %v3753_v33  ;;  %v945_v14 = vsel %vm572_vm11, %v944_v9, %v941_v13 }
 0x75e   :  { %1202 = vmatprep.subr.mxu0 %v3759_v34 }
 0x75f   :  { %1203 = vmatpush1.msra.mxu0 %v3765_v35  ;;  %v947_v20 = vpop.permute.xlu1 %946 }
 0x760   :  { %1204 = vmatprep.subr.mxu0 %v3771_v36  ;;  %v949_v57 = vsel %vm402_vm3, %v947_v20, %v3926_v3  ;;  %v1060_v12 = vsel %vm402_vm3, %v3924_v1, %v947_v20 }
 0x761   :  { %1205 = vmatpush1.msra.mxu0 %v3777_v37 }
 0x762   :  { %1206 = vmatprep.subr.mxu0 %v3783_v38 }
 0x763   :  { %1207 = vmatpush1.msra.mxu0 %v3789_v39 }
 0x764   :  { %1208 = vmatprep.subr.mxu0 %v3795_v40 }
 0x765   :  { %1209 = vmatpush1.msra.mxu0 %v3801_v41 }
 0x766   :  { %1210 = vmatprep.subr.mxu0 %v3807_v42 }
 0x767   :  { %1211 = vmatpush1.msra.mxu0 %v3813_v43 }
 0x768   :  { %1424 = vmatprep.subr.mxu0 %v3724_v28 }
 0x818   :  { %v1018_v15 = vpop.f32.mrf.mxu0 }
 0x819   :  { %v1023_v17 = vadd.f32 %v1018_v15, %v945_v14 }
 0x81a   :  { %v1020_v28 = vpop.f32.mrf.mxu0 }
 0x81b   :  { %v3153_v18 = vmul.f32 -1.442695, %v1023_v17  ;;  %v1030_v21 = vadd.f32 %v3950_v45, %v1020_v28 }
 0x81d   :  { %3323 = vpow2.f32 %v3153_v18 }
 0x82a   :  { %v3324_v19 = vpop.eup %3323 }
 0x82b   :  { %v1027_v8 = vadd.f32 1.0, %v3324_v19 }
 0x82d   :  { %3325 = vrcp.f32 %v1027_v8 }
 0x83a   :  { %v3326_v23 = vpop.eup %3325 }
 0x83b   :  { %v1031_v44 = vmul.f32 %v3326_v23, %v1030_v21  ;;  %v1034_v50 = vsub.f32 1.0, %v3326_v23  ;;  %v1040_v52 = vmul.f32 %v3326_v23, %v4054_v61 }
 0x83d   :  { %v1032_v47 = vadd.f32 %v1031_v44, %v949_v57 }
 0x83f   :  { %3327 = vtanh.f32 %v1032_v47 }
 0x84c   :  { %v3328_v56 = vpop.eup %3327 }
 0x84d   :  { %1036 = vrot.lane.b32.xlu0 %v3328_v56, %s3540_s8 }
 0x851   :  { %1053 = vrot.lane.b32.xlu0 %v3924_v1, %s3539_s3  ;;  %v1063_v1 = vsel %vm402_vm3, %v4081_v62, %v3922_v63 }
 0x8bf   :  { %v1037_v54 = vpop.permute.xlu0 %1036 }
 0x8c0   :  { %v1039_v55 = vmul.f32 %v1037_v54, %v1034_v50 }
 0x8c2   :  { %v4095_v49 = vadd.f32 %v1040_v52, %v1039_v55 }
 0x8c3   :  { %v1054_v58 = vpop.permute.xlu0 %1053 }
 0x8c4   :  { %1043 = vrot.lane.b32.xlu1 %v4095_v49, %s3540_s8  ;;  %v1061_v4 = vsel %vm570_vm10, %v1060_v12, %v1054_v58 }
 0x8c8   :  { %1057 = vrot.lane.b32.xlu1 %v3922_v63, %s3541_s5 }
 0x936   :  { %v1044_v3 = vpop.permute.xlu1 %1043 }
 0x937   :  { %1047 = vst.msk [vmem:[#allocation2 + $0x18] sm:$0xff] %vm402_vm3, %v1044_v3  ;;  %3154 = vmatmul.mubr.msk.f32.vlgmr.msra.gmra.mxu1 %vm570_vm10, %v1044_v3 }
 0x938   :  { %1311 = vmatpush1.msra.mxu1 %v3729_v29  ;;  %1358 = vmatprep.mubr.f32.mxu1 %v3538_v27 }
 0x939   :  { %1312 = vmatprep.subr.mxu1 %v3734_v30 }
 0x93a   :  { %1313 = vmatpush1.msra.mxu1 %v3740_v31  ;;  %v1058_v0 = vpop.permute.xlu1 %1057 }
 0x93b   :  { %1314 = vmatprep.subr.mxu1 %v3747_v32  ;;  %v1062_v9 = vsel %vm572_vm11, %v1061_v4, %v1058_v0  ;;  %v1288_v0 = vsel %vm402_vm3, %v3932_v10, %v3996_v25 }
 0x93c   :  { %1315 = vmatpush1.msra.mxu1 %v3753_v33 }
 0x93d   :  { %1316 = vmatprep.subr.mxu1 %v3759_v34 }
 0x93e   :  { %1317 = vmatpush1.msra.mxu1 %v3765_v35 }
 0x93f   :  { %1318 = vmatprep.subr.mxu1 %v3771_v36 }
 0x940   :  { %1319 = vmatpush1.msra.mxu1 %v3777_v37 }
 0x941   :  { %1320 = vmatprep.subr.mxu1 %v3783_v38 }
 0x942   :  { %1321 = vmatpush1.msra.mxu1 %v3789_v39 }
 0x943   :  { %1322 = vmatprep.subr.mxu1 %v3795_v40 }
 0x944   :  { %1323 = vmatpush1.msra.mxu1 %v3801_v41 }
 0x945   :  { %1324 = vmatprep.subr.mxu1 %v3807_v42 }
 0x946   :  { %1325 = vmatpush1.msra.mxu1 %v3813_v43 }
 0x9f7   :  { %v1132_v13 = vpop.f32.mrf.mxu1 }
 0x9f8   :  { %v1137_v14 = vadd.f32 %v1132_v13, %v1062_v9 }
 0x9f9   :  { %v1134_v19 = vpop.f32.mrf.mxu1 }
 0x9fa   :  { %v3155_v15 = vmul.f32 -1.442695, %v1137_v14  ;;  %v1144_v8 = vadd.f32 %v3950_v45, %v1134_v19 }
 0x9fc   :  { %3329 = vpow2.f32 %v3155_v15 }
 0xa09   :  { %v3330_v17 = vpop.eup %3329 }
 0xa0a   :  { %v1141_v18 = vadd.f32 1.0, %v3330_v17 }
 0xa0c   :  { %3331 = vrcp.f32 %v1141_v18 }
 0xa19   :  { %v3332_v28 = vpop.eup %3331 }
 0xa1a   :  { %v1145_v21 = vmul.f32 %v3332_v28, %v1144_v8  ;;  %v1148_v44 = vsub.f32 1.0, %v3332_v28  ;;  %v1154_v47 = vmul.f32 %v3332_v28, %v4095_v49 }
 0xa1c   :  { %v1146_v20 = vadd.f32 %v1145_v21, %v1063_v1 }
 0xa1e   :  { %3333 = vtanh.f32 %v1146_v20 }
 0xa2b   :  { %v3334_v23 = vpop.eup %3333 }
 0xa2c   :  { %1150 = vrot.lane.b32.xlu0 %v3334_v23, %s3540_s8 }
 0xa30   :  { %1167 = vrot.lane.b32.xlu0 %v3928_v5, %s3539_s3 }
 0xa9e   :  { %v1151_v57 = vpop.permute.xlu0 %1150 }
 0xa9f   :  { %v1153_v56 = vmul.f32 %v1151_v57, %v1148_v44 }
 0xaa1   :  { %v4131_v50 = vadd.f32 %v1154_v47, %v1153_v56  ;;  %v1402_v56 = vsel %vm402_vm3, %v3936_v60, %v3952_v48 }
 0xaa3   :  { %1157 = vrot.lane.b32.xlu1 %v4131_v50, %s3540_s8 }
 0xaa7   :  { %1171 = vrot.lane.b32.xlu1 %v3918_v59, %s3541_s5 }
 0xb15   :  { %v1158_v63 = vpop.permute.xlu1 %1157 }
 0xb16   :  { %1161 = vst.msk [vmem:[#allocation2 + $0x20] sm:$0xff] %vm402_vm3, %v1158_v63  ;;  %3156 = vmatmul.mubr.msk.f32.vlgmr.msra.gmra.mxu0 %vm570_vm10, %v1158_v63 }
 0xb17   :  { %1425 = vmatpush1.msra.mxu0 %v3729_v29  ;;  %1472 = vmatprep.mubr.f32.mxu0 %v3538_v27  ;;  %v1168_v29 = vpop.permute.xlu0 %1167 }
 0xb18   :  { %1426 = vmatprep.subr.mxu0 %v3734_v30 }
 0xb19   :  { %1427 = vmatpush1.msra.mxu0 %v3740_v31  ;;  %v1172_v30 = vpop.permute.xlu1 %1171  ;;  %v1174_v31 = vsel %vm402_vm3, %v3928_v5, %v4042_v22 }
 0xb1a   :  { %1428 = vmatprep.subr.mxu0 %v3747_v32  ;;  %v1175_v32 = vsel %vm570_vm10, %v1174_v31, %v1168_v29 }
 0xb1b   :  { %1429 = vmatpush1.msra.mxu0 %v3753_v33  ;;  %v1176_v33 = vsel %vm572_vm11, %v1175_v32, %v1172_v30 }
 0xb1c   :  { %1430 = vmatprep.subr.mxu0 %v3759_v34 }
 0xb1d   :  { %1431 = vmatpush1.msra.mxu0 %v3765_v35 }
 0xb1e   :  { %1432 = vmatprep.subr.mxu0 %v3771_v36 }
 0xb1f   :  { %1433 = vmatpush1.msra.mxu0 %v3777_v37 }
 0xb20   :  { %1434 = vmatprep.subr.mxu0 %v3783_v38 }
 0xb21   :  { %1435 = vmatpush1.msra.mxu0 %v3789_v39 }
 0xb22   :  { %1436 = vmatprep.subr.mxu0 %v3795_v40 }
 0xb23   :  { %1437 = vmatpush1.msra.mxu0 %v3801_v41 }
 0xb24   :  { %1438 = vmatprep.subr.mxu0 %v3807_v42 }
 0xb25   :  { %1439 = vmatpush1.msra.mxu0 %v3813_v43  ;;  %v1177_v43 = vsel %vm402_vm3, %v4035_v2, %v3918_v59 }
 0xbd6   :  { %v1246_v34 = vpop.f32.mrf.mxu0 }
 0xbd7   :  { %v1251_v35 = vadd.f32 %v1246_v34, %v1176_v33 }
 0xbd8   :  { %v1248_v39 = vpop.f32.mrf.mxu0 }
 0xbd9   :  { %v3157_v36 = vmul.f32 -1.442695, %v1251_v35  ;;  %v1258_v40 = vadd.f32 %v3950_v45, %v1248_v39 }
 0xbdb   :  { %3335 = vpow2.f32 %v3157_v36 }
 0xbe8   :  { %v3336_v37 = vpop.eup %3335 }
 0xbe9   :  { %v1255_v38 = vadd.f32 1.0, %v3336_v37 }
 0xbeb   :  { %3337 = vrcp.f32 %v1255_v38 }
 0xbf8   :  { %v3338_v41 = vpop.eup %3337 }
 0xbf9   :  { %v1259_v42 = vmul.f32 %v3338_v41, %v1258_v40  ;;  %v1262_v62 = vsub.f32 1.0, %v3338_v41  ;;  %v1268_v52 = vmul.f32 %v3338_v41, %v4131_v50 }
 0xbfb   :  { %v1260_v5 = vadd.f32 %v1259_v42, %v1177_v43 }
 0xbfd   :  { %3339 = vtanh.f32 %v1260_v5 }
 0xc0a   :  { %v3340_v22 = vpop.eup %3339 }
 0xc0b   :  { %1264 = vrot.lane.b32.xlu0 %v3340_v22, %s3540_s8  ;;  %v1579_v22 = vld [vmem:[%s4859_s11 + $0x78] sm:$0xff] }
 0xc0c   :  { %1632 = vmatprep.subr.mxu1 %v1579_v22 }
 0xc0f   :  { %1281 = vrot.lane.b32.xlu0 %v3932_v10, %s3539_s3  ;;  %v1291_v10 = vsel %vm402_vm3, %v3989_v11, %v3913_v46 }
 0xc7d   :  { %v1265_v54 = vpop.permute.xlu0 %1264 }
 0xc7e   :  { %v1267_v55 = vmul.f32 %v1265_v54, %v1262_v62  ;;  %v1578_v62 = vld [vmem:[%s4859_s11 + $0x70] sm:$0xff]  ;;  %v1576_v54 = vld [vmem:[%s4859_s11 + $0x60] sm:$0xff] }
 0xc80   :  { %v4168_v3 = vadd.f32 %v1268_v52, %v1267_v55  ;;  %v1575_v52 = vld [vmem:[%s4859_s11 + $0x58] sm:$0xff]  ;;  %v1573_v55 = vld [vmem:[%s4859_s11 + $0x48] sm:$0xff] }
 0xc81   :  { %v1282_v2 = vpop.permute.xlu0 %1281 }
 0xc82   :  { %1271 = vrot.lane.b32.xlu1 %v4168_v3, %s3540_s8  ;;  %v1289_v12 = vsel %vm570_vm10, %v1288_v0, %v1282_v2  ;;  %v1570_v2 = vld [vmem:[%s4859_s11 + $0x30] sm:$0xff]  ;;  %v1568_v0 = vld [vmem:[%s4859_s11 + $0x20] sm:$0xff] }
 0xc86   :  { %1285 = vrot.lane.b32.xlu1 %v3913_v46, %s3541_s5 }
 0xcf4   :  { %v1272_v59 = vpop.permute.xlu1 %1271 }
 0xcf5   :  { %1275 = vst.msk [vmem:[#allocation2 + $0x28] sm:$0xff] %vm402_vm3, %v1272_v59  ;;  %3158 = vmatmul.mubr.msk.f32.vlgmr.msra.gmra.mxu1 %vm570_vm10, %v1272_v59  ;;  %v1571_v59 = vld [vmem:[%s4859_s11 + $0x38] sm:$0xff] }
 0xcf6   :  { %1680 = vmatprep.mubr.f32.mxu1 %v3538_v27  ;;  %1633 = vmatpush1.msra.mxu1 %v1578_v62 }
 0xcf8   :  { %v1286_v58 = vpop.permute.xlu1 %1285 }
 0xcf9   :  { %v1290_v4 = vsel %vm572_vm11, %v1289_v12, %v1286_v58  ;;  %v1569_v58 = vld [vmem:[%s4859_s11 + $0x28] sm:$0xff]  ;;  %v1567_v12 = vld [vmem:[%s4859_s11 + $0x18] sm:$0xff] }
 0xdb5   :  { %v1360_v9 = vpop.f32.mrf.mxu1 }
 0xdb6   :  { %v1365_v13 = vadd.f32 %v1360_v9, %v1290_v4  ;;  %v1566_v4 = vld [vmem:[%s4859_s11 + $0x10] sm:$0xff]  ;;  %v1565_v9 = vld [vmem:[%s4859_s11 + $0x8] sm:$0xff] }
 0xdb7   :  { %v1362_v18 = vpop.f32.mrf.mxu1 }
 0xdb8   :  { %v3159_v14 = vmul.f32 -1.442695, %v1365_v13  ;;  %v1372_v19 = vadd.f32 %v3950_v45, %v1362_v18  ;;  %v1564_v13 = vld [vmem:[%s4859_s11] sm:$0xff] }
 0xdba   :  { %3341 = vpow2.f32 %v3159_v14 }
 0xdc7   :  { %v3342_v15 = vpop.eup %3341 }
 0xdc8   :  { %v1369_v17 = vadd.f32 1.0, %v3342_v15 }
 0xdca   :  { %3343 = vrcp.f32 %v1369_v17 }
 0xdd7   :  { %v3344_v8 = vpop.eup %3343 }
 0xdd8   :  { %v1373_v28 = vmul.f32 %v3344_v8, %v1372_v19  ;;  %v1376_v1 = vsub.f32 1.0, %v3344_v8  ;;  %v1382_v23 = vmul.f32 %v3344_v8, %v4168_v3 }
 0xdda   :  { %v1374_v25 = vadd.f32 %v1373_v28, %v1291_v10 }
 0xddc   :  { %3345 = vtanh.f32 %v1374_v25 }
 0xde9   :  { %v3346_v21 = vpop.eup %3345 }
 0xdea   :  { %1378 = vrot.lane.b32.xlu0 %v3346_v21, %s3540_s8 }
 0xdee   :  { %1395 = vrot.lane.b32.xlu0 %v3936_v60, %s3539_s3  ;;  %v1405_v60 = vsel %vm402_vm3, %v3941_v16, %v3908_v51 }
 0xe5c   :  { %v1379_v20 = vpop.permute.xlu0 %1378 }
 0xe5d   :  { %v1381_v44 = vmul.f32 %v1379_v20, %v1376_v1 }
 0xe5f   :  { %v1383_v57 = vadd.f32 %v1382_v23, %v1381_v44  ;;  %v4290_v44 = vld [vmem:[#allocation11 + $0x78] sm:$0xff] }
 0xe60   :  { %v1396_v11 = vpop.permute.xlu0 %1395  ;;  %1781 = vmatprep.subr.mxu0 %v4290_v44 }
 0xe61   :  { %1385 = vrot.lane.b32.xlu1 %v1383_v57, %s3540_s8  ;;  %v1403_v63 = vsel %vm570_vm10, %v1402_v56, %v1396_v11  ;;  %v4297_v11 = vld [vmem:[#allocation11 + $0x60] sm:$0xff]  ;;  %v4304_v56 = vld [vmem:[#allocation11 + $0x50] sm:$0xff] }
 0xe65   :  { %1399 = vrot.lane.b32.xlu1 %v3908_v51, %s3541_s5 }
 0xed3   :  { %v1386_v46 = vpop.permute.xlu1 %1385 }
 0xed4   :  { %1389 = vst.msk [vmem:[#allocation2 + $0x30] sm:$0xff] %vm402_vm3, %v1386_v46  ;;  %3160 = vmatmul.mubr.msk.f32.vlgmr.msra.gmra.mxu0 %vm570_vm10, %v1386_v46  ;;  %v4294_v46 = vld [vmem:[#allocation11 + $0x68] sm:$0xff] }
 0xed5   :  { %1829 = vmatprep.mubr.f32.mxu0 %v3538_v27 }
 0xed7   :  { %v1400_v47 = vpop.permute.xlu1 %1399 }
 0xed8   :  { %v1404_v29 = vsel %vm572_vm11, %v1403_v63, %v1400_v47  ;;  %v4301_v47 = vld [vmem:[#allocation11 + $0x58] sm:$0xff]  ;;  %v4307_v63 = vld [vmem:[#allocation11 + $0x48] sm:$0xff] }
 0xf94   :  { %v1474_v30 = vpop.f32.mrf.mxu0 }
 0xf95   :  { %v1479_v31 = vadd.f32 %v1474_v30, %v1404_v29  ;;  %v4310_v29 = vld [vmem:[#allocation11 + $0x40] sm:$0xff]  ;;  %v4313_v30 = vld [vmem:[#allocation11 + $0x38] sm:$0xff] }
 0xf96   :  { %v1476_v35 = vpop.f32.mrf.mxu0 }
 0xf97   :  { %v3161_v32 = vmul.f32 -1.442695, %v1479_v31  ;;  %v1486_v36 = vadd.f32 %v3950_v45, %v1476_v35  ;;  %v4316_v31 = vld [vmem:[#allocation11 + $0x30] sm:$0xff] }
 0xf98   :  { %v4328_v35 = vld [vmem:[#allocation11 + $0x10] sm:$0xff] }
 0xf99   :  { %3347 = vpow2.f32 %v3161_v32  ;;  %v4319_v32 = vld [vmem:[#allocation11 + $0x28] sm:$0xff] }
 0xfa6   :  { %v3348_v33 = vpop.eup %3347 }
 0xfa7   :  { %v1483_v34 = vadd.f32 1.0, %v3348_v33  ;;  %v4322_v33 = vld [vmem:[#allocation11 + $0x20] sm:$0xff] }
 0xfa9   :  { %3349 = vrcp.f32 %v1483_v34  ;;  %v4325_v34 = vld [vmem:[#allocation11 + $0x18] sm:$0xff] }
 0xfb6   :  { %v3350_v37 = vpop.eup %3349 }
 0xfb7   :  { %v1487_v38 = vmul.f32 %v3350_v37, %v1486_v36  ;;  %v1490_v45 = vsub.f32 1.0, %v3350_v37  ;;  %v1496_v41 = vmul.f32 %v3350_v37, %v1383_v57  ;;  %v4331_v36 = vld [vmem:[#allocation11 + $0x8] sm:$0xff]  ;;  %v4334_v37 = vld [vmem:[#allocation11] sm:$0xff] }
 0xfb9   :  { %v1488_v48 = vadd.f32 %v1487_v38, %v1405_v60  ;;  %v1508_v38 = vld [vmem:[#allocation2] sm:$0xff] }
 0xfbb   :  { %3351 = vtanh.f32 %v1488_v48 }
 0xfc8   :  { %v3352_v39 = vpop.eup %3351 }
 0xfc9   :  { %1492 = vrot.lane.b32.xlu0 %v3352_v39, %s3540_s8  ;;  %v1509_v39 = vld [vmem:[#allocation2 + $0x8] sm:$0xff] }
 0xfcd   :  { %1390 = vrot.lane.b32.xlu0 %v1383_v57, %s3539_s3  ;;  %v4292_v57 = vld [vmem:[#allocation11 + $0x70] sm:$0xff] }
 0xfce   :  { %1782 = vmatpush1.msra.mxu0 %v4292_v57 }
 0xfcf   :  { %1783 = vmatprep.subr.mxu0 %v4294_v46 }
 0xfd0   :  { %1784 = vmatpush1.msra.mxu0 %v4297_v11 }
 0xfd1   :  { %1162 = vrot.lane.b32.xlu0 %v4131_v50, %s3539_s3  ;;  %1785 = vmatprep.subr.mxu0 %v4301_v47 }
 0xfd2   :  { %1786 = vmatpush1.msra.mxu0 %v4304_v56 }
 0xfd3   :  { %1787 = vmatprep.subr.mxu0 %v4307_v63 }
 0xfd4   :  { %1788 = vmatpush1.msra.mxu0 %v4310_v29 }
 0xfd5   :  { %926 = vrot.lane.b32.xlu0 %v4054_v61, %s3539_s3  ;;  %1789 = vmatprep.subr.mxu0 %v4313_v30 }
 0xfd6   :  { %1790 = vmatpush1.msra.mxu0 %v4316_v31 }
 0xfd7   :  { %1791 = vmatprep.subr.mxu0 %v4319_v32 }
 0xfd8   :  { %1792 = vmatpush1.msra.mxu0 %v4322_v33 }
 0xfd9   :  { %682 = vrot.lane.b32.xlu0 %v3962_v6, %s3539_s3  ;;  %1793 = vmatprep.subr.mxu0 %v4325_v34 }
 0xfda   :  { %1794 = vmatpush1.msra.mxu0 %v4328_v35 }
 0xfdb   :  { %1795 = vmatprep.subr.mxu0 %v4331_v36 }
 0xfdc   :  { %1796 = vmatpush1.msra.mxu0 %v4334_v37 }
 0xfdd   :  { %1830 = vmatmul.mubr.f32.vlgmr.msra.gmra.mxu0 %v3538_v27  ;;  %1907 = vmatprep.subr.mxu0 %v4290_v44 }
 0xfde   :  { %1908 = vmatpush1.msra.mxu0 %v4292_v57  ;;  %1955 = vmatprep.mubr.f32.mxu0 %v3538_v27 }
 0xfdf   :  { %1909 = vmatprep.subr.mxu0 %v4294_v46 }
 0xfe0   :  { %1910 = vmatpush1.msra.mxu0 %v4297_v11 }
 0xfe1   :  { %1911 = vmatprep.subr.mxu0 %v4301_v47 }
 0xfe2   :  { %1912 = vmatpush1.msra.mxu0 %v4304_v56 }
 0xfe3   :  { %1913 = vmatprep.subr.mxu0 %v4307_v63 }
 0xfe4   :  { %1914 = vmatpush1.msra.mxu0 %v4310_v29 }
 0xfe5   :  { %1915 = vmatprep.subr.mxu0 %v4313_v30 }
 0xfe6   :  { %1916 = vmatpush1.msra.mxu0 %v4316_v31 }
 0xfe7   :  { %1917 = vmatprep.subr.mxu0 %v4319_v32 }
 0xfe8   :  { %1918 = vmatpush1.msra.mxu0 %v4322_v33 }
 0xfe9   :  { %1919 = vmatprep.subr.mxu0 %v4325_v34 }
 0xfea   :  { %1920 = vmatpush1.msra.mxu0 %v4328_v35 }
 0xfeb   :  { %1921 = vmatprep.subr.mxu0 %v4331_v36 }
 0xfec   :  { %1922 = vmatpush1.msra.mxu0 %v4334_v37 }
 0xfed   :  { %2147 = vmatprep.subr.mxu0 %v4290_v44 }
0x103b   :  { %v1493_v40 = vpop.permute.xlu0 %1492 }
0x103c   :  { %v1495_v51 = vmul.f32 %v1493_v40, %v1490_v45 }
0x103e   :  { %v1497_v16 = vadd.f32 %v1496_v41, %v1495_v51  ;;  %v1510_v41 = vld [vmem:[#allocation2 + $0x10] sm:$0xff] }
0x103f   :  { %v1391_v42 = vpop.permute.xlu0 %1390 }
0x1040   :  { %1394 = vst.msk [vmem:[#allocation3 + $0x8] sm:$0xff] %vm402_vm3, %v1391_v42  ;;  %1504 = vrot.lane.b32.xlu1 %v1497_v16, %s3539_s3 }
0x1043   :  { %v1163_v43 = vpop.permute.xlu0 %1162 }
0x1044   :  { %1166 = vst.msk [vmem:[#allocation3 + $0x18] sm:$0xff] %vm402_vm3, %v1163_v43  ;;  %1276 = vrot.lane.b32.xlu1 %v4168_v3, %s3539_s3  ;;  %v1572_v3 = vld [vmem:[%s4859_s11 + $0x40] sm:$0xff] }
0x1047   :  { %v927_v61 = vpop.permute.xlu0 %926  ;;  %v1517_v50 = vld [vmem:[#allocation3 + $0x8] sm:$0xff] }
0x1048   :  { %930 = vst.msk [vmem:[#allocation3 + $0x28] sm:$0xff] %vm402_vm3, %v927_v61  ;;  %1048 = vrot.lane.b32.xlu1 %v4095_v49, %s3539_s3  ;;  %1534 = vrot.lane.b32.xlu0 %v1517_v50, %s3539_s3  ;;  %v1577_v49 = vld [vmem:[%s4859_s11 + $0x68] sm:$0xff]  ;;  %v1512_v61 = vld [vmem:[#allocation2 + $0x20] sm:$0xff] }
0x1049   :  { %1634 = vmatprep.subr.mxu1 %v1577_v49  ;;  %v1514_v49 = vld [vmem:[#allocation2 + $0x30] sm:$0xff] }
0x104a   :  { %1635 = vmatpush1.msra.mxu1 %v1576_v54 }
0x104b   :  { %v683_v6 = vpop.permute.xlu0 %682  ;;  %v1519_v5 = vld [vmem:[#allocation3 + $0x18] sm:$0xff]  ;;  %1636 = vmatprep.subr.mxu1 %v1575_v52 }
0x104c   :  { %686 = vst.msk [vmem:[#allocation3 + $0x38] sm:$0xff] %vm402_vm3, %v683_v6  ;;  %804 = vrot.lane.b32.xlu1 %v4008_v53, %s3539_s3  ;;  %1538 = vrot.lane.b32.xlu0 %v1519_v5, %s3539_s3  ;;  %v1574_v53 = vld [vmem:[%s4859_s11 + $0x50] sm:$0xff]  ;;  %v1513_v5 = vld [vmem:[#allocation2 + $0x28] sm:$0xff]  ;;  %s4878_s11 = sld [smem:[#allocation25_spill]] }
0x104d   :  { %1637 = vmatpush1.msra.mxu1 %v1574_v53 }
0x104e   :  { %1638 = vmatprep.subr.mxu1 %v1573_v55 }
0x104f   :  { %1639 = vmatpush1.msra.mxu1 %v1572_v3  ;;  %v1521_v20 = vld [vmem:[#allocation3 + $0x28] sm:$0xff]  ;;  %v1580_v3 = vld [vmem:[%s4860_s12] sm:$0x3] }
0x1050   :  { %1499 = vrot.lane.b32.xlu0 %v1497_v16, %s3540_s8  ;;  %1640 = vmatprep.subr.mxu1 %v1571_v59  ;;  %v1511_v16 = vld [vmem:[#allocation2 + $0x18] sm:$0xff]  ;;  %v1585_v59 = vrot.slane %v1580_v3, %v394_v7 }
0x1051   :  { %1641 = vmatpush1.msra.mxu1 %v1570_v2  ;;  %v1589_v2 = vrot.slane %v1580_v3, %v398_v26 }
0x1052   :  { %1642 = vmatprep.subr.mxu1 %v1569_v58 }
0x1053   :  { %1643 = vmatpush1.msra.mxu1 %v1568_v0  ;;  %v1523_v23 = vld [vmem:[#allocation3 + $0x38] sm:$0xff] }
0x1054   :  { %1644 = vmatprep.subr.mxu1 %v1567_v12 }
0x1055   :  { %1645 = vmatpush1.msra.mxu1 %v1566_v4 }
0x1056   :  { %1646 = vmatprep.subr.mxu1 %v1565_v9 }
0x1057   :  { %1647 = vmatpush1.msra.mxu1 %v1564_v13 }
0x1058   :  { %2027 = vmatprep.subr.mxu1 %v4290_v44 }
0x10b2   :  { %v1505_v14 = vpop.permute.xlu1 %1504 }
0x10b3   :  { %1507 = vst.msk [vmem:[#allocation3] sm:$0xff] %vm402_vm3, %v1505_v14 }
0x10b6   :  { %v1277_v15 = vpop.permute.xlu1 %1276 }
0x10b7   :  { %1280 = vst.msk [vmem:[#allocation3 + $0x10] sm:$0xff] %vm402_vm3, %v1277_v15 }
0x10ba   :  { %v1049_v17 = vpop.permute.xlu1 %1048  ;;  %v4277_v18 = vpop.permute.xlu0 %1534  ;;  %v1516_v19 = vld [vmem:[#allocation3] sm:$0xff] }
0x10bb   :  { %1052 = vst.msk [vmem:[#allocation3 + $0x20] sm:$0xff] %vm402_vm3, %v1049_v17  ;;  %1532 = vrot.lane.b32.xlu1 %v1516_v19, %s3539_s3  ;;  %v1557_v45 = vsel %vm402_vm3, %v1509_v39, %v4277_v18 }
0x10be   :  { %v805_v8 = vpop.permute.xlu1 %804  ;;  %v4281_v28 = vpop.permute.xlu0 %1538  ;;  %v1518_v10 = vld [vmem:[#allocation3 + $0x10] sm:$0xff] }
0x10bf   :  { %808 = vst.msk [vmem:[#allocation3 + $0x30] sm:$0xff] %vm402_vm3, %v805_v8  ;;  %1536 = vrot.lane.b32.xlu1 %v1518_v10, %s3539_s3  ;;  %v1559_v43 = vsel %vm402_vm3, %v1511_v16, %v4281_v28 }
0x10c2   :  { %v1500_v25 = vpop.permute.xlu0 %1499  ;;  %v1520_v21 = vld [vmem:[#allocation3 + $0x20] sm:$0xff] }
0x10c3   :  { %1503 = vst.msk [vmem:[#allocation2 + $0x38] sm:$0xff] %vm402_vm3, %v1500_v25  ;;  %1540 = vrot.lane.b32.xlu1 %v1520_v21, %s3539_s3 }
0x10c6   :  { %v1522_v1 = vld [vmem:[#allocation3 + $0x30] sm:$0xff] }
0x10c7   :  { %1544 = vrot.lane.b32.xlu0 %v1522_v1, %s3539_s3  ;;  %1542 = vrot.lane.b32.xlu1 %v1521_v20, %s3539_s3 }
0x10ca   :  { %v1515_v53 = vld [vmem:[#allocation2 + $0x38] sm:$0xff] }
0x10cb   :  { %1546 = vrot.lane.b32.xlu1 %v1523_v23, %s3539_s3 }
0x112d   :  { %v1533_v60 = vpop.permute.xlu1 %1532 }
0x112e   :  { %v1556_v48 = vsel %vm402_vm3, %v1508_v38, %v1533_v60 }
0x112f   :  { %3162 = vmatmul.mubr.msk.f32.vlgmr.msra.gmra.mxu1 %vm570_vm10, %v1556_v48 }
0x1130   :  { %1686 = vmatprep.mubr.f32.mxu1 %v3538_v27  ;;  %2028 = vmatpush1.msra.mxu1 %v4292_v57 }
0x1131   :  { %2029 = vmatprep.subr.mxu1 %v4294_v46  ;;  %v1537_v40 = vpop.permute.xlu1 %1536 }
0x1132   :  { %2030 = vmatpush1.msra.mxu1 %v4297_v11  ;;  %v1558_v51 = vsel %vm402_vm3, %v1510_v41, %v1537_v40 }
0x1133   :  { %3163 = vmatmul.mubr.msk.f32.gmra.mxu1 %vm570_vm10, %v1557_v45  ;;  %2031 = vmatprep.subr.mxu1 %v4301_v47 }
0x1134   :  { %1692 = vmatprep.mubr.f32.mxu1 %v3538_v27  ;;  %2032 = vmatpush1.msra.mxu1 %v4304_v56 }
0x1135   :  { %2033 = vmatprep.subr.mxu1 %v4307_v63  ;;  %v1541_v42 = vpop.permute.xlu1 %1540 }
0x1136   :  { %2034 = vmatpush1.msra.mxu1 %v4310_v29  ;;  %v1560_v50 = vsel %vm402_vm3, %v1512_v61, %v1541_v42 }
0x1137   :  { %3164 = vmatmul.mubr.msk.f32.gmra.mxu1 %vm570_vm10, %v1558_v51  ;;  %2035 = vmatprep.subr.mxu1 %v4313_v30 }
0x1138   :  { %1698 = vmatprep.mubr.f32.mxu1 %v3538_v27  ;;  %2036 = vmatpush1.msra.mxu1 %v4316_v31 }
0x1139   :  { %2037 = vmatprep.subr.mxu1 %v4319_v32  ;;  %v1543_v6 = vpop.permute.xlu1 %1542  ;;  %v1545_v62 = vpop.permute.xlu0 %1544 }
0x113a   :  { %2038 = vmatpush1.msra.mxu1 %v4322_v33  ;;  %v1561_v22 = vsel %vm402_vm3, %v1513_v5, %v1543_v6  ;;  %v1562_v54 = vsel %vm402_vm3, %v1514_v49, %v1545_v62 }
0x113b   :  { %3165 = vmatmul.mubr.msk.f32.gmra.mxu1 %vm570_vm10, %v1559_v43  ;;  %2039 = vmatprep.subr.mxu1 %v4325_v34 }
0x113c   :  { %1704 = vmatprep.mubr.f32.mxu1 %v3538_v27  ;;  %2040 = vmatpush1.msra.mxu1 %v4328_v35 }
0x113d   :  { %2041 = vmatprep.subr.mxu1 %v4331_v36  ;;  %v1547_v52 = vpop.permute.xlu1 %1546 }
0x113e   :  { %2042 = vmatpush1.msra.mxu1 %v4334_v37  ;;  %v1563_v55 = vsel %vm402_vm3, %v1515_v53, %v1547_v52 }
0x113f   :  { %3166 = vmatmul.mubr.msk.f32.gmra.mxu1 %vm570_vm10, %v1560_v50  ;;  %2259 = vmatprep.subr.mxu1 %v4290_v44 }
0x1140   :  { %1710 = vmatprep.mubr.f32.mxu1 %v3538_v27 }
0x1143   :  { %3167 = vmatmul.mubr.msk.f32.gmra.mxu1 %vm570_vm10, %v1561_v22  ;;  %v1831_v22 = vpop.f32.mrf.mxu0 }
0x1144   :  { %1716 = vmatprep.mubr.f32.mxu1 %v3538_v27 }
0x1145   :  { %v1833_v3 = vpop.f32.mrf.mxu0 }
0x1147   :  { %3168 = vmatmul.mubr.msk.f32.gmra.mxu1 %vm570_vm10, %v1562_v54 }
0x1148   :  { %1722 = vmatprep.mubr.f32.mxu1 %v3538_v27 }
0x114b   :  { %3169 = vmatmul.mubr.msk.f32.gmra.mxu1 %vm570_vm10, %v1563_v55  ;;  %v4449_v55 = vld [vmem:[%s4862_s14] ss:$0 sm:$0xff] }
0x114c   :  { %2075 = vmatprep.mubr.f32.mxu1 %v3538_v27 }
0x11ef   :  { %v1682_v58 = vpop.f32.mrf.mxu1 }
0x11f0   :  { %v1683_v0 = vadd.f32 %v1682_v58, %v1585_v59 }
0x11f1   :  { %v1684_v12 = vpop.f32.mrf.mxu1 }
0x11f2   :  { %v4407_v4 = vadd.f32 %v1684_v12, %v1589_v2  ;;  %1751 = vrot.lane.b32.xlu1 %v1683_v0, %s3539_s3 }
0x11f3   :  { %v1688_v9 = vpop.f32.mrf.mxu1 }
0x11f4   :  { %v4410_v13 = vadd.f32 %v1688_v9, %v1585_v59 }
0x11f5   :  { %v1690_v14 = vpop.f32.mrf.mxu1 }
0x11f6   :  { %v4412_v15 = vadd.f32 %v1690_v14, %v1589_v2  ;;  %1761 = vrot.lane.b32.xlu1 %v1683_v0, %s3540_s8 }
0x11f7   :  { %v1694_v17 = vpop.f32.mrf.mxu1 }
0x11f8   :  { %v4415_v7 = vadd.f32 %v1694_v17, %v1585_v59 }
0x11f9   :  { %v1696_v24 = vpop.f32.mrf.mxu1 }
0x11fa   :  { %v4417_v26 = vadd.f32 %v1696_v24, %v1589_v2 }
0x11fb   :  { %v1700_v18 = vpop.f32.mrf.mxu1 }
0x11fc   :  { %v4419_v19 = vadd.f32 %v1700_v18, %v1585_v59 }
0x11fd   :  { %v1702_v8 = vpop.f32.mrf.mxu1 }
0x11fe   :  { %v4421_v28 = vadd.f32 %v1702_v8, %v1589_v2 }
0x11ff   :  { %v1706_v10 = vpop.f32.mrf.mxu1 }
0x1200   :  { %v4423_v25 = vadd.f32 %v1706_v10, %v1585_v59 }
0x1201   :  { %v1708_v21 = vpop.f32.mrf.mxu1 }
0x1202   :  { %v4425_v1 = vadd.f32 %v1708_v21, %v1589_v2 }
0x1203   :  { %v1712_v20 = vpop.f32.mrf.mxu1 }
0x1204   :  { %v4427_v23 = vadd.f32 %v1712_v20, %v1585_v59 }
0x1205   :  { %v1714_v38 = vpop.f32.mrf.mxu1 }
0x1206   :  { %v4429_v60 = vadd.f32 %v1714_v38, %v1589_v2 }
0x1207   :  { %v1718_v48 = vpop.f32.mrf.mxu1 }
0x1208   :  { %v4431_v39 = vadd.f32 %v1718_v48, %v1585_v59 }
0x1209   :  { %v1720_v45 = vpop.f32.mrf.mxu1 }
0x120a   :  { %v4433_v40 = vadd.f32 %v1720_v45, %v1589_v2 }
0x120b   :  { %v1724_v41 = vpop.f32.mrf.mxu1 }
0x120c   :  { %v4435_v51 = vadd.f32 %v1724_v41, %v1585_v59 }
0x120d   :  { %v1726_v16 = vpop.f32.mrf.mxu1 }
0x120e   :  { %1747 = vrot.lane.b32.xlu0 %v4435_v51, %s3540_s8  ;;  %v1727_v42 = vadd.f32 %v1726_v16, %v1589_v2  ;;  %v1849_v2 = vadd.f32 %v4449_v55, %v1833_v3 }
0x1212   :  { %1755 = vrot.lane.b32.xlu0 %v1727_v42, %s3541_s5 }
0x1264   :  { %v1752_v50 = vpop.permute.xlu1 %1751 }
0x1268   :  { %v4451_v59 = vpop.permute.xlu1 %1761 }
0x1269   :  { %v1764_v12 = vsel %vm402_vm3, %v4451_v59, %v1727_v42 }
0x1280   :  { %v4440_v43 = vpop.permute.xlu0 %1747 }
0x1281   :  { %v1758_v61 = vsel %vm402_vm3, %v1683_v0, %v4440_v43 }
0x1282   :  { %v1759_v6 = vsel %vm570_vm10, %v1758_v61, %v1752_v50 }
0x1284   :  { %v1756_v5 = vpop.permute.xlu0 %1755 }
0x1285   :  { %v1760_v62 = vsel %vm572_vm11, %v1759_v6, %v1756_v5 }
0x1286   :  { %v1836_v49 = vadd.f32 %v1831_v22, %v1760_v62 }
0x1288   :  { %v3170_v54 = vmul.f32 -1.442695, %v1836_v49 }
0x128a   :  { %3353 = vpow2.f32 %v3170_v54 }
0x1297   :  { %v3354_v52 = vpop.eup %3353 }
0x1298   :  { %v1840_v53 = vadd.f32 1.0, %v3354_v52 }
0x129a   :  { %3355 = vrcp.f32 %v1840_v53 }
0x12a7   :  { %v3356_v58 = vpop.eup %3355 }
0x12a8   :  { %v1850_v0 = vmul.f32 %v3356_v58, %v1849_v2  ;;  %v1853_v17 = vsub.f32 1.0, %v3356_v58  ;;  %v1859_v18 = vmul.f32 0.0, %v3356_v58 }
0x12aa   :  { %v1851_v9 = vadd.f32 %v1850_v0, %v1764_v12 }
0x12ac   :  { %3357 = vtanh.f32 %v1851_v9 }
0x12b9   :  { %v3358_v14 = vpop.eup %3357 }
0x12ba   :  { %1855 = vrot.lane.b32.xlu0 %v3358_v14, %s3540_s8 }
0x12be   :  { %1871 = vrot.lane.b32.xlu0 %v4431_v39, %s3540_s8 }
0x12c2   :  { %1879 = vrot.lane.b32.xlu0 %v4433_v40, %s3541_s5 }
0x132c   :  { %v1856_v24 = vpop.permute.xlu0 %1855 }
0x132d   :  { %v1858_v8 = vmul.f32 %v1856_v24, %v1853_v17 }
0x132f   :  { %v4461_v10 = vadd.f32 %v1859_v18, %v1858_v8 }
0x1330   :  { %v4488_v20 = vpop.permute.xlu0 %1871 }
0x1331   :  { %1862 = vrot.lane.b32.xlu1 %v4461_v10, %s3540_s8  ;;  %v1882_v48 = vsel %vm402_vm3, %v4410_v13, %v4488_v20 }
0x1334   :  { %v1880_v41 = vpop.permute.xlu0 %1879 }
0x1335   :  { %1875 = vrot.lane.b32.xlu1 %v4410_v13, %s3539_s3 }
0x1339   :  { %1885 = vrot.lane.b32.xlu1 %v4410_v13, %s3540_s8 }
0x13a3   :  { %v1863_v21 = vpop.permute.xlu1 %1862 }
0x13a4   :  { %1865 = vst.msk [vmem:[#allocation2] sm:$0xff] %vm402_vm3, %v1863_v21  ;;  %3172 = vmatmul.mubr.msk.f32.vlgmr.msra.gmra.mxu0 %vm570_vm10, %v1863_v21 }
0x13a5   :  { %2148 = vmatpush1.msra.mxu0 %v4292_v57  ;;  %2195 = vmatprep.mubr.f32.mxu0 %v3538_v27 }
0x13a6   :  { %2149 = vmatprep.subr.mxu0 %v4294_v46 }
0x13a7   :  { %2150 = vmatpush1.msra.mxu0 %v4297_v11  ;;  %v1876_v38 = vpop.permute.xlu1 %1875 }
0x13a8   :  { %2151 = vmatprep.subr.mxu0 %v4301_v47  ;;  %v1883_v45 = vsel %vm570_vm10, %v1882_v48, %v1876_v38 }
0x13a9   :  { %2152 = vmatpush1.msra.mxu0 %v4304_v56  ;;  %v1884_v16 = vsel %vm572_vm11, %v1883_v45, %v1880_v41 }
0x13aa   :  { %2153 = vmatprep.subr.mxu0 %v4307_v63 }
0x13ab   :  { %2154 = vmatpush1.msra.mxu0 %v4310_v29  ;;  %v4495_v62 = vpop.permute.xlu1 %1885 }
0x13ac   :  { %2155 = vmatprep.subr.mxu0 %v4313_v30  ;;  %v1888_v13 = vsel %vm402_vm3, %v4495_v62, %v4433_v40 }
0x13ad   :  { %2156 = vmatpush1.msra.mxu0 %v4316_v31 }
0x13ae   :  { %2157 = vmatprep.subr.mxu0 %v4319_v32 }
0x13af   :  { %2158 = vmatpush1.msra.mxu0 %v4322_v33 }
0x13b0   :  { %2159 = vmatprep.subr.mxu0 %v4325_v34 }
0x13b1   :  { %2160 = vmatpush1.msra.mxu0 %v4328_v35 }
0x13b2   :  { %2161 = vmatprep.subr.mxu0 %v4331_v36 }
0x13b3   :  { %2162 = vmatpush1.msra.mxu0 %v4334_v37 }
0x13b4   :  { %2371 = vmatprep.subr.mxu0 %v4290_v44 }
0x1464   :  { %v1957_v42 = vpop.f32.mrf.mxu0 }
0x1465   :  { %v1962_v61 = vadd.f32 %v1957_v42, %v1884_v16 }
0x1466   :  { %v1959_v22 = vpop.f32.mrf.mxu0 }
0x1467   :  { %v3173_v50 = vmul.f32 -1.442695, %v1962_v61  ;;  %v1969_v49 = vadd.f32 %v4449_v55, %v1959_v22 }
0x1469   :  { %3359 = vpow2.f32 %v3173_v50 }
0x1476   :  { %v3360_v6 = vpop.eup %3359 }
0x1477   :  { %v1966_v5 = vadd.f32 1.0, %v3360_v6 }
0x1479   :  { %3361 = vrcp.f32 %v1966_v5 }
0x1486   :  { %v3362_v54 = vpop.eup %3361 }
0x1487   :  { %v1970_v52 = vmul.f32 %v3362_v54, %v1969_v49  ;;  %v1973_v2 = vsub.f32 1.0, %v3362_v54  ;;  %v1979_v0 = vmul.f32 %v3362_v54, %v4461_v10 }
0x1489   :  { %v1971_v53 = vadd.f32 %v1970_v52, %v1888_v13 }
0x148b   :  { %3363 = vtanh.f32 %v1971_v53 }
0x1498   :  { %v3364_v3 = vpop.eup %3363 }
0x1499   :  { %1975 = vrot.lane.b32.xlu0 %v3364_v3, %s3540_s8 }
0x149d   :  { %1991 = vrot.lane.b32.xlu0 %v4427_v23, %s3540_s8 }
0x14a1   :  { %1999 = vrot.lane.b32.xlu0 %v4429_v60, %s3541_s5 }
0x150b   :  { %v1976_v58 = vpop.permute.xlu0 %1975 }
0x150c   :  { %v1978_v12 = vmul.f32 %v1976_v58, %v1973_v2 }
0x150e   :  { %v4507_v9 = vadd.f32 %v1979_v0, %v1978_v12 }
0x150f   :  { %v4534_v14 = vpop.permute.xlu0 %1991 }
0x1510   :  { %1982 = vrot.lane.b32.xlu1 %v4507_v9, %s3540_s8  ;;  %v2002_v24 = vsel %vm402_vm3, %v4415_v7, %v4534_v14 }
0x1513   :  { %v2000_v8 = vpop.permute.xlu0 %1999 }
0x1514   :  { %1995 = vrot.lane.b32.xlu1 %v4415_v7, %s3539_s3 }
0x1518   :  { %2005 = vrot.lane.b32.xlu1 %v4415_v7, %s3540_s8 }
0x1582   :  { %v1983_v40 = vpop.permute.xlu1 %1982 }
0x1583   :  { %1985 = vst.msk [vmem:[#allocation2 + $0x8] sm:$0xff] %vm402_vm3, %v1983_v40  ;;  %3174 = vmatmul.mubr.msk.f32.vlgmr.msra.gmra.mxu1 %vm570_vm10, %v1983_v40 }
0x1584   :  { %2260 = vmatpush1.msra.mxu1 %v4292_v57  ;;  %2307 = vmatprep.mubr.f32.mxu1 %v3538_v27 }
0x1585   :  { %2261 = vmatprep.subr.mxu1 %v4294_v46 }
0x1586   :  { %2262 = vmatpush1.msra.mxu1 %v4297_v11  ;;  %v1996_v17 = vpop.permute.xlu1 %1995 }
0x1587   :  { %2263 = vmatprep.subr.mxu1 %v4301_v47  ;;  %v2003_v18 = vsel %vm570_vm10, %v2002_v24, %v1996_v17 }
0x1588   :  { %2264 = vmatpush1.msra.mxu1 %v4304_v56  ;;  %v2004_v21 = vsel %vm572_vm11, %v2003_v18, %v2000_v8 }
0x1589   :  { %2265 = vmatprep.subr.mxu1 %v4307_v63 }
0x158a   :  { %2266 = vmatpush1.msra.mxu1 %v4310_v29  ;;  %v4541_v61 = vpop.permute.xlu1 %2005 }
0x158b   :  { %2267 = vmatprep.subr.mxu1 %v4313_v30  ;;  %v2008_v7 = vsel %vm402_vm3, %v4541_v61, %v4429_v60 }
0x158c   :  { %2268 = vmatpush1.msra.mxu1 %v4316_v31 }
0x158d   :  { %2269 = vmatprep.subr.mxu1 %v4319_v32 }
0x158e   :  { %2270 = vmatpush1.msra.mxu1 %v4322_v33 }
0x158f   :  { %2271 = vmatprep.subr.mxu1 %v4325_v34 }
0x1590   :  { %2272 = vmatpush1.msra.mxu1 %v4328_v35 }
0x1591   :  { %2273 = vmatprep.subr.mxu1 %v4331_v36 }
0x1592   :  { %2274 = vmatpush1.msra.mxu1 %v4334_v37 }
0x1593   :  { %2483 = vmatprep.subr.mxu1 %v4290_v44 }
0x1643   :  { %v2077_v38 = vpop.f32.mrf.mxu1 }
0x1644   :  { %v2082_v48 = vadd.f32 %v2077_v38, %v2004_v21 }
0x1645   :  { %v2079_v42 = vpop.f32.mrf.mxu1 }
0x1646   :  { %v3175_v45 = vmul.f32 -1.442695, %v2082_v48  ;;  %v2089_v50 = vadd.f32 %v4449_v55, %v2079_v42 }
0x1648   :  { %3365 = vpow2.f32 %v3175_v45 }
0x1655   :  { %v3366_v41 = vpop.eup %3365 }
0x1656   :  { %v2086_v16 = vadd.f32 1.0, %v3366_v41 }
0x1658   :  { %3367 = vrcp.f32 %v2086_v16 }
0x1665   :  { %v3368_v6 = vpop.eup %3367 }
0x1666   :  { %v2090_v5 = vmul.f32 %v3368_v6, %v2089_v50  ;;  %v2093_v54 = vsub.f32 1.0, %v3368_v6  ;;  %v2099_v13 = vmul.f32 %v3368_v6, %v4507_v9 }
0x1668   :  { %v2091_v22 = vadd.f32 %v2090_v5, %v2008_v7 }
0x166a   :  { %3369 = vtanh.f32 %v2091_v22 }
0x1677   :  { %v3370_v49 = vpop.eup %3369 }
0x1678   :  { %2095 = vrot.lane.b32.xlu0 %v3370_v49, %s3540_s8 }
0x167c   :  { %2111 = vrot.lane.b32.xlu0 %v4423_v25, %s3540_s8 }
0x1680   :  { %2119 = vrot.lane.b32.xlu0 %v4425_v1, %s3541_s5 }
0x16ea   :  { %v2096_v52 = vpop.permute.xlu0 %2095 }
0x16eb   :  { %v2098_v53 = vmul.f32 %v2096_v52, %v2093_v54 }
0x16ed   :  { %v4553_v3 = vadd.f32 %v2099_v13, %v2098_v53 }
0x16ee   :  { %v4580_v2 = vpop.permute.xlu0 %2111 }
0x16ef   :  { %2102 = vrot.lane.b32.xlu1 %v4553_v3, %s3540_s8  ;;  %v2122_v0 = vsel %vm402_vm3, %v4419_v19, %v4580_v2 }
0x16f2   :  { %v2120_v40 = vpop.permute.xlu0 %2119 }
0x16f3   :  { %2115 = vrot.lane.b32.xlu1 %v4419_v19, %s3539_s3 }
0x16f7   :  { %2125 = vrot.lane.b32.xlu1 %v4419_v19, %s3540_s8 }
0x1761   :  { %v2103_v60 = vpop.permute.xlu1 %2102 }
0x1762   :  { %2105 = vst.msk [vmem:[#allocation2 + $0x10] sm:$0xff] %vm402_vm3, %v2103_v60  ;;  %3176 = vmatmul.mubr.msk.f32.vlgmr.msra.gmra.mxu0 %vm570_vm10, %v2103_v60 }
0x1763   :  { %2372 = vmatpush1.msra.mxu0 %v4292_v57  ;;  %2419 = vmatprep.mubr.f32.mxu0 %v3538_v27 }
0x1764   :  { %2373 = vmatprep.subr.mxu0 %v4294_v46 }
0x1765   :  { %2374 = vmatpush1.msra.mxu0 %v4297_v11  ;;  %v2116_v58 = vpop.permute.xlu1 %2115 }
0x1766   :  { %2375 = vmatprep.subr.mxu0 %v4301_v47  ;;  %v2123_v12 = vsel %vm570_vm10, %v2122_v0, %v2116_v58 }
0x1767   :  { %2376 = vmatpush1.msra.mxu0 %v4304_v56  ;;  %v2124_v17 = vsel %vm572_vm11, %v2123_v12, %v2120_v40 }
0x1768   :  { %2377 = vmatprep.subr.mxu0 %v4307_v63 }
0x1769   :  { %2378 = vmatpush1.msra.mxu0 %v4310_v29  ;;  %v2126_v48 = vpop.permute.xlu1 %2125 }
0x176a   :  { %2379 = vmatprep.subr.mxu0 %v4313_v30  ;;  %v2128_v19 = vsel %vm402_vm3, %v2126_v48, %v4425_v1  ;;  %v2237_v13 = vsel %vm402_vm3, %v4423_v25, %v2126_v48 }
0x176b   :  { %2380 = vmatpush1.msra.mxu0 %v4316_v31 }
0x176c   :  { %2381 = vmatprep.subr.mxu0 %v4319_v32 }
0x176d   :  { %2382 = vmatpush1.msra.mxu0 %v4322_v33 }
0x176e   :  { %2383 = vmatprep.subr.mxu0 %v4325_v34 }
0x176f   :  { %2384 = vmatpush1.msra.mxu0 %v4328_v35 }
0x1770   :  { %2385 = vmatprep.subr.mxu0 %v4331_v36 }
0x1771   :  { %2386 = vmatpush1.msra.mxu0 %v4334_v37 }
0x1772   :  { %2595 = vmatprep.subr.mxu0 %v4290_v44 }
0x1822   :  { %v2197_v24 = vpop.f32.mrf.mxu0 }
0x1823   :  { %v2202_v18 = vadd.f32 %v2197_v24, %v2124_v17 }
0x1824   :  { %v2199_v44 = vpop.f32.mrf.mxu0 }
0x1825   :  { %v3177_v8 = vmul.f32 -1.442695, %v2202_v18  ;;  %v2209_v45 = vadd.f32 %v4449_v55, %v2199_v44 }
0x1827   :  { %3371 = vpow2.f32 %v3177_v8 }
0x1834   :  { %v3372_v21 = vpop.eup %3371 }
0x1835   :  { %v2206_v38 = vadd.f32 1.0, %v3372_v21 }
0x1837   :  { %3373 = vrcp.f32 %v2206_v38 }
0x1844   :  { %v3374_v41 = vpop.eup %3373 }
0x1845   :  { %v2210_v16 = vmul.f32 %v3374_v41, %v2209_v45  ;;  %v2213_v6 = vsub.f32 1.0, %v3374_v41  ;;  %v2219_v7 = vmul.f32 %v3374_v41, %v4553_v3 }
0x1847   :  { %v2211_v42 = vadd.f32 %v2210_v16, %v2128_v19 }
0x1849   :  { %3375 = vtanh.f32 %v2211_v42 }
0x1856   :  { %v3376_v50 = vpop.eup %3375 }
0x1857   :  { %2215 = vrot.lane.b32.xlu0 %v3376_v50, %s3540_s8 }
0x185b   :  { %2230 = vrot.lane.b32.xlu0 %v4423_v25, %s3539_s3  ;;  %v2240_v25 = vsel %vm402_vm3, %v4580_v2, %v4421_v28 }
0x18c9   :  { %v2216_v5 = vpop.permute.xlu0 %2215 }
0x18ca   :  { %v2218_v22 = vmul.f32 %v2216_v5, %v2213_v6 }
0x18cc   :  { %v4594_v49 = vadd.f32 %v2219_v7, %v2218_v22  ;;  %v2461_v7 = vsel %vm402_vm3, %v4431_v39, %v4495_v62 }
0x18cd   :  { %v2231_v54 = vpop.permute.xlu0 %2230 }
0x18ce   :  { %2222 = vrot.lane.b32.xlu1 %v4594_v49, %s3540_s8  ;;  %v2238_v53 = vsel %vm570_vm10, %v2237_v13, %v2231_v54 }
0x18d2   :  { %2234 = vrot.lane.b32.xlu1 %v4421_v28, %s3541_s5 }
0x1940   :  { %v2223_v1 = vpop.permute.xlu1 %2222 }
0x1941   :  { %2225 = vst.msk [vmem:[#allocation2 + $0x18] sm:$0xff] %vm402_vm3, %v2223_v1  ;;  %3178 = vmatmul.mubr.msk.f32.vlgmr.msra.gmra.mxu1 %vm570_vm10, %v2223_v1 }
0x1942   :  { %2484 = vmatpush1.msra.mxu1 %v4292_v57  ;;  %2531 = vmatprep.mubr.f32.mxu1 %v3538_v27 }
0x1943   :  { %2485 = vmatprep.subr.mxu1 %v4294_v46 }
0x1944   :  { %2486 = vmatpush1.msra.mxu1 %v4297_v11  ;;  %v2235_v52 = vpop.permute.xlu1 %2234 }
0x1945   :  { %2487 = vmatprep.subr.mxu1 %v4301_v47  ;;  %v2239_v60 = vsel %vm572_vm11, %v2238_v53, %v2235_v52 }
0x1946   :  { %2488 = vmatpush1.msra.mxu1 %v4304_v56 }
0x1947   :  { %2489 = vmatprep.subr.mxu1 %v4307_v63 }
0x1948   :  { %2490 = vmatpush1.msra.mxu1 %v4310_v29 }
0x1949   :  { %2491 = vmatprep.subr.mxu1 %v4313_v30 }
0x194a   :  { %2492 = vmatpush1.msra.mxu1 %v4316_v31 }
0x194b   :  { %2493 = vmatprep.subr.mxu1 %v4319_v32 }
0x194c   :  { %2494 = vmatpush1.msra.mxu1 %v4322_v33 }
0x194d   :  { %2495 = vmatprep.subr.mxu1 %v4325_v34 }
0x194e   :  { %2496 = vmatpush1.msra.mxu1 %v4328_v35 }
0x194f   :  { %2497 = vmatprep.subr.mxu1 %v4331_v36 }
0x1950   :  { %2498 = vmatpush1.msra.mxu1 %v4334_v37 }
0x1a01   :  { %v2309_v58 = vpop.f32.mrf.mxu1 }
0x1a02   :  { %v2314_v0 = vadd.f32 %v2309_v58, %v2239_v60 }
0x1a03   :  { %v2311_v24 = vpop.f32.mrf.mxu1 }
0x1a04   :  { %v3179_v12 = vmul.f32 -1.442695, %v2314_v0  ;;  %v2321_v18 = vadd.f32 %v4449_v55, %v2311_v24 }
0x1a06   :  { %3377 = vpow2.f32 %v3179_v12 }
0x1a13   :  { %v3378_v40 = vpop.eup %3377 }
0x1a14   :  { %v2318_v17 = vadd.f32 1.0, %v3378_v40 }
0x1a16   :  { %3379 = vrcp.f32 %v2318_v17 }
0x1a23   :  { %v3380_v8 = vpop.eup %3379 }
0x1a24   :  { %v2322_v21 = vmul.f32 %v3380_v8, %v2321_v18  ;;  %v2325_v48 = vsub.f32 1.0, %v3380_v8  ;;  %v2331_v41 = vmul.f32 %v3380_v8, %v4594_v49 }
0x1a26   :  { %v2323_v38 = vadd.f32 %v2322_v21, %v2240_v25 }
0x1a28   :  { %3381 = vtanh.f32 %v2323_v38 }
0x1a35   :  { %v3382_v44 = vpop.eup %3381 }
0x1a36   :  { %2327 = vrot.lane.b32.xlu0 %v3382_v44, %s3540_s8  ;;  %v2573_v44 = vsel %vm402_vm3, %v4435_v51, %v4451_v59 }
0x1a3a   :  { %2342 = vrot.lane.b32.xlu0 %v4427_v23, %s3539_s3 }
0x1aa8   :  { %v2328_v45 = vpop.permute.xlu0 %2327 }
0x1aa9   :  { %v2330_v16 = vmul.f32 %v2328_v45, %v2325_v48 }
0x1aab   :  { %v4630_v19 = vadd.f32 %v2331_v41, %v2330_v16 }
0x1aad   :  { %2334 = vrot.lane.b32.xlu1 %v4630_v19, %s3540_s8 }
0x1ab1   :  { %2346 = vrot.lane.b32.xlu1 %v4417_v26, %s3541_s5 }
0x1b1f   :  { %v2335_v28 = vpop.permute.xlu1 %2334 }
0x1b20   :  { %2337 = vst.msk [vmem:[#allocation2 + $0x20] sm:$0xff] %vm402_vm3, %v2335_v28  ;;  %3180 = vmatmul.mubr.msk.f32.vlgmr.msra.gmra.mxu0 %vm570_vm10, %v2335_v28 }
0x1b21   :  { %2596 = vmatpush1.msra.mxu0 %v4292_v57  ;;  %2643 = vmatprep.mubr.f32.mxu0 %v3538_v27  ;;  %v2343_v27 = vpop.permute.xlu0 %2342 }
0x1b22   :  { %2597 = vmatprep.subr.mxu0 %v4294_v46  ;;  %v2349_v46 = vsel %vm402_vm3, %v4427_v23, %v4541_v61 }
0x1b23   :  { %2598 = vmatpush1.msra.mxu0 %v4297_v11  ;;  %v2347_v57 = vpop.permute.xlu1 %2346  ;;  %v2350_v11 = vsel %vm570_vm10, %v2349_v46, %v2343_v27 }
0x1b24   :  { %2599 = vmatprep.subr.mxu0 %v4301_v47  ;;  %v2351_v47 = vsel %vm572_vm11, %v2350_v11, %v2347_v57 }
0x1b25   :  { %2600 = vmatpush1.msra.mxu0 %v4304_v56 }
0x1b26   :  { %2601 = vmatprep.subr.mxu0 %v4307_v63 }
0x1b27   :  { %2602 = vmatpush1.msra.mxu0 %v4310_v29 }
0x1b28   :  { %2603 = vmatprep.subr.mxu0 %v4313_v30 }
0x1b29   :  { %2604 = vmatpush1.msra.mxu0 %v4316_v31 }
0x1b2a   :  { %2605 = vmatprep.subr.mxu0 %v4319_v32 }
0x1b2b   :  { %2606 = vmatpush1.msra.mxu0 %v4322_v33 }
0x1b2c   :  { %2607 = vmatprep.subr.mxu0 %v4325_v34 }
0x1b2d   :  { %2608 = vmatpush1.msra.mxu0 %v4328_v35 }
0x1b2e   :  { %2609 = vmatprep.subr.mxu0 %v4331_v36  ;;  %v2352_v36 = vsel %vm402_vm3, %v4534_v14, %v4417_v26 }
0x1b2f   :  { %2610 = vmatpush1.msra.mxu0 %v4334_v37 }
0x1be0   :  { %v2421_v56 = vpop.f32.mrf.mxu0 }
0x1be1   :  { %v2426_v63 = vadd.f32 %v2421_v56, %v2351_v47 }
0x1be2   :  { %v2423_v32 = vpop.f32.mrf.mxu0 }
0x1be3   :  { %v3181_v29 = vmul.f32 -1.442695, %v2426_v63  ;;  %v2433_v33 = vadd.f32 %v4449_v55, %v2423_v32 }
0x1be5   :  { %3383 = vpow2.f32 %v3181_v29 }
0x1bf2   :  { %v3384_v30 = vpop.eup %3383 }
0x1bf3   :  { %v2430_v31 = vadd.f32 1.0, %v3384_v30 }
0x1bf5   :  { %3385 = vrcp.f32 %v2430_v31 }
0x1c02   :  { %v3386_v34 = vpop.eup %3385 }
0x1c03   :  { %v2434_v35 = vmul.f32 %v3386_v34, %v2433_v33  ;;  %v2437_v61 = vsub.f32 1.0, %v3386_v34  ;;  %v2443_v42 = vmul.f32 %v3386_v34, %v4630_v19  ;;  %v2741_v33 = vld [vmem:[%s4863_s15 + $0x38] sm:$0xff]  ;;  %v2740_v34 = vld [vmem:[%s4863_s15 + $0x30] sm:$0xff] }
0x1c04   :  { %3237 = vmatprep.subr.mxu1 %v2741_v33 }
0x1c05   :  { %v2435_v37 = vadd.f32 %v2434_v35, %v2352_v36  ;;  %v2737_v35 = vld [vmem:[%s4863_s15 + $0x18] sm:$0xff]  ;;  %v2736_v36 = vld [vmem:[%s4863_s15 + $0x10] sm:$0xff] }
0x1c07   :  { %3387 = vtanh.f32 %v2435_v37  ;;  %v2735_v37 = vld [vmem:[%s4863_s15 + $0x8] sm:$0xff] }
0x1c14   :  { %v3388_v23 = vpop.eup %3387 }
0x1c15   :  { %2439 = vrot.lane.b32.xlu0 %v3388_v23, %s3540_s8  ;;  %v2734_v23 = vld [vmem:[%s4863_s15] sm:$0xff] }
0x1c19   :  { %2454 = vrot.lane.b32.xlu0 %v4431_v39, %s3539_s3  ;;  %v2464_v39 = vsel %vm402_vm3, %v4488_v20, %v4412_v15 }
0x1c87   :  { %v2440_v2 = vpop.permute.xlu0 %2439 }
0x1c88   :  { %v2442_v50 = vmul.f32 %v2440_v2, %v2437_v61 }
0x1c8a   :  { %v4667_v6 = vadd.f32 %v2443_v42, %v2442_v50 }
0x1c8b   :  { %v2455_v14 = vpop.permute.xlu0 %2454 }
0x1c8c   :  { %2446 = vrot.lane.b32.xlu1 %v4667_v6, %s3540_s8  ;;  %v2462_v22 = vsel %vm570_vm10, %v2461_v7, %v2455_v14 }
0x1c90   :  { %2458 = vrot.lane.b32.xlu1 %v4412_v15, %s3541_s5 }
0x1cfe   :  { %v2447_v26 = vpop.permute.xlu1 %2446 }
0x1cff   :  { %2449 = vst.msk [vmem:[#allocation2 + $0x28] sm:$0xff] %vm402_vm3, %v2447_v26  ;;  %3182 = vmatmul.mubr.msk.f32.vlgmr.msra.gmra.mxu1 %vm570_vm10, %v2447_v26 }
0x1d00   :  { %3238 = vmatpush3.msra.mxu1 %v2741_v33 }
0x1d01   :  { %3239 = vmatprep.subr.mxu1 %v2740_v34 }
0x1d02   :  { %v2459_v5 = vpop.permute.xlu1 %2458  ;;  %3240 = vmatpush3.msra.mxu1 %v2740_v34 }
0x1d03   :  { %v2463_v1 = vsel %vm572_vm11, %v2462_v22, %v2459_v5 }
0x1dbf   :  { %v2533_v54 = vpop.f32.mrf.mxu1 }
0x1dc0   :  { %v2538_v52 = vadd.f32 %v2533_v54, %v2463_v1  ;;  %v2878_v1 = vld [vmem:[%s4878_s11] sm:$0xff] }
0x1dc1   :  { %v2535_v58 = vpop.f32.mrf.mxu1 }
0x1dc2   :  { %v3183_v13 = vmul.f32 -1.442695, %v2538_v52  ;;  %v2545_v0 = vadd.f32 %v4449_v55, %v2535_v58 }
0x1dc4   :  { %3389 = vpow2.f32 %v3183_v13  ;;  %v2895_v13 = vsub.f32 1.0, %v2878_v1 }
0x1dd1   :  { %v3390_v53 = vpop.eup %3389 }
0x1dd2   :  { %v2542_v60 = vadd.f32 1.0, %v3390_v53  ;;  %v2880_v53 = vld [vmem:[%s4878_s11 + $0x10] sm:$0xff] }
0x1dd4   :  { %3391 = vrcp.f32 %v2542_v60  ;;  %v2879_v60 = vld [vmem:[%s4878_s11 + $0x8] sm:$0xff] }
0x1de1   :  { %v3392_v12 = vpop.eup %3391 }
0x1de2   :  { %v2546_v40 = vmul.f32 %v3392_v12, %v2545_v0  ;;  %v2549_v24 = vsub.f32 1.0, %v3392_v12  ;;  %v2555_v8 = vmul.f32 %v3392_v12, %v4667_v6  ;;  %v2897_v0 = vsub.f32 1.0, %v2880_v53 }
0x1de3   :  { %v2896_v12 = vsub.f32 1.0, %v2879_v60 }
0x1de4   :  { %v2547_v62 = vadd.f32 %v2546_v40, %v2464_v39  ;;  %v2882_v40 = vld [vmem:[%s4878_s11 + $0x20] sm:$0xff]  ;;  %v2881_v39 = vld [vmem:[%s4878_s11 + $0x18] sm:$0xff] }
0x1de6   :  { %3393 = vtanh.f32 %v2547_v62  ;;  %v2899_v62 = vsub.f32 1.0, %v2882_v40 }
0x1df3   :  { %v3394_v17 = vpop.eup %3393 }
0x1df4   :  { %2551 = vrot.lane.b32.xlu0 %v3394_v17, %s3540_s8  ;;  %v2898_v17 = vsub.f32 1.0, %v2881_v39 }
0x1df8   :  { %2566 = vrot.lane.b32.xlu0 %v4435_v51, %s3539_s3  ;;  %v2576_v51 = vsel %vm402_vm3, %v4440_v43, %v4407_v4 }
0x1e66   :  { %v2552_v18 = vpop.permute.xlu0 %2551 }
0x1e67   :  { %v2554_v21 = vmul.f32 %v2552_v18, %v2549_v24  ;;  %v2884_v24 = vld [vmem:[%s4878_s11 + $0x30] sm:$0xff]  ;;  %v2883_v18 = vld [vmem:[%s4878_s11 + $0x28] sm:$0xff] }
0x1e69   :  { %v2556_v25 = vadd.f32 %v2555_v8, %v2554_v21  ;;  %v2901_v8 = vsub.f32 1.0, %v2884_v24  ;;  %v2900_v21 = vsub.f32 1.0, %v2883_v18 }
0x1e6a   :  { %v2567_v20 = vpop.permute.xlu0 %2566 }
0x1e6b   :  { %2558 = vrot.lane.b32.xlu1 %v2556_v25, %s3540_s8  ;;  %v2574_v48 = vsel %vm570_vm10, %v2573_v44, %v2567_v20  ;;  %v2678_v20 = vld [vmem:[#allocation2] sm:$0xff]  ;;  %v2679_v44 = vld [vmem:[#allocation2 + $0x8] sm:$0xff] }
0x1e6f   :  { %2570 = vrot.lane.b32.xlu1 %v4407_v4, %s3541_s5 }
0x1edd   :  { %v2559_v15 = vpop.permute.xlu1 %2558 }
0x1ede   :  { %2561 = vst.msk [vmem:[#allocation2 + $0x30] sm:$0xff] %vm402_vm3, %v2559_v15  ;;  %3184 = vmatmul.mubr.msk.f32.vlgmr.msra.gmra.mxu0 %vm570_vm10, %v2559_v15 }
0x1ee1   :  { %v2571_v38 = vpop.permute.xlu1 %2570 }
0x1ee2   :  { %v2575_v45 = vsel %vm572_vm11, %v2574_v48, %v2571_v38 }
0x1f9e   :  { %v2645_v41 = vpop.f32.mrf.mxu0 }
0x1f9f   :  { %v2650_v16 = vadd.f32 %v2645_v41, %v2575_v45  ;;  %v2680_v41 = vld [vmem:[#allocation2 + $0x10] sm:$0xff] }
0x1fa0   :  { %v2647_v46 = vpop.f32.mrf.mxu0 }
0x1fa1   :  { %v3185_v28 = vmul.f32 -1.442695, %v2650_v16  ;;  %v2657_v11 = vadd.f32 %v4449_v55, %v2647_v46  ;;  %v2682_v46 = vld [vmem:[#allocation2 + $0x20] sm:$0xff] }
0x1fa3   :  { %3395 = vpow2.f32 %v3185_v28 }
0x1fb0   :  { %v3396_v27 = vpop.eup %3395 }
0x1fb1   :  { %v2654_v57 = vadd.f32 1.0, %v3396_v27  ;;  %v2681_v27 = vld [vmem:[#allocation2 + $0x18] sm:$0xff] }
0x1fb3   :  { %3397 = vrcp.f32 %v2654_v57 }
0x1fc0   :  { %v3398_v47 = vpop.eup %3397 }
0x1fc1   :  { %v2658_v56 = vmul.f32 %v3398_v47, %v2657_v11  ;;  %v2661_v55 = vsub.f32 1.0, %v3398_v47  ;;  %v2667_v30 = vmul.f32 %v3398_v47, %v2556_v25 }
0x1fc3   :  { %v2659_v59 = vadd.f32 %v2658_v56, %v2576_v51  ;;  %v2683_v51 = vld [vmem:[#allocation2 + $0x28] sm:$0xff] }
0x1fc5   :  { %3399 = vtanh.f32 %v2659_v59 }
0x1fd2   :  { %v3400_v63 = vpop.eup %3399 }
0x1fd3   :  { %2663 = vrot.lane.b32.xlu0 %v3400_v63, %s3540_s8  ;;  %v2684_v63 = vld [vmem:[#allocation2 + $0x30] sm:$0xff] }
0x1fd7   :  { %2562 = vrot.lane.b32.xlu0 %v2556_v25, %s3539_s3  ;;  %v2885_v25 = vld [vmem:[%s4878_s11 + $0x38] sm:$0xff] }
0x1fd8   :  { %v2902_v15 = vsub.f32 1.0, %v2885_v25 }
0x1fdb   :  { %2338 = vrot.lane.b32.xlu0 %v4630_v19, %s3539_s3 }
0x1fdf   :  { %2106 = vrot.lane.b32.xlu0 %v4553_v3, %s3539_s3 }
0x1fe3   :  { %1866 = vrot.lane.b32.xlu0 %v4461_v10, %s3539_s3 }
0x2045   :  { %v2664_v29 = vpop.permute.xlu0 %2663 }
0x2046   :  { %v2666_v4 = vmul.f32 %v2664_v29, %v2661_v55 }
0x2048   :  { %v2668_v43 = vadd.f32 %v2667_v30, %v2666_v4 }
0x2049   :  { %v2563_v31 = vpop.permute.xlu0 %2562 }
0x204a   :  { %2565 = vst.msk [vmem:[#allocation3 + $0x8] sm:$0xff] %vm402_vm3, %v2563_v31  ;;  %2674 = vrot.lane.b32.xlu1 %v2668_v43, %s3539_s3 }
0x204d   :  { %v2339_v32 = vpop.permute.xlu0 %2338 }
0x204e   :  { %2341 = vst.msk [vmem:[#allocation3 + $0x18] sm:$0xff] %vm402_vm3, %v2339_v32  ;;  %2450 = vrot.lane.b32.xlu1 %v4667_v6, %s3539_s3  ;;  %v3186_v32 = vld [vmem:[%s4864_s16] ss:$0 sm:$0xff] }
0x2051   :  { %v2107_v3 = vpop.permute.xlu0 %2106  ;;  %v2687_v19 = vld [vmem:[#allocation3 + $0x8] sm:$0xff] }
0x2052   :  { %2109 = vst.msk [vmem:[#allocation3 + $0x28] sm:$0xff] %vm402_vm3, %v2107_v3  ;;  %2226 = vrot.lane.b32.xlu1 %v4594_v49, %s3539_s3  ;;  %2704 = vrot.lane.b32.xlu0 %v2687_v19, %s3539_s3  ;;  %v2739_v49 = vld [vmem:[%s4863_s15 + $0x28] sm:$0xff] }
0x2053   :  { %3241 = vmatprep.subr.mxu1 %v2739_v49 }
0x2054   :  { %3242 = vmatpush3.msra.mxu1 %v2739_v49 }
0x2055   :  { %v1867_v10 = vpop.permute.xlu0 %1866  ;;  %v2689_v22 = vld [vmem:[#allocation3 + $0x18] sm:$0xff] }
0x2056   :  { %1869 = vst.msk [vmem:[#allocation3 + $0x38] sm:$0xff] %vm402_vm3, %v1867_v10  ;;  %1986 = vrot.lane.b32.xlu1 %v4507_v9, %s3539_s3  ;;  %2670 = vrot.lane.b32.xlu0 %v2668_v43, %s3540_s8  ;;  %v2738_v9 = vld [vmem:[%s4863_s15 + $0x20] sm:$0xff] }
0x2057   :  { %3243 = vmatprep.subr.mxu1 %v2738_v9 }
0x2058   :  { %3244 = vmatpush3.msra.mxu1 %v2738_v9 }
0x2059   :  { %3245 = vmatprep.subr.mxu1 %v2737_v35  ;;  %v2691_v52 = vld [vmem:[#allocation3 + $0x28] sm:$0xff] }
0x205a   :  { %3246 = vmatpush3.msra.mxu1 %v2737_v35 }
0x205b   :  { %3247 = vmatprep.subr.mxu1 %v2736_v36 }
0x205c   :  { %3248 = vmatpush3.msra.mxu1 %v2736_v36 }
0x205d   :  { %3249 = vmatprep.subr.mxu1 %v2735_v37  ;;  %v2693_v58 = vld [vmem:[#allocation3 + $0x38] sm:$0xff] }
0x205e   :  { %3250 = vmatpush3.msra.mxu1 %v2735_v37 }
0x205f   :  { %3251 = vmatprep.subr.mxu1 %v2734_v23 }
0x2060   :  { %3252 = vmatpush3.msra.mxu1 %v2734_v23  ;;  %v2887_v23 = vld [vmem:[%s4852_s4 + $0x4] sm:$0xf] }
0x20bc   :  { %v2675_v61 = vpop.permute.xlu1 %2674 }
0x20bd   :  { %2677 = vst.msk [vmem:[#allocation3] sm:$0xff] %vm402_vm3, %v2675_v61 }
0x20c0   :  { %v2451_v2 = vpop.permute.xlu1 %2450 }
0x20c1   :  { %2453 = vst.msk [vmem:[#allocation3 + $0x10] sm:$0xff] %vm402_vm3, %v2451_v2 }
0x20c4   :  { %v2227_v42 = vpop.permute.xlu1 %2226  ;;  %v2705_v50 = vpop.permute.xlu0 %2704  ;;  %v2686_v6 = vld [vmem:[#allocation3] sm:$0xff] }
0x20c5   :  { %2229 = vst.msk [vmem:[#allocation3 + $0x20] sm:$0xff] %vm402_vm3, %v2227_v42  ;;  %2702 = vrot.lane.b32.xlu1 %v2686_v6, %s3539_s3  ;;  %v2727_v45 = vsel %vm402_vm3, %v2679_v44, %v2705_v50  ;;  %v2886_v6 = vld [vmem:[%s4852_s4] sm:$0xf] }
0x20c8   :  { %v1987_v26 = vpop.permute.xlu1 %1986  ;;  %v2671_v14 = vpop.permute.xlu0 %2670  ;;  %v2688_v5 = vld [vmem:[#allocation3 + $0x10] sm:$0xff] }
0x20c9   :  { %1989 = vst.msk [vmem:[#allocation3 + $0x30] sm:$0xff] %vm402_vm3, %v1987_v26  ;;  %2673 = vst.msk [vmem:[#allocation2 + $0x38] sm:$0xff] %vm402_vm3, %v2671_v14  ;;  %2706 = vrot.lane.b32.xlu1 %v2688_v5, %s3539_s3 }
0x20cc   :  { %v2690_v7 = vld [vmem:[#allocation3 + $0x20] sm:$0xff] }
0x20cd   :  { %2710 = vrot.lane.b32.xlu0 %v2690_v7, %s3539_s3  ;;  %2708 = vrot.lane.b32.xlu1 %v2689_v22, %s3539_s3 }
0x20d0   :  { %v2692_v54 = vld [vmem:[#allocation3 + $0x30] sm:$0xff]  ;;  %v2685_v43 = vld [vmem:[#allocation2 + $0x38] sm:$0xff] }
0x20d1   :  { %2714 = vrot.lane.b32.xlu0 %v2692_v54, %s3539_s3  ;;  %2712 = vrot.lane.b32.xlu1 %v2691_v52, %s3539_s3 }
0x20d5   :  { %2905 = vperm.xlu0 %3287, %v2895_v13   ;;  %2716 = vrot.lane.b32.xlu1 %v2693_v58, %s3539_s3 }
0x20d9   :  { %2915 = vperm.xlu0 %3287, %v2897_v0   ;;  %2910 = vperm.xlu1 %3288, %v2896_v12   ;;  %v2889_v12 = vld [vmem:[%s4852_s4 + $0xc] sm:$0xf] }
0x20dd   :  { %2925 = vperm.xlu0 %3287, %v2899_v62   ;;  %2920 = vperm.xlu1 %3288, %v2898_v17   ;;  %v2894_v17 = vld [vmem:[#allocation4] sm:$0xf] }
0x20e1   :  { %2935 = vperm.xlu0 %3287, %v2901_v8   ;;  %2930 = vperm.xlu1 %3288, %v2900_v21  }
0x20e5   :  { %2940 = vperm.xlu1 %3288, %v2902_v15   ;;  %v2888_v15 = vld [vmem:[%s4852_s4 + $0x8] sm:$0xf] }
0x2137   :  { %v2703_v38 = vpop.permute.xlu1 %2702 }
0x2138   :  { %v2726_v48 = vsel %vm402_vm3, %v2678_v20, %v2703_v38 }
0x2139   :  { %3253 = vmatprep.mubr.msk.f32.mxu1 %vm570_vm10, %v2726_v48 }
0x213a   :  { %3254 = vmatmul.mubr.msk.f32.vlgmr.msra.gmra.mxu1 %vm570_vm10, %v2727_v45 }
0x213b   :  { %v2707_v16 = vpop.permute.xlu1 %2706 }
0x213c   :  { %v2728_v28 = vsel %vm402_vm3, %v2680_v41, %v2707_v16  ;;  %v2891_v41 = vld [vmem:[%s4852_s4 + $0x14] sm:$0xf] }
0x213d   :  { %3256 = vmatprep.mubr.msk.f32.mxu1 %vm570_vm10, %v2728_v28 }
0x213f   :  { %v2709_v57 = vpop.permute.xlu1 %2708  ;;  %v2711_v11 = vpop.permute.xlu0 %2710 }
0x2140   :  { %v2729_v47 = vsel %vm402_vm3, %v2681_v27, %v2709_v57  ;;  %v2730_v56 = vsel %vm402_vm3, %v2682_v46, %v2711_v11 }
0x2141   :  { %3257 = vmatmul.mubr.msk.f32.gmra.mxu1 %vm570_vm10, %v2729_v47 }
0x2142   :  { %3259 = vmatprep.mubr.msk.f32.mxu1 %vm570_vm10, %v2730_v56 }
0x2143   :  { %v2713_v59 = vpop.permute.xlu1 %2712  ;;  %v2715_v55 = vpop.permute.xlu0 %2714 }
0x2144   :  { %v2731_v29 = vsel %vm402_vm3, %v2683_v51, %v2713_v59  ;;  %v2732_v30 = vsel %vm402_vm3, %v2684_v63, %v2715_v55 }
0x2145   :  { %3260 = vmatmul.mubr.msk.f32.gmra.mxu1 %vm570_vm10, %v2731_v29 }
0x2146   :  { %3262 = vmatprep.mubr.msk.f32.mxu1 %vm570_vm10, %v2732_v30 }
0x2147   :  { %v2717_v4 = vpop.permute.xlu1 %2716 }
0x2148   :  { %v2733_v31 = vsel %vm402_vm3, %v2685_v43, %v2717_v4  ;;  %v2890_v4 = vld [vmem:[%s4852_s4 + $0x10] sm:$0xf]  ;;  %vm3025_vm3 = vcmask 1044352  }
0x2149   :  { %3263 = vmatmul.mubr.msk.f32.gmra.mxu1 %vm570_vm10, %v2733_v31 }
0x2150   :  { %v2906_v33 = vpop.permute.xlu0 %2905 }
0x2154   :  { %v2911_v3 = vpop.permute.xlu1 %2910  ;;  %v2916_v50 = vpop.permute.xlu0 %2915 }
0x2158   :  { %v2921_v37 = vpop.permute.xlu1 %2920  ;;  %v2926_v62 = vpop.permute.xlu0 %2925 }
0x215c   :  { %v2931_v13 = vpop.permute.xlu1 %2930  ;;  %v2936_v63 = vpop.permute.xlu0 %2935 }
0x2160   :  { %v2941_v27 = vpop.permute.xlu1 %2940 }
0x21fa   :  { %v3255_v19 = vpop.f32.mrf.mxu1 }
0x21fb   :  { %v2845_v10 = vadd.f32 %v3255_v19, %v3186_v32 }
0x21fc   :  { %v2839_v34 = vpop.f32.mrf.mxu1 }
0x21fd   :  { %v2944_v49 = vmul.f32 %v2911_v3, %v2845_v10  ;;  %v2840_v9 = vadd.f32 %v3186_v32, %v2839_v34 }
0x21ff   :  { %v2960_v35 = vrot.slane %v2944_v49, 4  ;;  %v2943_v36 = vmul.f32 %v2906_v33, %v2840_v9 }
0x2201   :  { %v2959_v61 = vrot.slane %v2943_v36, 4  ;;  %v3258_v2 = vpop.f32.mrf.mxu1  ;;  %v2976_v42 = vadd.f32 %v2960_v35, %v2944_v49 }
0x2202   :  { %v2855_v26 = vadd.f32 %v3258_v2, %v3186_v32 }
0x2203   :  { %v2975_v14 = vadd.f32 %v2959_v61, %v2943_v36  ;;  %2986 = vrot.lane.b32.xlu1 %v2976_v42, %s3535_s30  ;;  %v3028_v5 = vsub.f32 %v2976_v42, %v2887_v23  ;;  %v2849_v7 = vpop.f32.mrf.mxu1  ;;  %v2892_v23 = vld [vmem:[%s4852_s4 + $0x18] sm:$0xf] }
0x2204   :  { %v2946_v22 = vmul.f32 %v2921_v37, %v2855_v26  ;;  %v2850_v1 = vadd.f32 %v3186_v32, %v2849_v7 }
0x2205   :  { %v3027_v54 = vsub.f32 %v2975_v14, %v2886_v6  ;;  %2984 = vst.msk [vmem:[#allocation13] sm:$0xf] %vm2983_vm12, %v2975_v14  ;;  %v3261_v52 = vpop.f32.mrf.mxu1  ;;  %v3036_v40 = vmul.f32 %v3028_v5, %v3028_v5 }
0x2206   :  { %v2962_v53 = vrot.slane %v2946_v22, 4  ;;  %v2945_v60 = vmul.f32 %v2916_v50, %v2850_v1  ;;  %v2865_v58 = vadd.f32 %v3261_v52, %v3186_v32 }
0x2207   :  { %v3035_v0 = vmul.f32 %v3027_v54, %v3027_v54  ;;  %v2859_v39 = vpop.f32.mrf.mxu1  ;;  %v3044_v46 = vmul.f32 %v3036_v40, %v2894_v17 }
0x2208   :  { %v2978_v24 = vadd.f32 %v2962_v53, %v2946_v22  ;;  %v2961_v18 = vrot.slane %v2945_v60, 4  ;;  %v2948_v8 = vmul.f32 %v2931_v13, %v2865_v58  ;;  %v2860_v21 = vadd.f32 %v3186_v32, %v2859_v39 }
0x2209   :  { %v3043_v25 = vmul.f32 %v3035_v0, %v2894_v17  ;;  %v3264_v20 = vpop.f32.mrf.mxu1  ;;  %v3052_v10 = vsel %vm2983_vm12, %v3044_v46, 0.0 }
0x220a   :  { %v3030_v38 = vsub.f32 %v2978_v24, %v2889_v12  ;;  %v2977_v44 = vadd.f32 %v2961_v18, %v2945_v60  ;;  %v2964_v48 = vrot.slane %v2948_v8, 4  ;;  %v2947_v45 = vmul.f32 %v2926_v62, %v2860_v21 }
0x220b   :  { %v2875_v16 = vadd.f32 %v3264_v20, %v3186_v32  ;;  %v2869_v28 = vpop.f32.mrf.mxu1  ;;  %v3051_v55 = vsel %vm2983_vm12, %v3043_v25, 0.0 }
0x220c   :  { %v3038_v57 = vmul.f32 %v3030_v38, %v3030_v38  ;;  %v3029_v11 = vsub.f32 %v2977_v44, %v2888_v15  ;;  %v2980_v47 = vadd.f32 %v2964_v48, %v2948_v8  ;;  %2992 = vrot.lane.b32.xlu1 %v2977_v44, %s3539_s3  ;;  %v2963_v56 = vrot.slane %v2947_v45, 4 }
0x220d   :  { %v2950_v51 = vmul.f32 %v2941_v27, %v2875_v16  ;;  %v2870_v59 = vadd.f32 %v3186_v32, %v2869_v28  ;;  %v2893_v32 = vld [vmem:[%s4852_s4 + $0x1c] sm:$0xf]  ;;  %v3053_v49 = vadd.f32 %v3052_v10, %v3051_v55  ;;  %s3544_s4 = smov 112  }
0x220e   :  { %v3037_v29 = vmul.f32 %v3029_v11, %v3029_v11  ;;  %v3032_v30 = vsub.f32 %v2980_v47, %v2891_v41  ;;  %v2979_v43 = vadd.f32 %v2963_v56, %v2947_v45  ;;  %v3046_v19 = vmul.f32 %v3038_v57, %v2894_v17 }
0x220f   :  { %v2966_v31 = vrot.slane %v2950_v51, 4  ;;  %v2949_v3 = vmul.f32 %v2936_v63, %v2870_v59 }
0x2210   :  { %v3045_v33 = vmul.f32 %v3037_v29, %v2894_v17  ;;  %v3040_v34 = vmul.f32 %v3032_v30, %v3032_v30  ;;  %2998 = vrot.lane.b32.xlu1 %v2978_v24, %s3542_s26  ;;  %v3031_v9 = vsub.f32 %v2979_v43, %v2890_v4  ;;  %v3056_v6 = vsel %vm2983_vm12, %v3046_v19, 0.0 }
0x2211   :  { %v2982_v35 = vadd.f32 %v2966_v31, %v2950_v51  ;;  %v2965_v36 = vrot.slane %v2949_v3, 4 }
0x2212   :  { %v3054_v37 = vsel %vm2983_vm12, %v3045_v33, 0.0  ;;  %v3039_v2 = vmul.f32 %v3031_v9, %v3031_v9  ;;  %v3048_v26 = vmul.f32 %v3040_v34, %v2894_v17 }
0x2213   :  { %v3055_v61 = vadd.f32 %v3054_v37, %v3053_v49  ;;  %v3034_v42 = vsub.f32 %v2982_v35, %v2893_v32  ;;  %v2981_v50 = vadd.f32 %v2965_v36, %v2949_v3 }
0x2214   :  { %3004 = vrot.lane.b32.xlu1 %v2979_v43, %s3540_s8  ;;  %v3047_v14 = vmul.f32 %v3039_v2, %v2894_v17  ;;  %v3060_v60 = vsel %vm2983_vm12, %v3048_v26, 0.0  ;;  %s3545_s8 = smov 0.0  }
0x2215   :  { %v3042_v5 = vmul.f32 %v3034_v42, %v3034_v42  ;;  %v3033_v7 = vsub.f32 %v2981_v50, %v2892_v23  ;;  %v3057_v22 = vadd.f32 %v3056_v6, %v3055_v61  ;;  %3078 = sst [smem:[#allocation15]] %s3545_s8 }
0x2216   :  { %v3058_v54 = vsel %vm2983_vm12, %v3047_v14, 0.0  ;;  %3104 = dma.smem_to_hbm %s3546_s29, 16, %s4867_s19, [#allocation16]  }
0x2217   :  { %v3041_v1 = vmul.f32 %v3033_v7, %v3033_v7  ;;  %v3059_v52 = vadd.f32 %v3058_v54, %v3057_v22  ;;  %v3050_v53 = vmul.f32 %v3042_v5, %v2894_v17 }
0x2218   :  { %3010 = vrot.lane.b32.xlu1 %v2980_v47, %s3543_s28 }
0x2219   :  { %v3049_v13 = vmul.f32 %v3041_v1, %v2894_v17  ;;  %v3061_v58 = vadd.f32 %v3060_v60, %v3059_v52  ;;  %v3064_v40 = vsel %vm2983_vm12, %v3050_v53, 0.0 }
0x221b   :  { %v3062_v0 = vsel %vm2983_vm12, %v3049_v13, 0.0 }
0x221c   :  { %3016 = vrot.lane.b32.xlu1 %v2981_v50, %s3541_s5  ;;  %v3063_v12 = vadd.f32 %v3062_v0, %v3061_v58  ;;  %s3547_s5 = smov [#allocation13]  }
0x221d   :  { %s3085_s21 = sshll.u32 %s3547_s5, 4  ;;  %s3086_s21 = int_to_ptr.vmem [resolvable:$true] %s3085_s21 }
0x221e   :  { %v3065_v39 = vadd.f32 %v3064_v40, %v3063_v12  ;;  %s3489_s19 = scalar_lea.vmem %s3086_s21, 64  ;;  %p3494_p7 = scmp.lt.s32.totalorder %s3086_s21, %s3086_s21 }
0x221f   :  { %p3490_p6 = scmp.ne.s32.totalorder %s3086_s21, %s3489_s19  ;;  %p3495_p8 = scmp.lt.s32.totalorder %s3489_s19, %s3489_s19 }
0x2220   :  { %3066 = vadd.xlane.f32.xlu0 %v3065_v39  ;;  %3022 = vrot.lane.b32.xlu1 %v2982_v35, %s3544_s4 }
0x2221   :  { %p3496_p9 = por %p3495_p8, %p3494_p7 }
0x2223   :  { %p3497_p10 = pnand %p3496_p9, %p3490_p6 }
0x2275   :  { %v2987_v62 = vpop.permute.xlu1 %2986 }
0x2276   :  { %2990 = vst.msk [vmem:[#allocation13] sm:$0xf] %vm2989_vm13, %v2987_v62 }
0x227e   :  { %v2993_v17 = vpop.permute.xlu1 %2992 }
0x227f   :  { %2996 = vst.msk [vmem:[#allocation13] sm:$0xf] %vm2995_vm14, %v2993_v17 }
0x2282   :  { %v2999_v24 = vpop.permute.xlu1 %2998 }
0x2283   :  { %3002 = vst.msk [vmem:[#allocation13] sm:$0xf] %vm3001_vm15, %v2999_v24 }
0x2286   :  { %v3005_v18 = vpop.permute.xlu1 %3004 }
0x2287   :  { %3008 = vst.msk [vmem:[#allocation13] sm:$0xf] %vm3007_vm0, %v3005_v18 }
0x228a   :  { %v3011_v8 = vpop.permute.xlu1 %3010 }
0x228b   :  { %3014 = vst.msk [vmem:[#allocation13] sm:$0xf] %vm3013_vm1, %v3011_v8 }
0x228e   :  { %v3017_v21 = vpop.permute.xlu1 %3016 }
0x228f   :  { %3020 = vst.msk [vmem:[#allocation13] sm:$0xf] %vm3019_vm2, %v3017_v21 }
0x2292   :  { %v3023_v25 = vpop.permute.xlu1 %3022 }
0x2293   :  { %3026 = vst.msk [vmem:[#allocation13] sm:$0xf] %vm3025_vm3, %v3023_v25 }
0x2294   :  { %3500 = shalt.err (!%p3497_p10)
}
0x2295   :  { %3088 = dma.vmem_to_hbm [thread:$0]  %s3086_s21, 64, %s4865_s17, [#allocation6]  }
0x2296   :  { %s3548_s23 = smov [#allocation14]  }
0x22a9   :  { %v3067_v15 = vpop.xlane.xlu0 %3066 }
0x22aa   :  { %v3068_v20 = vrot.slane %v3067_v15, 4 }
0x22ac   :  { %v3069_v38 = vadd.f32 %v3068_v20, %v3067_v15 }
0x22ae   :  { %v3070_v44 = vrot.slane %v3069_v38, 2 }
0x22b0   :  { %v3071_v48 = vadd.f32 %v3070_v44, %v3069_v38 }
0x22b2   :  { %v3072_v45 = vrot.slane %v3071_v48, 1 }
0x22b4   :  { %v3073_v41 = vadd.f32 %v3072_v45, %v3071_v48 }
0x22b6   :  { %3265 = vpush %v3073_v41 }
0x22e7   :  { %s3266_s2 = spop %3265 }
0x22e8   :  { %3076 = sst [smem:[#allocation14]] %s3266_s2 }
0x22e9   :  { %3096 = dma.smem_to_hbm %s3548_s23, 16, %s4866_s18, [#allocation7]  }
0x22ea   :  { %3523 = dma.done.wait [#allocation6], 64  }
0x22eb   :  { %3524 = vsyncadd [#allocation6], 4294967232 }
0x22ec   :  { %3525 = dma.done.wait [#allocation7], 16  }
0x22ed   :  { %3526 = vsyncadd [#allocation7], 4294967280 }
0x22ee   :  { %3527 = dma.done.wait [#allocation16], 16  }
0x22ef   :  { %3528 = vsyncadd [#allocation16], 4294967280 }
0x22f0   :  { %3114 = sfence }
0x22f1   :  { %3115 = vsyncpa [#allocation5], 1 }
0x22f2   :  { %3116 = vsyncpa [#allocation9], 1 }
0x22f3   :  { %3117 = vsyncpa [#allocation12], 1 }
0x22f4   :  { %3118 = vsyncpa [#allocation6], 1 }
0x22f5   :  { %3119 = vsyncpa [#allocation7], 1 }
0x22f6   :  { %3120 = vsyncpa [#allocation16], 1 }

</bundles_post_ra>
